<compile_context>
chip_gen: v7x
topology: tpu7x:2x2x1
jax: 0.10.0
libtpu: 0.0.40
codegen_flags: <defaults>
</compile_context>

<pallas_src>
import functools

import jax
import jax.numpy as jnp
from jax import lax
from jax.experimental import pallas as pl
from jax.experimental.pallas import tpu as pltpu


def _pad(n, m):
    return ((n + m - 1) // m) * m


def _block_bytes(shape, itemsize):
    """Padded VMEM bytes of one block (last two dims padded to (8, 128))."""
    *lead, sub, lane = shape
    n = 1
    for d in lead:
        n *= d
    return n * _pad(sub, 8) * _pad(lane, 128) * itemsize


_VMEM_CAP = None


def _vmem_capacity_bytes():
    global _VMEM_CAP
    if _VMEM_CAP is None:
        try:
            _VMEM_CAP = int(pltpu.get_tpu_info().vmem_capacity_bytes)
        except Exception:
            _VMEM_CAP = 64 * 1024 * 1024  # conservative fallback (v7x-sized)
    return _VMEM_CAP


def _pick_group_tile(n, block_bytes_fn, target_bytes):
    """Largest divisor cb of n with cb % 8 == 0 (or cb == n, i.e. untiled along
    the sublane axis of the output block) whose (in + out) block fits the byte
    budget; prefers >= 2 grid steps so both v7x TensorCores get work."""
    cands = [d for d in range(1, n + 1)
             if n % d == 0 and (d % 8 == 0 or d == n)]
    within = [d for d in cands if block_bytes_fn(d) <= target_bytes]
    multi = [d for d in within if n // d >= 2]
    if multi:
        return max(multi)
    if within:
        return max(within)
    return min(cands)


def _squeeze_kernel(x_ref, o_ref, *, factor):
    """x_ref: (cb, OH, f*W)  ->  o_ref: (cb, f*f*OH*OW), k = ki*f + kj major."""
    f = factor
    cb, oh, fw = x_ref.shape
    w = fw // f
    ow = w // f
    x = x_ref[...]                                           # (cb, OH, f*W)
    slabs = []
    for ki in range(f):
        # rows oh*f + ki live in lane range [ki*w, (ki+1)*w) of super-row oh.
        xi = lax.slice(x, (0, 0, ki * w), (cb, oh, (ki + 1) * w))   # (cb, OH, W)
        xi = xi.reshape(cb, oh, ow, f)                              # split kj
        for kj in range(f):
            s = lax.slice(xi, (0, 0, 0, kj), (cb, oh, ow, kj + 1))
            slabs.append(s.reshape(cb, oh * ow))                    # (cb, L)
    # Lane-dense output: index k*L + (oh*OW + ow), k = ki*f + kj (F.unfold order).
    o_ref[...] = jnp.concatenate(slabs, axis=-1).astype(o_ref.dtype)


def _unsqueeze_kernel(x_ref, o_ref, *, factor, h, w):
    """x_ref: (cb, f*f, h*w)  ->  o_ref: (cb, (h*f)*(w*f)) lane-dense."""
    f = factor
    cb = x_ref.shape[0]
    hw = h * w
    x = x_ref[...]                                           # (cb, f*f, h*w)
    rows = []
    for ki in range(f):
        cols = []
        for kj in range(f):
            k = ki * f + kj
            cols.append(lax.slice(x, (0, k, 0), (cb, k + 1, hw)).reshape(cb, hw))
        # interleave kj along the lane axis: (cb, hw, f) -> (cb, h, w*f)
        rows.append(jnp.stack(cols, axis=-1).reshape(cb, h, w * f))
    # interleave ki between output rows: (cb, h, f, w*f) -> flat (cb, h*f*w*f)
    y = jnp.stack(rows, axis=2).reshape(cb, f * f * hw)
    o_ref[...] = y.astype(o_ref.dtype)


@functools.partial(jax.jit, static_argnames=("factor", "reverse", "max_block_bytes"))
def squeeze(x, factor=2, reverse=False, max_block_bytes=None):
    """Pallas equivalent of Squeeze.forward(x, reverse)."""
    b, c, h, w = x.shape
    f = factor
    itemsize = jnp.dtype(x.dtype).itemsize
    cap = _vmem_capacity_bytes()
    if max_block_bytes is None:
        # ~1-4 MiB (in+out) blocks reach >=85% of the HBM roofline; keep well
        # inside v7x's 64 MiB VMEM once double-buffering + temporaries count.
        max_block_bytes = min(4 * 1024 * 1024, cap // 24)
    vmem_limit = min(cap // 2, 64 * 1024 * 1024)
    params = pltpu.CompilerParams(dimension_semantics=("parallel",),
                                  vmem_limit_bytes=vmem_limit)

    if not reverse:
        assert h % f == 0 and w % f == 0
        oh, ow = h // f, w // f
        L = oh * ow
        n = b * c
        xr = x.reshape(n, oh, f * w)                 # free, contiguous reshape

        def blk_bytes(cb):
            return (_block_bytes((cb, oh, f * w), itemsize)
                    + _block_bytes((cb, f * f * L), itemsize))

        cb = _pick_group_tile(n, blk_bytes, max_block_bytes)
        out = pl.pallas_call(
            functools.partial(_squeeze_kernel, factor=f),
            out_shape=jax.ShapeDtypeStruct((n, f * f * L), x.dtype),
            grid=(n // cb,),
            in_specs=[pl.BlockSpec((cb, oh, f * w), lambda i: (i, 0, 0))],
            out_specs=pl.BlockSpec((cb, f * f * L), lambda i: (i, 0)),
            compiler_params=params,
        )(xr)
        return out.reshape(b, c * f * f, oh, ow)     # free, contiguous reshape
    else:
        assert c % (f * f) == 0
        c0 = c // (f * f)
        hw = h * w
        n = b * c0
        xr = x.reshape(n, f * f, hw)                 # free, contiguous reshape

        def blk_bytes(cb):
            return (_block_bytes((cb, f * f, hw), itemsize)
                    + _block_bytes((cb, f * f * hw), itemsize))

        cb = _pick_group_tile(n, blk_bytes, max_block_bytes)
        out = pl.pallas_call(
            functools.partial(_unsqueeze_kernel, factor=f, h=h, w=w),
            out_shape=jax.ShapeDtypeStruct((n, f * f * hw), x.dtype),
            grid=(n // cb,),
            in_specs=[pl.BlockSpec((cb, f * f, hw), lambda i: (i, 0, 0))],
            out_specs=pl.BlockSpec((cb, f * f * hw), lambda i: (i, 0)),
            compiler_params=params,
        )(xr)
        return out.reshape(b, c0, h * f, w * f)      # free, contiguous reshape


def _squeeze_ref(x, factor=2):
    """Pure-JAX reference matching F.unfold(kernel=f, stride=f) + reshape."""
    b, c, h, w = x.shape
    f = factor
    x = x.reshape(b, c, h // f, f, w // f, f)
    x = jnp.transpose(x, (0, 1, 3, 5, 2, 4))
    return x.reshape(b, c * f * f, h // f, w // f)


def _unsqueeze_ref(x, factor=2):
    """Pure-JAX reference matching F.fold (non-overlapping windows)."""
    b, c, h, w = x.shape
    f = factor
    c0 = c // (f * f)
    x = x.reshape(b, c0, f, f, h, w)
    x = jnp.transpose(x, (0, 1, 4, 2, 5, 3))
    return x.reshape(b, c0, h * f, w * f)


if __name__ == "__main__":
    factor = 2
    key = jax.random.PRNGKey(0)
    k1, k2 = jax.random.split(key)

    # Case 1: shapes implied by the module (B=2, C=4, 16x16 spatial).
    B, C, H, W = 2, 4, 16, 16
    x = jax.random.normal(k1, (B, C, H, W), dtype=jnp.float32)

    y = jax.block_until_ready(squeeze(x, factor=factor, reverse=False))
    x_rec = jax.block_until_ready(squeeze(y, factor=factor, reverse=True))

    assert y.shape == (B, C * factor * factor, H // factor, W // factor)
    assert jnp.allclose(y, _squeeze_ref(x, factor)), "squeeze mismatch vs reference"
    assert jnp.allclose(x_rec, _unsqueeze_ref(y, factor)), "unsqueeze mismatch vs ref"
    assert jnp.allclose(x_rec, x), "reverse (fold) did not invert squeeze"

    # Case 2: force a multi-step tiled grid (cb < B*C) to exercise the tiling path.
    x2 = jax.random.normal(k2, (2, 8, 16, 16), dtype=jnp.float32)
    small = 64 * 1024  # tiny budget -> cb=8, 2 grid steps
    y2 = jax.block_until_ready(
        squeeze(x2, factor=factor, reverse=False, max_block_bytes=small))
    x2_rec = jax.block_until_ready(
        squeeze(y2, factor=factor, reverse=True, max_block_bytes=small))
    assert jnp.allclose(y2, _squeeze_ref(x2, factor)), "tiled squeeze mismatch"
    assert jnp.allclose(x2_rec, x2), "tiled reverse mismatch"

    print("KERNEL_OK")
</pallas_src>

<mosaic_0001>
module attributes {stable_mosaic.version = 11 : i64} {
  func.func @_squeeze_kernel(%arg0: i32, %arg1: memref<8x8x32xf32, #tpu.memory_space<vmem>>, %arg2: memref<8x256xf32, #tpu.memory_space<vmem>>) attributes {dimension_semantics = [#tpu.dimension_semantics<parallel>], iteration_bounds = array<i64: 1>, scalar_prefetch = 0 : i64, scratch_operands = 0 : i64, tpu.core_type = #tpu.core_type<tc>, window_params = [{transform_indices = @transform_0, window_bounds = array<i64: 8, 8, 32>}, {transform_indices = @transform_1, window_bounds = array<i64: 8, 256>}]} {
    %c0 = arith.constant 0 : index
    %c0_0 = arith.constant 0 : index
    %c0_1 = arith.constant 0 : index
    %0 = vector.load %arg1[%c0, %c0_0, %c0_1] : memref<8x8x32xf32, #tpu.memory_space<vmem>>, vector<8x8x32xf32>
    %1 = vector.extract_strided_slice %0 {offsets = [0, 0, 0], sizes = [8, 8, 16], strides = [1, 1, 1]} : vector<8x8x32xf32> to vector<8x8x16xf32>
    %2 = vector.shape_cast %1 : vector<8x8x16xf32> to vector<8x8x8x2xf32>
    %3 = vector.extract_strided_slice %2 {offsets = [0, 0, 0, 0], sizes = [8, 8, 8, 1], strides = [1, 1, 1, 1]} : vector<8x8x8x2xf32> to vector<8x8x8x1xf32>
    %4 = vector.shape_cast %3 : vector<8x8x8x1xf32> to vector<8x64xf32>
    %5 = vector.extract_strided_slice %2 {offsets = [0, 0, 0, 1], sizes = [8, 8, 8, 1], strides = [1, 1, 1, 1]} : vector<8x8x8x2xf32> to vector<8x8x8x1xf32>
    %6 = vector.shape_cast %5 : vector<8x8x8x1xf32> to vector<8x64xf32>
    %7 = vector.extract_strided_slice %0 {offsets = [0, 0, 16], sizes = [8, 8, 16], strides = [1, 1, 1]} : vector<8x8x32xf32> to vector<8x8x16xf32>
    %8 = vector.shape_cast %7 : vector<8x8x16xf32> to vector<8x8x8x2xf32>
    %9 = vector.extract_strided_slice %8 {offsets = [0, 0, 0, 0], sizes = [8, 8, 8, 1], strides = [1, 1, 1, 1]} : vector<8x8x8x2xf32> to vector<8x8x8x1xf32>
    %10 = vector.shape_cast %9 : vector<8x8x8x1xf32> to vector<8x64xf32>
    %11 = vector.extract_strided_slice %8 {offsets = [0, 0, 0, 1], sizes = [8, 8, 8, 1], strides = [1, 1, 1, 1]} : vector<8x8x8x2xf32> to vector<8x8x8x1xf32>
    %12 = vector.shape_cast %11 : vector<8x8x8x1xf32> to vector<8x64xf32>
    %13 = tpu.concatenate %4, %6, %10, %12 in 1 : vector<8x64xf32>, vector<8x64xf32>, vector<8x64xf32>, vector<8x64xf32> -> vector<8x256xf32>
    %c0_2 = arith.constant 0 : index
    %c0_3 = arith.constant 0 : index
    %14 = vector.load %arg2[%c0_2, %c0_3] : memref<8x256xf32, #tpu.memory_space<vmem>>, vector<8x256xf32>
    tpu.vector_store %arg2[%c0_2, %c0_3], %13 {strides = array<i32>} : memref<8x256xf32, #tpu.memory_space<vmem>>, vector<8x256xf32>,
    return
  }
  func.func @transform_0(%arg0: i32) -> (i32, i32, i32) {
    %c0_i32 = arith.constant 0 : i32
    %c0_i32_0 = arith.constant 0 : i32
    %c0_i32_1 = arith.constant 0 : i32
    return %arg0, %c0_i32, %c0_i32_0 : i32, i32, i32
  }
  func.func @transform_1(%arg0: i32) -> (i32, i32) {
    %c0_i32 = arith.constant 0 : i32
    %c0_i32_0 = arith.constant 0 : i32
    return %arg0, %c0_i32 : i32, i32
  }
}

</mosaic_0001>

<bundles_post_ra>
// kernel: squeeze.1
= control target key start
LH: loop header
LB: loop body
LE: loop exit
PB: predicated region body
PF: predicated region fallthrough
CT: control target
= control target key end

     0   :  { %s4801_s10 = smov 126   ;;  %s4802_s23 = smov 124   ;;  %v8341_v44 = vmov 0   ;;  %v4810_v62 = vmov 1983009808   ;;  %vm8602_vm0 = vcmask 130112   ;;  %s8339_s0 = inlined_call_operand.vmem [shape: f32[8,8,32], index: 0, kind: input, shape index: {}]   ;;  %s8340_s1 = inlined_call_operand.vmem [shape: f32[8,256], index: 1, kind: output, shape index: {}]  }
   0x1   :  { %v4826_v0 = vld [vmem:[%s8339_s0 + $0x10] sm:$0xff]  ;;  %v4831_v1 = vld [vmem:[%s8339_s0] sm:$0xff]  ;;  %v4838_v2 = vld [vmem:[%s8339_s0 + $0x18] sm:$0xff]  ;;  %s4804_s24 = smov 120   ;;  %s4805_s25 = smov 118   ;;  %4795 = vset.pattern.permute.xlu0 %v8341_v44  ;;  %4796 = vset.pattern.permute.xlu1 %v8341_v44  ;;  %v195_v63 = vunpack.c.l.s4 %v4810_v62  ;;  %v8356_v44 = vlaneseq  ;;  %vm8601_vm1 = vcmask 195712  }
   0x2   :  { %28 = vrot.lane.b32.xlu1 %v4826_v0, %s4801_s10  ;;  %24 = vrot.lane.b32.xlu0 %v4831_v1, %s4801_s10  ;;  %v4843_v3 = vld [vmem:[%s8339_s0 + $0x8] sm:$0xff]  ;;  %v4855_v5 = vld [vmem:[%s8339_s0 + $0x20] sm:$0xff]  ;;  %s4806_s26 = smov 116   ;;  %s4807_s27 = smov 114   ;;  %vm2841_vm2 = vcmask 261312   ;;  %vm8603_vm3 = vcmask 326912  }
   0x3   :  { %v4850_v4 = vld [vmem:[%s8339_s0 + $0x28] sm:$0xff]  ;;  %v4862_v6 = vld [vmem:[%s8339_s0 + $0x38] sm:$0xff]  ;;  %v4867_v7 = vld [vmem:[%s8339_s0 + $0x30] sm:$0xff]  ;;  %s4803_s0 = smov 122   ;;  %s4808_s28 = smov 112   ;;  %vm2855_vm4 = vcmask 392512  }
   0x4   :  { %vm2862_vm5 = vcmask 458112   ;;  %vm2869_vm6 = vcmask 523712   ;;  %vm8605_vm7 = vcmask 1041409   ;;  %vm8604_vm8 = vcmask 1042434  }
   0x5   :  { %vm8600_vm9 = vcmask 1043459   ;;  %vm8599_vm10 = vcmask 1044484   ;;  %vm8598_vm11 = vcmask 1045509   ;;  %vm3361_vm12 = vcmask 654912  }
   0x6   :  { %30 = vrot.lane.b32.xlu1 %v4838_v2, %s4801_s10  ;;  %26 = vrot.lane.b32.xlu0 %v4843_v3, %s4801_s10  ;;  %vm3368_vm13 = vcmask 720512   ;;  %vm3375_vm14 = vcmask 786112   ;;  %vm8606_vm15 = vcmask 851712  }
   0xa   :  { %34 = vrot.lane.b32.xlu1 %v4850_v4, %s4801_s10  ;;  %32 = vrot.lane.b32.xlu0 %v4855_v5, %s4801_s10 }
   0xe   :  { %38 = vrot.lane.b32.xlu1 %v4862_v6, %s4801_s10  ;;  %36 = vrot.lane.b32.xlu0 %v4867_v7, %s4801_s10 }
  0x12   :  { %50 = vrot.lane.b32.xlu1 %v4843_v3, %s4802_s23  ;;  %48 = vrot.lane.b32.xlu0 %v4831_v1, %s4802_s23 }
  0x16   :  { %54 = vrot.lane.b32.xlu1 %v4838_v2, %s4802_s23  ;;  %52 = vrot.lane.b32.xlu0 %v4826_v0, %s4802_s23 }
  0x1a   :  { %58 = vrot.lane.b32.xlu1 %v4850_v4, %s4802_s23  ;;  %56 = vrot.lane.b32.xlu0 %v4855_v5, %s4802_s23 }
  0x1e   :  { %62 = vrot.lane.b32.xlu1 %v4862_v6, %s4802_s23  ;;  %60 = vrot.lane.b32.xlu0 %v4867_v7, %s4802_s23 }
  0x22   :  { %74 = vrot.lane.b32.xlu1 %v4843_v3, %s4803_s0  ;;  %72 = vrot.lane.b32.xlu0 %v4831_v1, %s4803_s0 }
  0x26   :  { %78 = vrot.lane.b32.xlu1 %v4838_v2, %s4803_s0  ;;  %76 = vrot.lane.b32.xlu0 %v4826_v0, %s4803_s0 }
  0x2a   :  { %82 = vrot.lane.b32.xlu1 %v4850_v4, %s4803_s0  ;;  %80 = vrot.lane.b32.xlu0 %v4855_v5, %s4803_s0 }
  0x2e   :  { %86 = vrot.lane.b32.xlu1 %v4862_v6, %s4803_s0  ;;  %84 = vrot.lane.b32.xlu0 %v4867_v7, %s4803_s0 }
  0x32   :  { %98 = vrot.lane.b32.xlu1 %v4843_v3, %s4804_s24  ;;  %96 = vrot.lane.b32.xlu0 %v4831_v1, %s4804_s24 }
  0x36   :  { %102 = vrot.lane.b32.xlu1 %v4838_v2, %s4804_s24  ;;  %100 = vrot.lane.b32.xlu0 %v4826_v0, %s4804_s24 }
  0x3a   :  { %106 = vrot.lane.b32.xlu1 %v4850_v4, %s4804_s24  ;;  %104 = vrot.lane.b32.xlu0 %v4855_v5, %s4804_s24 }
  0x3e   :  { %110 = vrot.lane.b32.xlu1 %v4862_v6, %s4804_s24  ;;  %108 = vrot.lane.b32.xlu0 %v4867_v7, %s4804_s24 }
  0x42   :  { %122 = vrot.lane.b32.xlu1 %v4843_v3, %s4805_s25  ;;  %120 = vrot.lane.b32.xlu0 %v4831_v1, %s4805_s25 }
  0x46   :  { %126 = vrot.lane.b32.xlu1 %v4838_v2, %s4805_s25  ;;  %124 = vrot.lane.b32.xlu0 %v4826_v0, %s4805_s25 }
  0x4a   :  { %130 = vrot.lane.b32.xlu1 %v4850_v4, %s4805_s25  ;;  %128 = vrot.lane.b32.xlu0 %v4855_v5, %s4805_s25 }
  0x4e   :  { %134 = vrot.lane.b32.xlu1 %v4862_v6, %s4805_s25  ;;  %132 = vrot.lane.b32.xlu0 %v4867_v7, %s4805_s25 }
  0x52   :  { %146 = vrot.lane.b32.xlu1 %v4843_v3, %s4806_s26  ;;  %144 = vrot.lane.b32.xlu0 %v4831_v1, %s4806_s26 }
  0x56   :  { %150 = vrot.lane.b32.xlu1 %v4838_v2, %s4806_s26  ;;  %148 = vrot.lane.b32.xlu0 %v4826_v0, %s4806_s26 }
  0x5a   :  { %154 = vrot.lane.b32.xlu1 %v4850_v4, %s4806_s26  ;;  %152 = vrot.lane.b32.xlu0 %v4855_v5, %s4806_s26 }
  0x5e   :  { %158 = vrot.lane.b32.xlu1 %v4862_v6, %s4806_s26  ;;  %156 = vrot.lane.b32.xlu0 %v4867_v7, %s4806_s26 }
  0x62   :  { %170 = vrot.lane.b32.xlu1 %v4843_v3, %s4807_s27  ;;  %168 = vrot.lane.b32.xlu0 %v4831_v1, %s4807_s27 }
  0x66   :  { %174 = vrot.lane.b32.xlu1 %v4838_v2, %s4807_s27  ;;  %172 = vrot.lane.b32.xlu0 %v4826_v0, %s4807_s27 }
  0x6a   :  { %178 = vrot.lane.b32.xlu1 %v4850_v4, %s4807_s27  ;;  %176 = vrot.lane.b32.xlu0 %v4855_v5, %s4807_s27 }
  0x6e   :  { %182 = vrot.lane.b32.xlu1 %v4862_v6, %s4807_s27  ;;  %180 = vrot.lane.b32.xlu0 %v4867_v7, %s4807_s27 }
  0x72   :  { %1280 = vrot.lane.b32.xlu0 %v4831_v1, %s4808_s28 }
  0x74   :  { %v4921_v8 = vpop.permute.xlu1 %28  ;;  %v4923_v9 = vpop.permute.xlu0 %24 }
  0x75   :  { %1282 = vrot.lane.b32.xlu1 %v4923_v9, %s4808_s28 }
  0x78   :  { %v4927_v10 = vpop.permute.xlu1 %30  ;;  %v4929_v11 = vpop.permute.xlu0 %26 }
  0x7c   :  { %v4931_v12 = vpop.permute.xlu1 %34  ;;  %v4933_v13 = vpop.permute.xlu0 %32 }
  0x80   :  { %v4935_v14 = vpop.permute.xlu1 %38  ;;  %v4937_v15 = vpop.permute.xlu0 %36 }
  0x84   :  { %v4939_v16 = vpop.permute.xlu1 %50  ;;  %v4941_v17 = vpop.permute.xlu0 %48 }
  0x85   :  { %1284 = vrot.lane.b32.xlu0 %v4941_v17, %s4808_s28  ;;  %v329_v62 = vcombine.high %v4843_v3, %v4939_v16 }
  0x88   :  { %v4945_v18 = vpop.permute.xlu1 %54  ;;  %v4947_v19 = vpop.permute.xlu0 %52 }
  0x8c   :  { %v4949_v20 = vpop.permute.xlu1 %58  ;;  %v4951_v21 = vpop.permute.xlu0 %56 }
  0x90   :  { %v4953_v22 = vpop.permute.xlu1 %62  ;;  %v4955_v23 = vpop.permute.xlu0 %60 }
  0x94   :  { %v4957_v24 = vpop.permute.xlu1 %74  ;;  %v4959_v25 = vpop.permute.xlu0 %72 }
  0x95   :  { %1286 = vrot.lane.b32.xlu1 %v4959_v25, %s4808_s28 }
  0x98   :  { %v4963_v26 = vpop.permute.xlu1 %78  ;;  %v4965_v27 = vpop.permute.xlu0 %76 }
  0x9c   :  { %v4967_v28 = vpop.permute.xlu1 %82  ;;  %v4969_v29 = vpop.permute.xlu0 %80 }
  0xa0   :  { %v4971_v30 = vpop.permute.xlu1 %86  ;;  %v4973_v31 = vpop.permute.xlu0 %84 }
  0xa4   :  { %v4975_v32 = vpop.permute.xlu1 %98  ;;  %v4977_v33 = vpop.permute.xlu0 %96 }
  0xa5   :  { %1288 = vrot.lane.b32.xlu0 %v4977_v33, %s4808_s28 }
  0xa8   :  { %v4981_v34 = vpop.permute.xlu1 %102  ;;  %v4983_v35 = vpop.permute.xlu0 %100 }
  0xa9   :  { %8607 = vst [vmem:[#allocation2_spill] sm:$0xff] %v4983_v35 }
  0xac   :  { %v4985_v36 = vpop.permute.xlu1 %106  ;;  %v4987_v37 = vpop.permute.xlu0 %104 }
  0xad   :  { %8608 = vst [vmem:[#allocation3_spill] sm:$0xff] %v4985_v36  ;;  %8609 = vst [vmem:[#allocation4_spill] sm:$0xff] %v4987_v37 }
  0xb0   :  { %v4989_v38 = vpop.permute.xlu1 %110  ;;  %v4991_v39 = vpop.permute.xlu0 %108 }
  0xb1   :  { %8610 = vst [vmem:[#allocation5_spill] sm:$0xff] %v4989_v38  ;;  %8611 = vst [vmem:[#allocation6_spill] sm:$0xff] %v4991_v39 }
  0xb4   :  { %v4993_v40 = vpop.permute.xlu0 %120  ;;  %v4995_v41 = vpop.permute.xlu1 %122 }
  0xb5   :  { %1290 = vrot.lane.b32.xlu1 %v4993_v40, %s4808_s28 }
  0xb8   :  { %v4999_v42 = vpop.permute.xlu0 %124  ;;  %v5001_v43 = vpop.permute.xlu1 %126 }
  0xb9   :  { %8612 = vst [vmem:[#allocation7_spill] sm:$0xff] %v5001_v43 }
  0xbc   :  { %v5005_v45 = vpop.permute.xlu0 %128  ;;  %v5009_v47 = vpop.permute.xlu1 %130 }
  0xbd   :  { %8613 = vst [vmem:[#allocation8_spill] sm:$0xff] %v5005_v45  ;;  %8615 = vst [vmem:[#allocation10_spill] sm:$0xff] %v5009_v47 }
  0xc0   :  { %v5007_v46 = vpop.permute.xlu0 %132  ;;  %v5015_v49 = vpop.permute.xlu1 %134 }
  0xc1   :  { %8614 = vst [vmem:[#allocation9_spill] sm:$0xff] %v5007_v46  ;;  %8616 = vst [vmem:[#allocation11_spill] sm:$0xff] %v5015_v49 }
  0xc4   :  { %v5011_v48 = vpop.permute.xlu0 %144  ;;  %v5023_v52 = vpop.permute.xlu1 %146 }
  0xc5   :  { %1292 = vrot.lane.b32.xlu0 %v5011_v48, %s4808_s28 }
  0xc8   :  { %v5017_v50 = vpop.permute.xlu0 %148  ;;  %v5031_v54 = vpop.permute.xlu1 %150 }
  0xc9   :  { %1296 = vrot.lane.b32.xlu0 %v4843_v3, %s4808_s28 }
  0xcc   :  { %v5021_v51 = vpop.permute.xlu0 %152  ;;  %v5039_v56 = vpop.permute.xlu1 %154 }
  0xcd   :  { %8617 = vst [vmem:[#allocation12_spill] sm:$0xff] %v5021_v51  ;;  %1300 = vrot.lane.b32.xlu0 %v4939_v16, %s4808_s28  ;;  %8619 = vst [vmem:[#allocation14_spill] sm:$0xff] %v5039_v56 }
  0xd0   :  { %v5027_v53 = vpop.permute.xlu0 %156  ;;  %v5049_v57 = vpop.permute.xlu1 %158 }
  0xd1   :  { %8618 = vst [vmem:[#allocation13_spill] sm:$0xff] %v5027_v53  ;;  %1304 = vrot.lane.b32.xlu0 %v4975_v32, %s4808_s28  ;;  %8620 = vst [vmem:[#allocation15_spill] sm:$0xff] %v5049_v57 }
  0xd4   :  { %v5033_v55 = vpop.permute.xlu0 %168  ;;  %v5055_v58 = vpop.permute.xlu1 %170 }
  0xd5   :  { %1308 = vrot.lane.b32.xlu0 %v5023_v52, %s4808_s28  ;;  %1294 = vrot.lane.b32.xlu1 %v5033_v55, %s4808_s28 }
  0xd8   :  { %v5073_v59 = vpop.permute.xlu0 %172  ;;  %v5091_v60 = vpop.permute.xlu1 %174 }
  0xd9   :  { %1312 = vrot.lane.b32.xlu0 %v4826_v0, %s4808_s28  ;;  %1298 = vrot.lane.b32.xlu1 %v4929_v11, %s4808_s28  ;;  %8621 = vst [vmem:[#allocation16_spill] sm:$0xff] %v5091_v60 }
  0xdc   :  { %v5109_v61 = vpop.permute.xlu0 %176 }
  0xdd   :  { %1316 = vrot.lane.b32.xlu0 %v4947_v19, %s4808_s28  ;;  %1302 = vrot.lane.b32.xlu1 %v4957_v24, %s4808_s28  ;;  %8622 = vst [vmem:[#allocation17_spill] sm:$0xff] %v5109_v61 }
  0xe1   :  { %1320 = vrot.lane.b32.xlu0 %v4983_v35, %s4808_s28  ;;  %1306 = vrot.lane.b32.xlu1 %v4995_v41, %s4808_s28 }
  0xe5   :  { %1324 = vrot.lane.b32.xlu0 %v5017_v50, %s4808_s28  ;;  %1310 = vrot.lane.b32.xlu1 %v5055_v58, %s4808_s28 }
  0xe9   :  { %1328 = vrot.lane.b32.xlu0 %v4838_v2, %s4808_s28  ;;  %1314 = vrot.lane.b32.xlu1 %v4921_v8, %s4808_s28 }
  0xed   :  { %1332 = vrot.lane.b32.xlu0 %v4945_v18, %s4808_s28  ;;  %1318 = vrot.lane.b32.xlu1 %v4965_v27, %s4808_s28 }
  0xf1   :  { %1336 = vrot.lane.b32.xlu0 %v4981_v34, %s4808_s28  ;;  %1322 = vrot.lane.b32.xlu1 %v4999_v42, %s4808_s28 }
  0xf5   :  { %1340 = vrot.lane.b32.xlu0 %v5031_v54, %s4808_s28  ;;  %1326 = vrot.lane.b32.xlu1 %v5073_v59, %s4808_s28 }
  0xf9   :  { %1344 = vrot.lane.b32.xlu0 %v4855_v5, %s4808_s28  ;;  %1330 = vrot.lane.b32.xlu1 %v4927_v10, %s4808_s28 }
  0xfd   :  { %1348 = vrot.lane.b32.xlu0 %v4951_v21, %s4808_s28  ;;  %1334 = vrot.lane.b32.xlu1 %v4963_v26, %s4808_s28 }
 0x101   :  { %1352 = vrot.lane.b32.xlu0 %v4987_v37, %s4808_s28  ;;  %1338 = vrot.lane.b32.xlu1 %v5001_v43, %s4808_s28  ;;  %v196_v37 = vunpack.c.0.s8 %v195_v63  ;;  %v193_v63 = vcombine.high %v4831_v1, %v4941_v17 }
 0x105   :  { %1356 = vrot.lane.b32.xlu0 %v5021_v51, %s4808_s28  ;;  %1342 = vrot.lane.b32.xlu1 %v5091_v60, %s4808_s28 }
 0x109   :  { %1360 = vrot.lane.b32.xlu0 %v4850_v4, %s4808_s28  ;;  %1346 = vrot.lane.b32.xlu1 %v4933_v13, %s4808_s28 }
 0x10d   :  { %1364 = vrot.lane.b32.xlu0 %v4949_v20, %s4808_s28  ;;  %1350 = vrot.lane.b32.xlu1 %v4969_v29, %s4808_s28 }
 0x111   :  { %1368 = vrot.lane.b32.xlu0 %v4985_v36, %s4808_s28  ;;  %1354 = vrot.lane.b32.xlu1 %v5005_v45, %s4808_s28  ;;  %v4811_v36 = vmov 1934713408  }
 0x112   :  { %v259_v45 = vunpack.c.l.s4 %v4811_v36  ;;  %v192_v36 = vcombine.low %v4831_v1, %v4941_v17 }
 0x114   :  { %v260_v51 = vunpack.c.0.s8 %v259_v45  ;;  %v5151_v45 = vpop.permute.xlu1 %178 }
 0x115   :  { %1372 = vrot.lane.b32.xlu0 %v5039_v56, %s4808_s28  ;;  %1358 = vrot.lane.b32.xlu1 %v5109_v61, %s4808_s28  ;;  %v5122_v56 = vshrl.u32 %v8356_v44, 7  ;;  %v328_v61 = vcombine.low %v4843_v3, %v4939_v16  ;;  %v600_v44 = vcombine.low %v4838_v2, %v4945_v18  ;;  %v601_v3 = vcombine.high %v4838_v2, %v4945_v18 }
 0x116   :  { %8624 = vst [vmem:[#allocation19_spill] sm:$0xff] %v5151_v45  ;;  %v464_v18 = vcombine.low %v4826_v0, %v4947_v19 }
 0x117   :  { %8623 = vst [vmem:[#allocation18_spill] sm:$0xff] %v5122_v56  ;;  %v5133_v43 = vsub.s32 %v196_v37, %v5122_v56  ;;  %v5158_v1 = vsub.s32 %v260_v51, %v5122_v56  ;;  %v872_v56 = vcombine.low %v4850_v4, %v4949_v20 }
 0x119   :  { %1376 = vrot.lane.b32.xlu0 %v4867_v7, %s4808_s28  ;;  %1362 = vrot.lane.b32.xlu1 %v4931_v12, %s4808_s28  ;;  %v5146_v16 = vrot.slane %v328_v61, %v5133_v43  ;;  %v5149_v37 = vrot.slane %v329_v62, %v5133_v43  ;;  %v5161_v17 = vrot.slane %v192_v36, %v5133_v43 }
 0x11a   :  { %v5164_v2 = vrot.slane %v193_v63, %v5133_v43  ;;  %v465_v61 = vcombine.high %v4826_v0, %v4947_v19  ;;  %v5173_v62 = vrot.slane %v600_v44, %v5133_v43  ;;  %v5176_v51 = vrot.slane %v601_v3, %v5133_v43 }
 0x11b   :  { %v208_v36 = vcombine.low %v4923_v9, %v4959_v25  ;;  %v240_v63 = vcombine.low %v4993_v40, %v5033_v55  ;;  %v873_v0 = vcombine.high %v4850_v4, %v4949_v20  ;;  %v736_v19 = vcombine.low %v4855_v5, %v4951_v21 }
 0x11c   :  { %v209_v44 = vcombine.high %v4923_v9, %v4959_v25  ;;  %v737_v3 = vcombine.high %v4855_v5, %v4951_v21  ;;  %v5203_v4 = vrot.slane %v464_v18, %v5133_v43  ;;  %v1145_v5 = vcombine.high %v4862_v6, %v4953_v22 }
 0x11d   :  { %1380 = vrot.lane.b32.xlu0 %v4955_v23, %s4808_s28  ;;  %1366 = vrot.lane.b32.xlu1 %v4967_v28, %s4808_s28  ;;  %v1008_v9 = vcombine.low %v4867_v7, %v4955_v23  ;;  %v345_v20 = vcombine.high %v4929_v11, %v4957_v24  ;;  %v5214_v21 = vrot.slane %v465_v61, %v5133_v43 }
 0x11e   :  { %v1009_v25 = vcombine.high %v4867_v7, %v4955_v23  ;;  %v216_v18 = vrot.slane %v208_v36, %v5133_v43  ;;  %v5224_v35 = vrot.slane %v873_v0, %v5133_v43  ;;  %v5231_v61 = vrot.slane %v737_v3, %v5133_v43 }
 0x11f   :  { %v5243_v36 = vrot.slane %v1145_v5, %v5133_v43  ;;  %v5249_v0 = vrot.slane %v345_v20, %v5133_v43  ;;  %v480_v20 = vcombine.low %v4921_v8, %v4965_v27 }
 0x120   :  { %v257_v3 = vcombine.high %v5161_v17, %v216_v18 }
 0x121   :  { %1384 = vrot.lane.b32.xlu0 %v4991_v39, %s4808_s28  ;;  %1370 = vrot.lane.b32.xlu1 %v5009_v47, %s4808_s28  ;;  %v5153_v39 = vpop.permute.xlu0 %180  ;;  %v344_v47 = vcombine.low %v4929_v11, %v4957_v24  ;;  %v5227_v11 = vrot.slane %v736_v19, %v5133_v43  ;;  %v223_v24 = vrot.slane %v209_v44, %v5133_v43 }
 0x122   :  { %8625 = vst [vmem:[#allocation20_spill] sm:$0xff] %v5153_v39  ;;  %8628 = vst [vmem:[#allocation23_spill] sm:$0xff] %v5243_v36  ;;  %v5353_v36 = vpop.permute.xlu1 %182 }
 0x123   :  { %v5237_v23 = vrot.slane %v344_v47, %v5133_v43  ;;  %v5256_v47 = vrot.slane %v1009_v25, %v5133_v43  ;;  %v272_v5 = vcombine.low %v5164_v2, %v223_v24  ;;  %8633 = vst [vmem:[#allocation28_spill] sm:$0xff] %v5353_v36 }
 0x125   :  { %1388 = vrot.lane.b32.xlu0 %v5027_v53, %s4808_s28  ;;  %1374 = vrot.lane.b32.xlu1 %v5151_v45, %s4808_s28  ;;  %v1144_v53 = vcombine.low %v4862_v6, %v4953_v22  ;;  %v224_v45 = vcombine.low %v4977_v33, %v5011_v48  ;;  %v5198_v60 = vpop.permute.xlu0 %1280  ;;  %8630 = vst [vmem:[#allocation25_spill] sm:$0xff] %v5256_v47 }
 0x126   :  { %8626 = vst [vmem:[#allocation21_spill] sm:$0xff] %v5198_v60  ;;  %v248_v60 = vrot.slane %v240_v63, %v5133_v43  ;;  %v5246_v63 = vrot.slane %v1008_v9, %v5133_v43  ;;  %v617_v9 = vcombine.high %v4927_v10, %v4963_v26 }
 0x127   :  { %v5234_v7 = vrot.slane %v1144_v53, %v5133_v43  ;;  %v616_v53 = vcombine.low %v4927_v10, %v4963_v26 }
 0x128   :  { %8629 = vst [vmem:[#allocation24_spill] sm:$0xff] %v5246_v63  ;;  %v8658_v63 = vld [vmem:[#allocation7_spill] sm:$0xff] }
 0x129   :  { %1392 = vrot.lane.b32.xlu0 %v4862_v6, %s4808_s28  ;;  %1378 = vrot.lane.b32.xlu1 %v4937_v15, %s4808_s28  ;;  %v5221_v6 = vrot.slane %v872_v56, %v5133_v43  ;;  %8627 = vst [vmem:[#allocation22_spill] sm:$0xff] %v5234_v7  ;;  %v232_v56 = vrot.slane %v224_v45, %v5133_v43  ;;  %v5261_v44 = vpop.permute.xlu0 %1284 }
 0x12a   :  { %v241_v45 = vcombine.high %v4993_v40, %v5033_v55  ;;  %v273_v40 = vcombine.high %v5164_v2, %v223_v24  ;;  %v225_v55 = vcombine.high %v4977_v33, %v5011_v48 }
 0x12b   :  { %v288_v19 = vcombine.low %v232_v56, %v248_v60  ;;  %v289_v48 = vcombine.high %v232_v56, %v248_v60  ;;  %v888_v60 = vcombine.low %v4931_v12, %v4967_v28  ;;  %v889_v56 = vcombine.high %v4931_v12, %v4967_v28 }
 0x12c   :  { %v5290_v33 = vrot.slane %v241_v45, %v5133_v43  ;;  %v5310_v45 = vrot.slane %v272_v5, %v5158_v1  ;;  %v753_v12 = vcombine.high %v4933_v13, %v4969_v29  ;;  %v376_v28 = vcombine.low %v4995_v41, %v5055_v58 }
 0x12d   :  { %1396 = vrot.lane.b32.xlu0 %v4953_v22, %s4808_s28  ;;  %1382 = vrot.lane.b32.xlu1 %v4973_v31, %s4808_s28  ;;  %v256_v22 = vcombine.low %v5161_v17, %v216_v18  ;;  %v5283_v17 = vrot.slane %v616_v53, %v5133_v43  ;;  %v481_v18 = vcombine.high %v4921_v8, %v4965_v27  ;;  %v5292_v2 = vpop.permute.xlu0 %1288  ;;  %v8652_v47 = vld [vmem:[#allocation21_spill] sm:$0xff] }
 0x12e   :  { %v5298_v26 = vrot.slane %v288_v19, %v5158_v1  ;;  %v5301_v53 = vrot.slane %v617_v9, %v5133_v43  ;;  %v5304_v8 = vrot.slane %v480_v20, %v5133_v43  ;;  %v5307_v27 = vrot.slane %v257_v3, %v5158_v1 }
 0x12f   :  { %v5295_v24 = vrot.slane %v256_v22, %v5158_v1  ;;  %v239_v22 = vrot.slane %v225_v55, %v5133_v43  ;;  %v5320_v19 = vrot.slane %v273_v40, %v5158_v1  ;;  %v5325_v5 = vrot.slane %v481_v18, %v5133_v43 }
 0x130   :  { %8631 = vst [vmem:[#allocation26_spill] sm:$0xff] %v5301_v53  ;;  %v752_v9 = vcombine.low %v4933_v13, %v4969_v29  ;;  %v5343_v18 = vrot.slane %v289_v48, %v5158_v1  ;;  %v5358_v48 = vrot.slane %v888_v60, %v5133_v43  ;;  %v360_v29 = vcombine.low %v4975_v32, %v5023_v52 }
 0x131   :  { %1400 = vrot.lane.b32.xlu0 %v4989_v38, %s4808_s28  ;;  %1386 = vrot.lane.b32.xlu1 %v5007_v46, %s4808_s28  ;;  %v304_v20 = vcombine.low %v239_v22, %v5290_v33  ;;  %v5340_v55 = vcombine.low %v5295_v24, %v5298_v26  ;;  %v5361_v38 = vrot.slane %v889_v56, %v5133_v43 }
 0x132   :  { %v544_v3 = vcombine.low %v5214_v21, %v5325_v5  ;;  %v5371_v10 = vrot.slane %v752_v9, %v5133_v43  ;;  %v1160_v60 = vcombine.low %v4935_v14, %v4971_v30  ;;  %v5378_v56 = vrot.slane %v376_v28, %v5133_v43 }
 0x133   :  { %8632 = vst [vmem:[#allocation27_spill] sm:$0xff] %v5340_v55  ;;  %8634 = vst [vmem:[#allocation29_spill] sm:$0xff] %v5361_v38  ;;  %v305_v25 = vcombine.high %v239_v22, %v5290_v33  ;;  %v5388_v9 = vrot.slane %v304_v20, %v5158_v1  ;;  %v5391_v13 = vrot.slane %v753_v12, %v5133_v43  ;;  %v5399_v22 = vpop.permute.xlu1 %1282 }
 0x134   :  { %v1161_v46 = vcombine.high %v4935_v14, %v4971_v30  ;;  %v1024_v28 = vcombine.low %v4937_v15, %v4973_v31  ;;  %v1025_v33 = vcombine.high %v4937_v15, %v4973_v31  ;;  %v368_v53 = vrot.slane %v360_v29, %v5133_v43 }
 0x135   :  { %1404 = vrot.lane.b32.xlu0 %v5049_v57, %s4808_s28  ;;  %1390 = vrot.lane.b32.xlu1 %v5153_v39, %s4808_s28  ;;  %v5385_v57 = vcombine.high %v5307_v27, %v5343_v18  ;;  %v5414_v31 = vrot.slane %v1160_v60, %v5133_v43  ;;  %v377_v39 = vcombine.high %v4995_v41, %v5055_v58 }
 0x136   :  { %v424_v12 = vcombine.low %v368_v53, %v5378_v56  ;;  %v5430_v60 = vrot.slane %v305_v25, %v5158_v1  ;;  %v5435_v58 = vrot.slane %v1024_v28, %v5133_v43  ;;  %v361_v29 = vcombine.high %v4975_v32, %v5023_v52 }
 0x137   :  { %v5336_v40 = vpop.permute.xlu0 %1292  ;;  %8635 = vst [vmem:[#allocation30_spill] sm:$0xff] %v5385_v57  ;;  %8636 = vst [vmem:[#allocation31_spill] sm:$0xff] %v5414_v31  ;;  %v1287_v15 = vpop.permute.xlu1 %1286  ;;  %v5445_v38 = vrot.slane %v1161_v46, %v5133_v43  ;;  %v8641_v25 = vcombine.low %v5146_v16, %v5237_v23  ;;  %v5463_v46 = vrot.slane %v377_v39, %v5133_v43 }
 0x138   :  { %8638 = vst [vmem:[#allocation33_spill] sm:$0xff] %v5435_v58  ;;  %v425_v39 = vcombine.high %v368_v53, %v5378_v56  ;;  %v5486_v41 = vcombine.high %v5320_v19, %v5430_v60  ;;  %v375_v53 = vrot.slane %v361_v29, %v5133_v43  ;;  %v5514_v29 = vrot.slane %v544_v3, %v5158_v1 }
 0x139   :  { %2625 = vperm.xlu0 %4795, %v5340_v55   ;;  %1394 = vrot.lane.b32.xlu1 %v4935_v14, %s4808_s28  ;;  %v5427_v14 = vcombine.high %v5310_v45, %v5388_v9  ;;  %8640 = vst [vmem:[#allocation35_spill] sm:$0xff] %v5445_v38  ;;  %v5452_v28 = vrot.slane %v8641_v25, %v5158_v1  ;;  %v8651_v38 = vld [vmem:[#allocation2_spill] sm:$0xff] }
 0x13a   :  { %v8643_v25 = vcombine.low %v5149_v37, %v5249_v0  ;;  %8645 = vst [vmem:[#allocation36_spill] sm:$0xff] %v5486_v41  ;;  %v5539_v31 = vrot.slane %v425_v39, %v5158_v1  ;;  %v1489_v7 = vcombine.high %v5399_v22, %v1287_v15  ;;  %v5548_v3 = vcombine.high %v5295_v24, %v5298_v26 }
 0x13b   :  { %v5381_v55 = vpop.permute.xlu0 %1296  ;;  %8637 = vst [vmem:[#allocation32_spill] sm:$0xff] %v5427_v14  ;;  %v1291_v56 = vpop.permute.xlu1 %1290  ;;  %v1472_v39 = vcombine.low %v8652_v47, %v5261_v44 }
 0x13c   :  { %8650 = vst [vmem:[#allocation38_spill] sm:$0xff] %v5548_v3 }
 0x13d   :  { %2634 = vperm.xlu0 %4795, %v5385_v57   ;;  %1398 = vrot.lane.b32.xlu1 %v4971_v30, %s4808_s28  ;;  %v5438_v30 = vrot.slane %v1025_v33, %v5133_v43  ;;  %v8642_v33 = vcombine.high %v5146_v16, %v5237_v23  ;;  %v5471_v57 = vrot.slane %v8643_v25, %v5158_v1 }
 0x13e   :  { %v8644_v16 = vcombine.high %v5149_v37, %v5249_v0  ;;  %v5489_v25 = vrot.slane %v424_v12, %v5158_v1  ;;  %v8646_v12 = vcombine.low %v5203_v4, %v5304_v8  ;;  %v8647_v37 = vcombine.high %v5203_v4, %v5304_v8 }
 0x13f   :  { %v5423_v20 = vpop.permute.xlu0 %1300  ;;  %8639 = vst [vmem:[#allocation34_spill] sm:$0xff] %v5438_v30  ;;  %v5458_v32 = vrot.slane %v8642_v33, %v5158_v1  ;;  %v440_v0 = vcombine.low %v375_v53, %v5463_v46  ;;  %v8648_v4 = vcombine.high %v5214_v21, %v5325_v5  ;;  %v1504_v21 = vcombine.low %v5292_v2, %v5336_v40 }
 0x140   :  { %v5477_v23 = vrot.slane %v8644_v16, %v5158_v1  ;;  %v5505_v33 = vrot.slane %v8646_v12, %v5158_v1  ;;  %v5536_v16 = vcombine.high %v5452_v28, %v5489_v25  ;;  %v1505_v5 = vcombine.high %v5292_v2, %v5336_v40 }
 0x141   :  { %2640 = vperm.xlu0 %4795, %v5427_v14   ;;  %1402 = vrot.lane.b32.xlu1 %v5015_v49, %s4808_s28  ;;  %v5511_v14 = vrot.slane %v8647_v37, %v5158_v1  ;;  %v5527_v8 = vrot.slane %v8648_v4, %v5158_v1  ;;  %v1488_v37 = vcombine.low %v5399_v22, %v1287_v15 }
 0x142   :  { %8649 = vst [vmem:[#allocation37_spill] sm:$0xff] %v5536_v16  ;;  %v496_v30 = vcombine.low %v8651_v38, %v5017_v50  ;;  %v441_v22 = vcombine.high %v375_v53, %v5463_v46  ;;  %v1473_v2 = vcombine.high %v8652_v47, %v5261_v44  ;;  %v5561_v26 = vrot.slane %v440_v0, %v5158_v1 }
 0x143   :  { %v5482_v52 = vpop.permute.xlu0 %1304  ;;  %v1496_v24 = vrot.slane %v1488_v37, %v5133_v43  ;;  %v5570_v46 = vcombine.high %v5458_v32, %v5539_v31  ;;  %v1512_v47 = vrot.slane %v1504_v21, %v5133_v43  ;;  %v1519_v44 = vrot.slane %v1505_v5, %v5133_v43 }
 0x144   :  { %v5579_v53 = vcombine.low %v5307_v27, %v5343_v18  ;;  %v513_v37 = vcombine.high %v4999_v42, %v5073_v59  ;;  %v1487_v21 = vrot.slane %v1473_v2, %v5133_v43  ;;  %v5601_v2 = vcombine.low %v5310_v45, %v5388_v9 }
 0x145   :  { %2646 = vperm.xlu0 %4795, %v5486_v41   ;;  %v512_v41 = vcombine.low %v4999_v42, %v5073_v59  ;;  %1406 = vrot.lane.b32.xlu1 %v5353_v36, %s4808_s28  ;;  %8653 = vst [vmem:[#allocation2_spill] sm:$0xff] %v5570_v46  ;;  %v5597_v42 = vrot.slane %v441_v22, %v5158_v1  ;;  %v8657_v22 = vld [vmem:[#allocation16_spill] sm:$0xff] }
 0x146   :  { %8654 = vst [vmem:[#allocation21_spill] sm:$0xff] %v5579_v53  ;;  %8656 = vst [vmem:[#allocation40_spill] sm:$0xff] %v5601_v2 }
 0x147   :  { %v5532_v12 = vpop.permute.xlu0 %1308  ;;  %v1295_v4 = vpop.permute.xlu1 %1294  ;;  %v520_v15 = vrot.slane %v512_v41, %v5133_v43  ;;  %v1503_v41 = vrot.slane %v1489_v7, %v5133_v43  ;;  %v1480_v7 = vrot.slane %v1472_v39, %v5133_v43 }
 0x148   :  { %v1520_v49 = vcombine.low %v1291_v56, %v1295_v4  ;;  %v1521_v36 = vcombine.high %v1291_v56, %v1295_v4 }
 0x149   :  { %2652 = vperm.xlu0 %4795, %v5536_v16   ;;  %2628 = vperm.xlu1 %4796, %v5548_v3   ;;  %v1536_v18 = vcombine.low %v1480_v7, %v1496_v24  ;;  %v1552_v59 = vcombine.low %v1487_v21, %v1503_v41 }
 0x14a   :  { %v1528_v40 = vrot.slane %v1520_v49, %v5133_v43  ;;  %v1535_v56 = vrot.slane %v1521_v36, %v5133_v43  ;;  %v497_v49 = vcombine.high %v8651_v38, %v5017_v50  ;;  %v504_v36 = vrot.slane %v496_v30, %v5133_v43 }
 0x14b   :  { %v5566_v4 = vpop.permute.xlu0 %1312  ;;  %v5575_v0 = vpop.permute.xlu1 %1298  ;;  %v5594_v38 = vcombine.high %v5471_v57, %v5561_v26  ;;  %v1537_v50 = vcombine.high %v1480_v7, %v1496_v24  ;;  %v648_v24 = vcombine.low %v8658_v63, %v8657_v22  ;;  %v5643_v7 = vrot.slane %v1552_v59, %v5158_v1 }
 0x14c   :  { %v1568_v5 = vcombine.low %v1512_v47, %v1528_v40  ;;  %v1569_v3 = vcombine.high %v1512_v47, %v1528_v40  ;;  %v1584_v16 = vcombine.low %v1519_v44, %v1535_v56  ;;  %v560_v27 = vcombine.low %v504_v36, %v520_v15 }
 0x14d   :  { %2658 = vperm.xlu0 %4795, %v5570_v46   ;;  %2631 = vperm.xlu1 %4796, %v5579_v53   ;;  %8655 = vst [vmem:[#allocation39_spill] sm:$0xff] %v5594_v38  ;;  %v1585_v30 = vcombine.high %v1519_v44, %v1535_v56  ;;  %v5604_v40 = vrot.slane %v497_v49, %v5133_v43  ;;  %8661 = vst [vmem:[#allocation41_spill] sm:$0xff] %v5643_v7 }
 0x14e   :  { %v5607_v47 = vrot.slane %v513_v37, %v5133_v43  ;;  %v561_v46 = vcombine.high %v504_v36, %v520_v15  ;;  %v1553_v53 = vcombine.high %v1487_v21, %v1503_v41  ;;  %v5614_v56 = vrot.slane %v1568_v5, %v5158_v1 }
 0x14f   :  { %v5590_v58 = vpop.permute.xlu0 %1316  ;;  %v1303_v39 = vpop.permute.xlu1 %1302  ;;  %v5617_v45 = vrot.slane %v1569_v3, %v5158_v1  ;;  %v5620_v9 = vrot.slane %v1584_v16, %v5158_v1  ;;  %v5626_v15 = vcombine.high %v5477_v23, %v5597_v42  ;;  %v5630_v41 = vcombine.low %v5320_v19, %v5430_v60 }
 0x150   :  { %v5633_v49 = vrot.slane %v560_v27, %v5158_v1  ;;  %v5636_v36 = vrot.slane %v1536_v18, %v5158_v1  ;;  %v1624_v3 = vcombine.low %v5575_v0, %v1303_v39  ;;  %v5640_v37 = vrot.slane %v1537_v50, %v5158_v1 }
 0x151   :  { %2664 = vperm.xlu0 %4795, %v5594_v38   ;;  %2637 = vperm.xlu1 %4796, %v5601_v2   ;;  %8659 = vst [vmem:[#allocation16_spill] sm:$0xff] %v5626_v15  ;;  %8660 = vst [vmem:[#allocation7_spill] sm:$0xff] %v5630_v41  ;;  %v5646_v21 = vrot.slane %v1585_v30, %v5158_v1  ;;  %v576_v19 = vcombine.low %v5604_v40, %v5607_v47 }
 0x152   :  { %v1608_v60 = vcombine.low %v5381_v55, %v5423_v20  ;;  %v5654_v5 = vrot.slane %v561_v46, %v5158_v1  ;;  %v5657_v27 = vrot.slane %v1553_v53, %v5158_v1  ;;  %v1625_v18 = vcombine.high %v5575_v0, %v1303_v39 }
 0x153   :  { %v5622_v44 = vpop.permute.xlu0 %1320  ;;  %v1307_v16 = vpop.permute.xlu1 %1306  ;;  %v5663_v50 = vcombine.high %v5636_v36, %v5614_v56  ;;  %v5667_v59 = vcombine.low %v5640_v37, %v5617_v45  ;;  %v5671_v30 = vcombine.low %v5643_v7, %v5620_v9  ;;  %v8665_v46 = vcombine.low %v4981_v34, %v5031_v54 }
 0x154   :  { %v1640_v0 = vcombine.low %v5482_v52, %v5532_v12  ;;  %v1641_v39 = vcombine.high %v5482_v52, %v5532_v12  ;;  %v5701_v52 = vrot.slane %v648_v24, %v5133_v43  ;;  %v577_v12 = vcombine.high %v5604_v40, %v5607_v47 }
 0x155   :  { %2670 = vperm.xlu0 %4795, %v5626_v15   ;;  %2643 = vperm.xlu1 %4796, %v5630_v41   ;;  %8662 = vst [vmem:[#allocation42_spill] sm:$0xff] %v5663_v50  ;;  %8663 = vst [vmem:[#allocation43_spill] sm:$0xff] %v5667_v59  ;;  %v5677_v53 = vrot.slane %v8665_v46, %v5133_v43  ;;  %v5687_v59 = vcombine.high %v5505_v33, %v5633_v49 }
 0x156   :  { %8664 = vst [vmem:[#allocation44_spill] sm:$0xff] %v5671_v30  ;;  %v1609_v30 = vcombine.high %v5381_v55, %v5423_v20  ;;  %v1632_v41 = vrot.slane %v1624_v3, %v5133_v43  ;;  %v5694_v46 = vcombine.low %v5452_v28, %v5489_v25  ;;  %v5698_v15 = vcombine.low %v5657_v27, %v5646_v21 }
 0x157   :  { %v5683_v50 = vpop.permute.xlu0 %1324  ;;  %8666 = vst [vmem:[#allocation45_spill] sm:$0xff] %v5687_v59  ;;  %v1311_v2 = vpop.permute.xlu1 %1310  ;;  %v1616_v55 = vrot.slane %v1608_v60, %v5133_v43  ;;  %v1639_v20 = vrot.slane %v1625_v18, %v5133_v43  ;;  %v5711_v28 = vcombine.high %v5511_v14, %v5654_v5  ;;  %v5714_v25 = vrot.slane %v576_v19, %v5158_v1 }
 0x158   :  { %8667 = vst [vmem:[#allocation46_spill] sm:$0xff] %v5694_v46  ;;  %8668 = vst [vmem:[#allocation47_spill] sm:$0xff] %v5698_v15  ;;  %v1656_v38 = vcombine.low %v1307_v16, %v1311_v2  ;;  %v1657_v7 = vcombine.high %v1307_v16, %v1311_v2  ;;  %v1648_v24 = vrot.slane %v1640_v0, %v5133_v43 }
 0x159   :  { %2676 = vperm.xlu0 %4795, %v5687_v59   ;;  %2649 = vperm.xlu1 %4796, %v5694_v46   ;;  %8669 = vst [vmem:[#allocation48_spill] sm:$0xff] %v5711_v28  ;;  %v1655_v40 = vrot.slane %v1641_v39, %v5133_v43  ;;  %v1623_v16 = vrot.slane %v1609_v30, %v5133_v43 }
 0x15a   :  { %v1664_v2 = vrot.slane %v1656_v38, %v5133_v43  ;;  %v1671_v47 = vrot.slane %v1657_v7, %v5133_v43  ;;  %v1672_v60 = vcombine.low %v1616_v55, %v1632_v41  ;;  %v1673_v18 = vcombine.high %v1616_v55, %v1632_v41 }
 0x15b   :  { %v5720_v3 = vpop.permute.xlu0 %1328  ;;  %v5723_v15 = vpop.permute.xlu1 %1314  ;;  %v5727_v19 = vcombine.low %v5458_v32, %v5539_v31  ;;  %v649_v38 = vcombine.high %v8658_v63, %v8657_v22  ;;  %v696_v7 = vcombine.low %v5677_v53, %v5701_v52  ;;  %v1688_v30 = vcombine.low %v1623_v16, %v1639_v20 }
 0x15c   :  { %v1704_v46 = vcombine.low %v1648_v24, %v1664_v2  ;;  %v1705_v0 = vcombine.high %v1648_v24, %v1664_v2  ;;  %v1720_v59 = vcombine.low %v1655_v40, %v1671_v47  ;;  %v1721_v39 = vcombine.high %v1655_v40, %v1671_v47 }
 0x15d   :  { %8670 = vst [vmem:[#allocation49_spill] sm:$0xff] %v5727_v19  ;;  %2682 = vperm.xlu0 %4795, %v5711_v28   ;;  %v1689_v41 = vcombine.high %v1623_v16, %v1639_v20  ;;  %2655 = vperm.xlu1 %4796, %v5727_v19   ;;  %v5739_v31 = vcombine.high %v5514_v29, %v5714_v25 }
 0x15e   :  { %v5742_v32 = vrot.slane %v577_v12, %v5158_v1  ;;  %v5745_v24 = vrot.slane %v1704_v46, %v5158_v1  ;;  %v5748_v63 = vrot.slane %v1705_v0, %v5158_v1  ;;  %v5752_v20 = vcombine.low %v5471_v57, %v5561_v26  ;;  %v8676_v57 = vld [vmem:[#allocation12_spill] sm:$0xff] }
 0x15f   :  { %v5735_v55 = vpop.permute.xlu0 %1332  ;;  %8671 = vst [vmem:[#allocation50_spill] sm:$0xff] %v5739_v31  ;;  %v1319_v22 = vpop.permute.xlu1 %1318  ;;  %v8673_v40 = vcombine.low %v5173_v62, %v5283_v17  ;;  %v5761_v12 = vrot.slane %v1720_v59, %v5158_v1  ;;  %v5764_v46 = vrot.slane %v1721_v39, %v5158_v1  ;;  %v8675_v47 = vcombine.high %v4981_v34, %v5031_v54  ;;  %v8677_v26 = vld [vmem:[#allocation4_spill] sm:$0xff] }
 0x160   :  { %8672 = vst [vmem:[#allocation51_spill] sm:$0xff] %v5752_v20  ;;  %v768_v0 = vcombine.low %v8677_v26, %v8676_v57  ;;  %v5779_v59 = vrot.slane %v1673_v18, %v5158_v1  ;;  %v5782_v39 = vrot.slane %v649_v38, %v5133_v43  ;;  %v697_v19 = vcombine.high %v5677_v53, %v5701_v52 }
 0x161   :  { %v5758_v2 = vrot.slane %v8673_v40, %v5158_v1  ;;  %8674 = vst [vmem:[#allocation52_spill] sm:$0xff] %v5764_v46  ;;  %v5770_v16 = vrot.slane %v8675_v47, %v5133_v43  ;;  %2688 = vperm.xlu0 %4795, %v5739_v31   ;;  %v5776_v40 = vrot.slane %v1672_v60, %v5158_v1  ;;  %v8688_v31 = vld [vmem:[#allocation8_spill] sm:$0xff] }
 0x162   :  { %8678 = vst [vmem:[#allocation12_spill] sm:$0xff] %v5779_v59  ;;  %2661 = vperm.xlu1 %4796, %v5752_v20   ;;  %v5788_v34 = vrot.slane %v1688_v30, %v5158_v1  ;;  %v5791_v54 = vrot.slane %v1689_v41, %v5158_v1  ;;  %v5797_v60 = vcombine.high %v5527_v8, %v5742_v32 }
 0x163   :  { %v5793_v47 = vpop.permute.xlu0 %1336  ;;  %v5800_v18 = vrot.slane %v696_v7, %v5158_v1  ;;  %v5804_v53 = vcombine.low %v5776_v40, %v5745_v24  ;;  %v5808_v52 = vcombine.low %v5779_v59, %v5748_v63  ;;  %v1760_v38 = vcombine.low %v5723_v15, %v1319_v22  ;;  %v1323_v30 = vpop.permute.xlu1 %1322 }
 0x164   :  { %8679 = vst [vmem:[#allocation4_spill] sm:$0xff] %v5788_v34  ;;  %8680 = vst [vmem:[#allocation53_spill] sm:$0xff] %v5791_v54  ;;  %v5813_v41 = vcombine.low %v5477_v23, %v5597_v42  ;;  %v5817_v20 = vcombine.low %v5788_v34, %v5761_v12  ;;  %v5821_v7 = vcombine.low %v5791_v54, %v5764_v46  ;;  %v8690_v23 = vld [vmem:[#allocation26_spill] sm:$0xff] }
 0x165   :  { %8681 = vst [vmem:[#allocation54_spill] sm:$0xff] %v5797_v60  ;;  %8682 = vst [vmem:[#allocation55_spill] sm:$0xff] %v5804_v53  ;;  %v8687_v53 = vld [vmem:[#allocation17_spill] sm:$0xff]  ;;  %2694 = vperm.xlu0 %4795, %v5797_v60   ;;  %v8691_v42 = vcombine.low %v5176_v51, %v8690_v23  ;;  %v712_v60 = vcombine.low %v5770_v16, %v5782_v39  ;;  %v5863_v46 = vcombine.high %v5758_v2, %v5800_v18 }
 0x166   :  { %8683 = vst [vmem:[#allocation56_spill] sm:$0xff] %v5808_v52  ;;  %8684 = vst [vmem:[#allocation57_spill] sm:$0xff] %v5813_v41  ;;  %v784_v28 = vcombine.low %v8688_v31, %v8687_v53  ;;  %v8689_v52 = vcombine.high %v5173_v62, %v5283_v17  ;;  %v1744_v62 = vcombine.low %v5566_v4, %v5590_v58  ;;  %2667 = vperm.xlu1 %4796, %v5813_v41  }
 0x167   :  { %8685 = vst [vmem:[#allocation58_spill] sm:$0xff] %v5817_v20  ;;  %8686 = vst [vmem:[#allocation59_spill] sm:$0xff] %v5821_v7  ;;  %v5836_v20 = vrot.slane %v8691_v42, %v5158_v1  ;;  %v8692_v7 = vcombine.high %v5176_v51, %v8690_v23  ;;  %v1761_v17 = vcombine.high %v5723_v15, %v1319_v22  ;;  %v5859_v23 = vpop.permute.xlu0 %1340 }
 0x168   :  { %v5830_v59 = vrot.slane %v8689_v52, %v5158_v1  ;;  %v5851_v52 = vrot.slane %v697_v19, %v5158_v1  ;;  %v769_v42 = vcombine.high %v8677_v26, %v8676_v57  ;;  %v1776_v51 = vcombine.low %v5622_v44, %v5683_v50  ;;  %8693 = vst [vmem:[#allocation17_spill] sm:$0xff] %v5863_v46  ;;  %v1327_v57 = vpop.permute.xlu1 %1326 }
 0x169   :  { %v5842_v54 = vrot.slane %v8692_v7, %v5158_v1  ;;  %v1777_v7 = vcombine.high %v5622_v44, %v5683_v50  ;;  %v5866_v15 = vrot.slane %v768_v0, %v5133_v43  ;;  %v1745_v19 = vcombine.high %v5566_v4, %v5590_v58  ;;  %2700 = vperm.xlu0 %4795, %v5863_v46  }
 0x16a   :  { %v1768_v22 = vrot.slane %v1760_v38, %v5133_v43  ;;  %v5873_v26 = vcombine.low %v5505_v33, %v5633_v49  ;;  %v713_v44 = vcombine.high %v5770_v16, %v5782_v39  ;;  %v5878_v50 = vrot.slane %v784_v28, %v5133_v43 }
 0x16b   :  { %v1792_v41 = vcombine.low %v1323_v30, %v1327_v57  ;;  %v1793_v34 = vcombine.high %v1323_v30, %v1327_v57  ;;  %v1752_v0 = vrot.slane %v1744_v62, %v5133_v43  ;;  %v1775_v58 = vrot.slane %v1761_v17, %v5133_v43  ;;  %v5895_v38 = vpop.permute.xlu0 %1344 }
 0x16c   :  { %8694 = vst [vmem:[#allocation8_spill] sm:$0xff] %v5873_v26  ;;  %2673 = vperm.xlu1 %4796, %v5873_v26   ;;  %v5886_v33 = vcombine.high %v5830_v59, %v5851_v52  ;;  %v5889_v4 = vrot.slane %v712_v60, %v5158_v1  ;;  %v1784_v49 = vrot.slane %v1776_v51, %v5133_v43  ;;  %v5898_v57 = vpop.permute.xlu1 %1330 }
 0x16d   :  { %v1791_v28 = vrot.slane %v1777_v7, %v5133_v43  ;;  %v1800_v16 = vrot.slane %v1792_v41, %v5133_v43  ;;  %v1807_v39 = vrot.slane %v1793_v34, %v5133_v43  ;;  %v1759_v30 = vrot.slane %v1745_v19, %v5133_v43 }
 0x16e   :  { %8695 = vst [vmem:[#allocation26_spill] sm:$0xff] %v5886_v33  ;;  %v1808_v62 = vcombine.low %v1752_v0, %v1768_v22  ;;  %v1809_v17 = vcombine.high %v1752_v0, %v1768_v22  ;;  %v5902_v60 = vcombine.low %v5511_v14, %v5654_v5  ;;  %2706 = vperm.xlu0 %4795, %v5886_v33   ;;  %v8713_v33 = vld [vmem:[#allocation10_spill] sm:$0xff] }
 0x16f   :  { %v1840_v26 = vcombine.low %v1784_v49, %v1800_v16  ;;  %v1841_v51 = vcombine.high %v1784_v49, %v1800_v16  ;;  %v1856_v46 = vcombine.low %v1791_v28, %v1807_v39  ;;  %v1857_v7 = vcombine.high %v1791_v28, %v1807_v39  ;;  %v5910_v0 = vpop.permute.xlu0 %1348  ;;  %v8701_v39 = vld [vmem:[#allocation14_spill] sm:$0xff] }
 0x170   :  { %8696 = vst [vmem:[#allocation60_spill] sm:$0xff] %v5902_v60  ;;  %v785_v34 = vcombine.high %v8688_v31, %v8687_v53  ;;  %v832_v41 = vcombine.low %v5866_v15, %v5878_v50  ;;  %v1824_v19 = vcombine.low %v1759_v30, %v1775_v58  ;;  %v1825_v22 = vcombine.high %v1759_v30, %v1775_v58  ;;  %v1335_v53 = vpop.permute.xlu1 %1334  ;;  %v8702_v30 = vld [vmem:[#allocation3_spill] sm:$0xff] }
 0x171   :  { %2679 = vperm.xlu1 %4796, %v5902_v60   ;;  %v5914_v14 = vcombine.high %v5836_v20, %v5889_v4  ;;  %v5917_v5 = vrot.slane %v713_v44, %v5158_v1  ;;  %v5920_v49 = vrot.slane %v1840_v26, %v5158_v1  ;;  %v5923_v31 = vrot.slane %v1841_v51, %v5158_v1 }
 0x172   :  { %v5927_v58 = vcombine.low %v5514_v29, %v5714_v25  ;;  %v8699_v28 = vcombine.low %v5227_v11, %v5371_v10  ;;  %v5936_v44 = vrot.slane %v1856_v46, %v5158_v1  ;;  %v5939_v26 = vrot.slane %v1857_v7, %v5158_v1 }
 0x173   :  { %8697 = vst [vmem:[#allocation61_spill] sm:$0xff] %v5914_v14  ;;  %v904_v51 = vcombine.low %v8702_v30, %v8701_v39  ;;  %v5944_v60 = vrot.slane %v769_v42, %v5133_v43  ;;  %2712 = vperm.xlu0 %4795, %v5914_v14   ;;  %v5948_v29 = vrot.slane %v1808_v62, %v5158_v1  ;;  %v5965_v14 = vpop.permute.xlu0 %1352 }
 0x174   :  { %8698 = vst [vmem:[#allocation62_spill] sm:$0xff] %v5927_v58  ;;  %v5933_v16 = vrot.slane %v8699_v28, %v5158_v1  ;;  %8700 = vst [vmem:[#allocation63_spill] sm:$0xff] %v5939_v26  ;;  %v5951_v25 = vrot.slane %v1809_v17, %v5158_v1  ;;  %v5954_v46 = vrot.slane %v785_v34, %v5133_v43 }
 0x175   :  { %8703 = vst [vmem:[#allocation14_spill] sm:$0xff] %v5948_v29  ;;  %v833_v7 = vcombine.high %v5866_v15, %v5878_v50  ;;  %2685 = vperm.xlu1 %4796, %v5927_v58   ;;  %v5960_v28 = vrot.slane %v1824_v19, %v5158_v1  ;;  %v5963_v42 = vrot.slane %v1825_v22, %v5158_v1  ;;  %v1339_v19 = vpop.permute.xlu1 %1338 }
 0x176   :  { %8704 = vst [vmem:[#allocation3_spill] sm:$0xff] %v5951_v25  ;;  %v5969_v62 = vcombine.high %v5842_v54, %v5917_v5  ;;  %v5972_v17 = vrot.slane %v832_v41, %v5158_v1  ;;  %v5976_v15 = vcombine.low %v5948_v29, %v5920_v49  ;;  %v5980_v50 = vcombine.low %v5951_v25, %v5923_v31 }
 0x177   :  { %8705 = vst [vmem:[#allocation64_spill] sm:$0xff] %v5963_v42  ;;  %v1896_v34 = vcombine.low %v5898_v57, %v1335_v53  ;;  %v5985_v22 = vcombine.low %v5527_v8, %v5742_v32  ;;  %v5989_v58 = vcombine.low %v5960_v28, %v5936_v44  ;;  %v5993_v41 = vcombine.low %v5963_v42, %v5939_v26 }
 0x178   :  { %8706 = vst [vmem:[#allocation65_spill] sm:$0xff] %v5969_v62  ;;  %8707 = vst [vmem:[#allocation66_spill] sm:$0xff] %v5976_v15  ;;  %v8712_v15 = vld [vmem:[#allocation19_spill] sm:$0xff]  ;;  %2718 = vperm.xlu0 %4795, %v5969_v62   ;;  %v8715_v8 = vcombine.low %v5231_v61, %v5391_v13  ;;  %v848_v62 = vcombine.low %v5944_v60, %v5954_v46  ;;  %v6035_v42 = vcombine.high %v5933_v16, %v5972_v17 }
 0x179   :  { %8708 = vst [vmem:[#allocation67_spill] sm:$0xff] %v5980_v50  ;;  %8709 = vst [vmem:[#allocation68_spill] sm:$0xff] %v5985_v22  ;;  %v920_v29 = vcombine.low %v8713_v33, %v8712_v15  ;;  %v8714_v50 = vcombine.high %v5227_v11, %v5371_v10  ;;  %v1880_v11 = vcombine.low %v5720_v3, %v5735_v55  ;;  %2691 = vperm.xlu1 %4796, %v5985_v22  }
 0x17a   :  { %8710 = vst [vmem:[#allocation69_spill] sm:$0xff] %v5989_v58  ;;  %8711 = vst [vmem:[#allocation70_spill] sm:$0xff] %v5993_v41  ;;  %v6008_v32 = vrot.slane %v8715_v8, %v5158_v1  ;;  %v8716_v41 = vcombine.high %v5231_v61, %v5391_v13  ;;  %v1897_v10 = vcombine.high %v5898_v57, %v1335_v53 }
 0x17b   :  { %v6002_v25 = vrot.slane %v8714_v50, %v5158_v1  ;;  %v6023_v50 = vrot.slane %v833_v7, %v5158_v1  ;;  %v905_v8 = vcombine.high %v8702_v30, %v8701_v39  ;;  %v1912_v61 = vcombine.low %v5793_v47, %v5859_v23  ;;  %8717 = vst [vmem:[#allocation19_spill] sm:$0xff] %v6035_v42  ;;  %v1343_v30 = vpop.permute.xlu1 %1342 }
 0x17c   :  { %v6014_v58 = vrot.slane %v8716_v41, %v5158_v1  ;;  %v1913_v13 = vcombine.high %v5793_v47, %v5859_v23  ;;  %v6031_v41 = vpop.permute.xlu0 %1356  ;;  %v6038_v57 = vrot.slane %v904_v51, %v5133_v43  ;;  %v1881_v53 = vcombine.high %v5720_v3, %v5735_v55  ;;  %2724 = vperm.xlu0 %4795, %v6035_v42  }
 0x17d   :  { %v1904_v39 = vrot.slane %v1896_v34, %v5133_v43  ;;  %v6045_v7 = vcombine.low %v5758_v2, %v5800_v18  ;;  %v6048_v47 = vrot.slane %v920_v29, %v5133_v43  ;;  %v849_v23 = vcombine.high %v5944_v60, %v5954_v46 }
 0x17e   :  { %v1928_v22 = vcombine.low %v1339_v19, %v1343_v30  ;;  %v1929_v26 = vcombine.high %v1339_v19, %v1343_v30  ;;  %v1888_v51 = vrot.slane %v1880_v11, %v5133_v43  ;;  %v1911_v3 = vrot.slane %v1897_v10, %v5133_v43 }
 0x17f   :  { %8718 = vst [vmem:[#allocation10_spill] sm:$0xff] %v6045_v7  ;;  %2697 = vperm.xlu1 %4796, %v6045_v7   ;;  %v6058_v55 = vcombine.high %v6002_v25, %v6023_v50  ;;  %v6061_v2 = vrot.slane %v848_v62, %v5158_v1  ;;  %v1920_v18 = vrot.slane %v1912_v61, %v5133_v43  ;;  %v6070_v30 = vpop.permute.xlu1 %1346 }
 0x180   :  { %v1927_v60 = vrot.slane %v1913_v13, %v5133_v43  ;;  %v1936_v29 = vrot.slane %v1928_v22, %v5133_v43  ;;  %v1943_v46 = vrot.slane %v1929_v26, %v5133_v43  ;;  %v6067_v34 = vpop.permute.xlu0 %1360  ;;  %v1895_v19 = vrot.slane %v1881_v53, %v5133_v43 }
 0x181   :  { %8719 = vst [vmem:[#allocation71_spill] sm:$0xff] %v6058_v55  ;;  %v1944_v11 = vcombine.low %v1888_v51, %v1904_v39  ;;  %v1945_v10 = vcombine.high %v1888_v51, %v1904_v39  ;;  %v6074_v62 = vcombine.low %v5830_v59, %v5851_v52  ;;  %2730 = vperm.xlu0 %4795, %v6058_v55   ;;  %v8739_v55 = vld [vmem:[#allocation9_spill] sm:$0xff] }
 0x182   :  { %v1976_v7 = vcombine.low %v1920_v18, %v1936_v29  ;;  %v1977_v61 = vcombine.high %v1920_v18, %v1936_v29  ;;  %v1992_v42 = vcombine.low %v1927_v60, %v1943_v46  ;;  %v1993_v13 = vcombine.high %v1927_v60, %v1943_v46 }
 0x183   :  { %8720 = vst [vmem:[#allocation72_spill] sm:$0xff] %v6074_v62  ;;  %v921_v26 = vcombine.high %v8713_v33, %v8712_v15  ;;  %v968_v22 = vcombine.low %v6038_v57, %v6048_v47  ;;  %v1960_v53 = vcombine.low %v1895_v19, %v1911_v3  ;;  %v1961_v39 = vcombine.high %v1895_v19, %v1911_v3  ;;  %v1351_v15 = vpop.permute.xlu1 %1350  ;;  %v8726_v19 = vld [vmem:[#allocation13_spill] sm:$0xff] }
 0x184   :  { %2703 = vperm.xlu1 %4796, %v6074_v62   ;;  %v6082_v51 = vpop.permute.xlu0 %1364  ;;  %v6086_v59 = vcombine.high %v6008_v32, %v6061_v2  ;;  %v6089_v52 = vrot.slane %v849_v23, %v5158_v1  ;;  %v6092_v18 = vrot.slane %v1976_v7, %v5158_v1  ;;  %v6095_v33 = vrot.slane %v1977_v61, %v5158_v1  ;;  %v8727_v61 = vld [vmem:[#allocation6_spill] sm:$0xff] }
 0x185   :  { %v6099_v3 = vcombine.low %v5836_v20, %v5889_v4  ;;  %v8723_v60 = vcombine.low %v5221_v6, %v5358_v48  ;;  %v6108_v23 = vrot.slane %v1992_v42, %v5158_v1  ;;  %v6111_v7 = vrot.slane %v1993_v13, %v5158_v1 }
 0x186   :  { %8721 = vst [vmem:[#allocation73_spill] sm:$0xff] %v6086_v59  ;;  %v6114_v46 = vrot.slane %v905_v8, %v5133_v43  ;;  %v1040_v62 = vcombine.low %v8727_v61, %v8726_v19  ;;  %2736 = vperm.xlu0 %4795, %v6086_v59   ;;  %v6120_v20 = vrot.slane %v1944_v11, %v5158_v1 }
 0x187   :  { %8722 = vst [vmem:[#allocation74_spill] sm:$0xff] %v6099_v3  ;;  %v6105_v29 = vrot.slane %v8723_v60, %v5158_v1  ;;  %8724 = vst [vmem:[#allocation75_spill] sm:$0xff] %v6108_v23  ;;  %v6123_v4 = vrot.slane %v1945_v10, %v5158_v1  ;;  %v6126_v42 = vrot.slane %v921_v26, %v5133_v43 }
 0x188   :  { %8725 = vst [vmem:[#allocation76_spill] sm:$0xff] %v6111_v7  ;;  %8728 = vst [vmem:[#allocation13_spill] sm:$0xff] %v6120_v20  ;;  %v969_v13 = vcombine.high %v6038_v57, %v6048_v47  ;;  %2709 = vperm.xlu1 %4796, %v6099_v3   ;;  %v6132_v8 = vrot.slane %v1960_v53, %v5158_v1  ;;  %v6135_v60 = vrot.slane %v1961_v39, %v5158_v1  ;;  %v6137_v59 = vpop.permute.xlu0 %1368  ;;  %v1355_v53 = vpop.permute.xlu1 %1354 }
 0x189   :  { %8729 = vst [vmem:[#allocation6_spill] sm:$0xff] %v6123_v4  ;;  %v6141_v11 = vcombine.high %v6014_v58, %v6089_v52  ;;  %v6144_v10 = vrot.slane %v968_v22, %v5158_v1  ;;  %v6148_v57 = vcombine.low %v6120_v20, %v6092_v18  ;;  %v6152_v47 = vcombine.low %v6123_v4, %v6095_v33 }
 0x18a   :  { %8730 = vst [vmem:[#allocation77_spill] sm:$0xff] %v6132_v8  ;;  %8731 = vst [vmem:[#allocation78_spill] sm:$0xff] %v6135_v60  ;;  %v2032_v26 = vcombine.low %v6070_v30, %v1351_v15  ;;  %v6157_v39 = vcombine.low %v5842_v54, %v5917_v5  ;;  %v6161_v3 = vcombine.low %v6132_v8, %v6108_v23  ;;  %v8741_v54 = vld [vmem:[#allocation29_spill] sm:$0xff] }
 0x18b   :  { %8732 = vst [vmem:[#allocation79_spill] sm:$0xff] %v6141_v11  ;;  %8733 = vst [vmem:[#allocation80_spill] sm:$0xff] %v6148_v57  ;;  %v6165_v22 = vcombine.low %v6135_v60, %v6111_v7  ;;  %v8738_v57 = vld [vmem:[#allocation20_spill] sm:$0xff]  ;;  %2742 = vperm.xlu0 %4795, %v6141_v11   ;;  %v8742_v5 = vcombine.low %v5224_v35, %v8741_v54  ;;  %v984_v11 = vcombine.low %v6114_v46, %v6126_v42 }
 0x18c   :  { %8734 = vst [vmem:[#allocation81_spill] sm:$0xff] %v6152_v47  ;;  %8735 = vst [vmem:[#allocation82_spill] sm:$0xff] %v6157_v39  ;;  %v1056_v20 = vcombine.low %v8739_v55, %v8738_v57  ;;  %v8740_v47 = vcombine.high %v5221_v6, %v5358_v48  ;;  %v2016_v6 = vcombine.low %v5895_v38, %v5910_v0  ;;  %2715 = vperm.xlu1 %4796, %v6157_v39  }
 0x18d   :  { %8736 = vst [vmem:[#allocation83_spill] sm:$0xff] %v6161_v3  ;;  %8737 = vst [vmem:[#allocation84_spill] sm:$0xff] %v6165_v22  ;;  %v6180_v3 = vrot.slane %v8742_v5, %v5158_v1  ;;  %v8743_v22 = vcombine.high %v5224_v35, %v8741_v54  ;;  %v2033_v48 = vcombine.high %v6070_v30, %v1351_v15  ;;  %v6203_v54 = vpop.permute.xlu0 %1372 }
 0x18e   :  { %v6174_v4 = vrot.slane %v8740_v47, %v5158_v1  ;;  %v6195_v47 = vrot.slane %v969_v13, %v5158_v1  ;;  %v1041_v5 = vcombine.high %v8727_v61, %v8726_v19  ;;  %v2048_v35 = vcombine.low %v5965_v14, %v6031_v41  ;;  %v1359_v61 = vpop.permute.xlu1 %1358 }
 0x18f   :  { %v6186_v60 = vrot.slane %v8743_v22, %v5158_v1  ;;  %v2049_v22 = vcombine.high %v5965_v14, %v6031_v41  ;;  %v6207_v7 = vcombine.high %v6105_v29, %v6144_v10  ;;  %v6210_v30 = vrot.slane %v1040_v62, %v5133_v43 }
 0x190   :  { %v2017_v15 = vcombine.high %v5895_v38, %v5910_v0  ;;  %v2040_v19 = vrot.slane %v2032_v26, %v5133_v43  ;;  %v6217_v13 = vcombine.low %v5933_v16, %v5972_v17  ;;  %v985_v14 = vcombine.high %v6114_v46, %v6126_v42 }
 0x191   :  { %8744 = vst [vmem:[#allocation20_spill] sm:$0xff] %v6207_v7  ;;  %v6222_v41 = vrot.slane %v1056_v20, %v5133_v43  ;;  %v2064_v39 = vcombine.low %v1355_v53, %v1359_v61  ;;  %v2065_v8 = vcombine.high %v1355_v53, %v1359_v61  ;;  %2748 = vperm.xlu0 %4795, %v6207_v7   ;;  %v6239_v26 = vpop.permute.xlu0 %1376 }
 0x192   :  { %8745 = vst [vmem:[#allocation9_spill] sm:$0xff] %v6217_v13  ;;  %v2024_v62 = vrot.slane %v2016_v6, %v5133_v43  ;;  %v2047_v38 = vrot.slane %v2033_v48, %v5133_v43  ;;  %2721 = vperm.xlu1 %4796, %v6217_v13   ;;  %v6230_v0 = vcombine.high %v6174_v4, %v6195_v47  ;;  %v6242_v61 = vpop.permute.xlu1 %1362 }
 0x193   :  { %v6233_v16 = vrot.slane %v984_v11, %v5158_v1  ;;  %v2056_v17 = vrot.slane %v2048_v35, %v5133_v43  ;;  %v2063_v46 = vrot.slane %v2049_v22, %v5133_v43  ;;  %v2072_v20 = vrot.slane %v2064_v39, %v5133_v43 }
 0x194   :  { %8746 = vst [vmem:[#allocation29_spill] sm:$0xff] %v6230_v0  ;;  %v2079_v42 = vrot.slane %v2065_v8, %v5133_v43  ;;  %v2031_v53 = vrot.slane %v2017_v15, %v5133_v43  ;;  %v2080_v6 = vcombine.low %v2024_v62, %v2040_v19  ;;  %v2081_v48 = vcombine.high %v2024_v62, %v2040_v19 }
 0x195   :  { %v6246_v11 = vcombine.low %v6002_v25, %v6023_v50  ;;  %v2112_v13 = vcombine.low %v2056_v17, %v2072_v20  ;;  %v2113_v35 = vcombine.high %v2056_v17, %v2072_v20  ;;  %2754 = vperm.xlu0 %4795, %v6230_v0   ;;  %v1057_v8 = vcombine.high %v8739_v55, %v8738_v57  ;;  %v6267_v57 = vpop.permute.xlu0 %1380  ;;  %v8752_v20 = vld [vmem:[#allocation33_spill] sm:$0xff] }
 0x196   :  { %v2128_v7 = vcombine.low %v2063_v46, %v2079_v42  ;;  %v2129_v22 = vcombine.high %v2063_v46, %v2079_v42  ;;  %v1104_v39 = vcombine.low %v6210_v30, %v6222_v41  ;;  %v2096_v15 = vcombine.low %v2031_v53, %v2047_v38  ;;  %v1367_v55 = vpop.permute.xlu1 %1366  ;;  %v8751_v46 = vld [vmem:[#allocation24_spill] sm:$0xff] }
 0x197   :  { %8747 = vst [vmem:[#allocation85_spill] sm:$0xff] %v6246_v11  ;;  %v2097_v19 = vcombine.high %v2031_v53, %v2047_v38  ;;  %2727 = vperm.xlu1 %4796, %v6246_v11   ;;  %v6256_v25 = vcombine.high %v6180_v3, %v6233_v16  ;;  %v6259_v50 = vrot.slane %v985_v14, %v5158_v1  ;;  %v8757_v11 = vld [vmem:[#allocation5_spill] sm:$0xff] }
 0x198   :  { %v6262_v62 = vrot.slane %v2112_v13, %v5158_v1  ;;  %v6265_v17 = vrot.slane %v2113_v35, %v5158_v1  ;;  %v6271_v38 = vcombine.low %v6008_v32, %v6061_v2  ;;  %v8753_v42 = vcombine.low %v8751_v46, %v8752_v20  ;;  %v8756_v35 = vld [vmem:[#allocation15_spill] sm:$0xff] }
 0x199   :  { %8748 = vst [vmem:[#allocation86_spill] sm:$0xff] %v6256_v25  ;;  %v6280_v14 = vrot.slane %v2128_v7, %v5158_v1  ;;  %v6283_v13 = vrot.slane %v2129_v22, %v5158_v1  ;;  %v1176_v0 = vcombine.low %v8757_v11, %v8756_v35  ;;  %v6288_v23 = vrot.slane %v1041_v5, %v5133_v43 }
 0x19a   :  { %8749 = vst [vmem:[#allocation87_spill] sm:$0xff] %v6265_v17  ;;  %8750 = vst [vmem:[#allocation88_spill] sm:$0xff] %v6271_v38  ;;  %v6277_v53 = vrot.slane %v8753_v42, %v5158_v1  ;;  %2760 = vperm.xlu0 %4795, %v6256_v25   ;;  %v6292_v32 = vrot.slane %v2080_v6, %v5158_v1  ;;  %v6295_v2 = vrot.slane %v2081_v48, %v5158_v1  ;;  %v8768_v25 = vld [vmem:[#allocation28_spill] sm:$0xff] }
 0x19b   :  { %8754 = vst [vmem:[#allocation24_spill] sm:$0xff] %v6280_v14  ;;  %8755 = vst [vmem:[#allocation33_spill] sm:$0xff] %v6283_v13  ;;  %v6298_v7 = vrot.slane %v1057_v8, %v5133_v43  ;;  %v1105_v22 = vcombine.high %v6210_v30, %v6222_v41  ;;  %2733 = vperm.xlu1 %4796, %v6271_v38   ;;  %v6304_v42 = vrot.slane %v2096_v15, %v5158_v1  ;;  %v1371_v15 = vpop.permute.xlu1 %1370 }
 0x19c   :  { %8758 = vst [vmem:[#allocation15_spill] sm:$0xff] %v6292_v32  ;;  %8759 = vst [vmem:[#allocation5_spill] sm:$0xff] %v6295_v2  ;;  %v6307_v5 = vrot.slane %v2097_v19, %v5158_v1  ;;  %v6311_v6 = vcombine.high %v6186_v60, %v6259_v50  ;;  %v6314_v48 = vrot.slane %v1104_v39, %v5158_v1 }
 0x19d   :  { %8760 = vst [vmem:[#allocation89_spill] sm:$0xff] %v6304_v42  ;;  %v6318_v8 = vcombine.low %v6292_v32, %v6262_v62  ;;  %v6322_v30 = vcombine.low %v6295_v2, %v6265_v17  ;;  %v2168_v41 = vcombine.low %v6242_v61, %v1367_v55  ;;  %v6327_v19 = vcombine.low %v6014_v58, %v6089_v52 }
 0x19e   :  { %8761 = vst [vmem:[#allocation90_spill] sm:$0xff] %v6307_v5  ;;  %8762 = vst [vmem:[#allocation91_spill] sm:$0xff] %v6311_v6  ;;  %v6331_v38 = vcombine.low %v6304_v42, %v6280_v14  ;;  %v6335_v39 = vcombine.low %v6307_v5, %v6283_v13  ;;  %2766 = vperm.xlu0 %4795, %v6311_v6   ;;  %v8770_v58 = vcombine.high %v8751_v46, %v8752_v20  ;;  %v8772_v42 = vld [vmem:[#allocation34_spill] sm:$0xff]  ;;  %v6359_v6 = vpop.permute.xlu0 %1384 }
 0x19f   :  { %8763 = vst [vmem:[#allocation92_spill] sm:$0xff] %v6318_v8  ;;  %8764 = vst [vmem:[#allocation93_spill] sm:$0xff] %v6322_v30  ;;  %v1177_v8 = vcombine.high %v8757_v11, %v8756_v35  ;;  %v8769_v30 = vld [vmem:[#allocation11_spill] sm:$0xff]  ;;  %v1120_v11 = vcombine.low %v6288_v23, %v6298_v7  ;;  %v2152_v35 = vcombine.low %v6067_v34, %v6082_v51  ;;  %2739 = vperm.xlu1 %4796, %v6327_v19  }
 0x1a0   :  { %8765 = vst [vmem:[#allocation94_spill] sm:$0xff] %v6327_v19  ;;  %8766 = vst [vmem:[#allocation95_spill] sm:$0xff] %v6331_v38  ;;  %v1192_v2 = vcombine.low %v8769_v30, %v8768_v25  ;;  %v6346_v52 = vrot.slane %v8770_v58, %v5158_v1  ;;  %v8771_v38 = vld [vmem:[#allocation25_spill] sm:$0xff]  ;;  %v6363_v46 = vrot.slane %v1105_v22, %v5158_v1 }
 0x1a1   :  { %8767 = vst [vmem:[#allocation96_spill] sm:$0xff] %v6335_v39  ;;  %v8773_v14 = vcombine.low %v8771_v38, %v8772_v42  ;;  %v2169_v39 = vcombine.high %v6242_v61, %v1367_v55  ;;  %v6366_v20 = vrot.slane %v1176_v0, %v5133_v43  ;;  %v2185_v58 = vcombine.high %v6137_v59, %v6203_v54  ;;  %v1375_v0 = vpop.permute.xlu1 %1374 }
 0x1a2   :  { %v6374_v13 = vcombine.high %v6277_v53, %v6314_v48  ;;  %v1193_v61 = vcombine.high %v8769_v30, %v8768_v25  ;;  %v2153_v55 = vcombine.high %v6067_v34, %v6082_v51  ;;  %v2176_v22 = vrot.slane %v2168_v41, %v5133_v43 }
 0x1a3   :  { %v6352_v5 = vrot.slane %v8773_v14, %v5158_v1  ;;  %v2184_v14 = vcombine.low %v6137_v59, %v6203_v54  ;;  %v6383_v19 = vcombine.low %v6105_v29, %v6144_v10  ;;  %v6386_v17 = vrot.slane %v1192_v2, %v5133_v43 }
 0x1a4   :  { %8774 = vst [vmem:[#allocation28_spill] sm:$0xff] %v6374_v13  ;;  %v1121_v59 = vcombine.high %v6288_v23, %v6298_v7  ;;  %v2200_v54 = vcombine.low %v1371_v15, %v1375_v0  ;;  %v2201_v32 = vcombine.high %v1371_v15, %v1375_v0  ;;  %2772 = vperm.xlu0 %4795, %v6374_v13  }
 0x1a5   :  { %8775 = vst [vmem:[#allocation11_spill] sm:$0xff] %v6383_v19  ;;  %v2160_v25 = vrot.slane %v2152_v35, %v5133_v43  ;;  %v2183_v34 = vrot.slane %v2169_v39, %v5133_v43  ;;  %2745 = vperm.xlu1 %4796, %v6383_v19   ;;  %v6396_v51 = vcombine.high %v6346_v52, %v6363_v46  ;;  %v6406_v39 = vpop.permute.xlu0 %1388  ;;  %v1379_v35 = vpop.permute.xlu1 %1378 }
 0x1a6   :  { %v6399_v29 = vrot.slane %v1120_v11, %v5158_v1  ;;  %v2192_v10 = vrot.slane %v2184_v14, %v5133_v43  ;;  %v2199_v23 = vrot.slane %v2185_v58, %v5133_v43  ;;  %v2208_v2 = vrot.slane %v2200_v54, %v5133_v43  ;;  %v8778_v58 = vld [vmem:[#allocation35_spill] sm:$0xff] }
 0x1a7   :  { %8776 = vst [vmem:[#allocation25_spill] sm:$0xff] %v6396_v51  ;;  %v2215_v7 = vrot.slane %v2201_v32, %v5133_v43  ;;  %v2167_v30 = vrot.slane %v2153_v55, %v5133_v43  ;;  %v2216_v41 = vcombine.low %v2160_v25, %v2176_v22  ;;  %v2217_v15 = vcombine.high %v2160_v25, %v2176_v22  ;;  %v8779_v54 = vld [vmem:[#allocation23_spill] sm:$0xff] }
 0x1a8   :  { %v6410_v0 = vcombine.low %v6174_v4, %v6195_v47  ;;  %v2248_v11 = vcombine.low %v2192_v10, %v2208_v2  ;;  %v2249_v19 = vcombine.high %v2192_v10, %v2208_v2  ;;  %2778 = vperm.xlu0 %4795, %v6396_v51   ;;  %v1224_v32 = vcombine.low %v8779_v54, %v8778_v58 }
 0x1a9   :  { %v2264_v14 = vcombine.low %v2199_v23, %v2215_v7  ;;  %v2265_v13 = vcombine.high %v2199_v23, %v2215_v7  ;;  %v1240_v55 = vcombine.low %v6366_v20, %v6386_v17  ;;  %v2232_v22 = vcombine.low %v2167_v30, %v2183_v34  ;;  %v1383_v2 = vpop.permute.xlu1 %1382 }
 0x1aa   :  { %8777 = vst [vmem:[#allocation34_spill] sm:$0xff] %v6410_v0  ;;  %v2233_v25 = vcombine.high %v2167_v30, %v2183_v34  ;;  %2751 = vperm.xlu1 %4796, %v6410_v0   ;;  %v6420_v4 = vcombine.high %v6352_v5, %v6399_v29  ;;  %v6423_v47 = vrot.slane %v1121_v59, %v5158_v1 }
 0x1ab   :  { %v6426_v10 = vrot.slane %v2248_v11, %v5158_v1  ;;  %v6429_v23 = vrot.slane %v2249_v19, %v5158_v1  ;;  %v6433_v7 = vcombine.low %v6180_v3, %v6233_v16  ;;  %v8782_v34 = vcombine.high %v8771_v38, %v8772_v42  ;;  %v6462_v42 = vpop.permute.xlu0 %1392 }
 0x1ac   :  { %8780 = vst [vmem:[#allocation35_spill] sm:$0xff] %v6420_v4  ;;  %v6442_v59 = vrot.slane %v2264_v14, %v5158_v1  ;;  %v6445_v11 = vrot.slane %v2265_v13, %v5158_v1  ;;  %v6448_v19 = vrot.slane %v1177_v8, %v5133_v43  ;;  %v6451_v0 = vrot.slane %v1193_v61, %v5133_v43 }
 0x1ad   :  { %8781 = vst [vmem:[#allocation23_spill] sm:$0xff] %v6433_v7  ;;  %v6439_v30 = vrot.slane %v8782_v34, %v5158_v1  ;;  %2784 = vperm.xlu0 %4795, %v6420_v4   ;;  %v6455_v3 = vrot.slane %v2216_v41, %v5158_v1  ;;  %v6458_v16 = vrot.slane %v2217_v15, %v5158_v1  ;;  %v1387_v14 = vpop.permute.xlu1 %1386  ;;  %v8791_v34 = vld [vmem:[#allocation22_spill] sm:$0xff] }
 0x1ae   :  { %8783 = vst [vmem:[#allocation97_spill] sm:$0xff] %v6445_v11  ;;  %v1241_v38 = vcombine.high %v6366_v20, %v6386_v17  ;;  %2757 = vperm.xlu1 %4796, %v6433_v7   ;;  %v6467_v13 = vcombine.low %v6186_v60, %v6259_v50  ;;  %v6470_v8 = vrot.slane %v2232_v22, %v5158_v1 }
 0x1af   :  { %v6473_v61 = vrot.slane %v2233_v25, %v5158_v1  ;;  %v6477_v41 = vcombine.high %v6439_v30, %v6423_v47  ;;  %v6480_v17 = vrot.slane %v1240_v55, %v5158_v1  ;;  %v6484_v20 = vcombine.low %v6455_v3, %v6426_v10 }
 0x1b0   :  { %8784 = vst [vmem:[#allocation98_spill] sm:$0xff] %v6467_v13  ;;  %v6488_v60 = vcombine.low %v6458_v16, %v6429_v23  ;;  %v2304_v50 = vcombine.low %v1379_v35, %v1383_v2  ;;  %v2305_v15 = vcombine.high %v1379_v35, %v1383_v2  ;;  %v6492_v22 = vcombine.low %v6470_v8, %v6442_v59 }
 0x1b1   :  { %8785 = vst [vmem:[#allocation99_spill] sm:$0xff] %v6473_v61  ;;  %8786 = vst [vmem:[#allocation100_spill] sm:$0xff] %v6477_v41  ;;  %v6496_v25 = vcombine.low %v6473_v61, %v6445_v11  ;;  %v1225_v55 = vcombine.high %v8779_v54, %v8778_v58  ;;  %2790 = vperm.xlu0 %4795, %v6477_v41   ;;  %v1256_v35 = vcombine.low %v6448_v19, %v6451_v0  ;;  %v1391_v4 = vpop.permute.xlu1 %1390 }
 0x1b2   :  { %8787 = vst [vmem:[#allocation101_spill] sm:$0xff] %v6484_v20  ;;  %8788 = vst [vmem:[#allocation102_spill] sm:$0xff] %v6488_v60  ;;  %v8792_v20 = vld [vmem:[#allocation31_spill] sm:$0xff]  ;;  %v2288_v2 = vcombine.low %v6239_v26, %v6267_v57  ;;  %2763 = vperm.xlu1 %4796, %v6467_v13   ;;  %v6515_v58 = vrot.slane %v1241_v38, %v5158_v1  ;;  %v2320_v54 = vcombine.low %v6359_v6, %v6406_v39  ;;  %v6533_v13 = vpop.permute.xlu0 %1396 }
 0x1b3   :  { %8789 = vst [vmem:[#allocation103_spill] sm:$0xff] %v6492_v22  ;;  %8790 = vst [vmem:[#allocation104_spill] sm:$0xff] %v6496_v25  ;;  %v8793_v60 = vcombine.low %v8791_v34, %v8792_v20  ;;  %v2289_v25 = vcombine.high %v6239_v26, %v6267_v57  ;;  %v8795_v41 = vcombine.high %v8791_v34, %v8792_v20 }
 0x1b4   :  { %v2312_v57 = vrot.slane %v2304_v50, %v5133_v43  ;;  %v2319_v38 = vrot.slane %v2305_v15, %v5133_v43  ;;  %v1257_v51 = vcombine.high %v6448_v19, %v6451_v0  ;;  %v2336_v20 = vcombine.low %v1387_v14, %v1391_v4 }
 0x1b5   :  { %v6505_v7 = vrot.slane %v8793_v60, %v5158_v1  ;;  %v2321_v60 = vcombine.high %v6359_v6, %v6406_v39  ;;  %v6529_v26 = vrot.slane %v8795_v41, %v5158_v1  ;;  %v6537_v6 = vcombine.low %v6277_v53, %v6314_v48 }
 0x1b6   :  { %v6540_v39 = vrot.slane %v1224_v32, %v5158_v1  ;;  %v2337_v41 = vcombine.high %v1387_v14, %v1391_v4  ;;  %v6547_v50 = vcombine.low %v6346_v52, %v6363_v46  ;;  %v2296_v15 = vrot.slane %v2288_v2, %v5133_v43  ;;  %v1395_v2 = vpop.permute.xlu1 %1394 }
 0x1b7   :  { %v6523_v22 = vcombine.high %v6505_v7, %v6480_v17  ;;  %8796 = vst [vmem:[#allocation31_spill] sm:$0xff] %v6537_v6  ;;  %v2303_v34 = vrot.slane %v2289_v25, %v5133_v43  ;;  %2769 = vperm.xlu1 %4796, %v6537_v6   ;;  %v6554_v53 = vcombine.high %v6529_v26, %v6515_v58 }
 0x1b8   :  { %v6557_v48 = vrot.slane %v1256_v35, %v5158_v1  ;;  %v2328_v0 = vrot.slane %v2320_v54, %v5133_v43  ;;  %v2335_v32 = vrot.slane %v2321_v60, %v5133_v43  ;;  %v2344_v52 = vrot.slane %v2336_v20, %v5133_v43  ;;  %v1401_v35 = vpop.permute.xlu0 %1400 }
 0x1b9   :  { %8794 = vst [vmem:[#allocation22_spill] sm:$0xff] %v6523_v22  ;;  %2796 = vperm.xlu0 %4795, %v6523_v22   ;;  %v2351_v46 = vrot.slane %v2337_v41, %v5133_v43  ;;  %v2352_v4 = vcombine.low %v2296_v15, %v2312_v57  ;;  %v2353_v19 = vcombine.high %v2296_v15, %v2312_v57 }
 0x1ba   :  { %v2368_v14 = vcombine.low %v2303_v34, %v2319_v38  ;;  %v2369_v25 = vcombine.high %v2303_v34, %v2319_v38  ;;  %v2384_v6 = vcombine.low %v2328_v0, %v2344_v52  ;;  %v2385_v22 = vcombine.high %v2328_v0, %v2344_v52  ;;  %v1399_v15 = vpop.permute.xlu1 %1398 }
 0x1bb   :  { %v2400_v61 = vcombine.low %v2335_v32, %v2351_v46  ;;  %v2401_v11 = vcombine.high %v2335_v32, %v2351_v46  ;;  %2775 = vperm.xlu1 %4796, %v6547_v50   ;;  %v6567_v54 = vcombine.high %v6540_v39, %v6557_v48  ;;  %v6570_v60 = vrot.slane %v1257_v51, %v5158_v1 }
 0x1bc   :  { %v6573_v57 = vrot.slane %v2384_v6, %v5158_v1  ;;  %v6576_v38 = vrot.slane %v2385_v22, %v5158_v1  ;;  %v6586_v34 = vcombine.low %v6352_v5, %v6399_v29  ;;  %v6589_v51 = vrot.slane %v2352_v4, %v5158_v1  ;;  %v1405_v52 = vpop.permute.xlu0 %1404 }
 0x1bd   :  { %2802 = vperm.xlu0 %4795, %v6554_v53   ;;  %v6579_v20 = vrot.slane %v2400_v61, %v5158_v1  ;;  %v6582_v41 = vrot.slane %v2401_v11, %v5158_v1  ;;  %v6592_v6 = vrot.slane %v2353_v19, %v5158_v1  ;;  %v6596_v22 = vrot.slane %v1225_v55, %v5158_v1 }
 0x1be   :  { %8797 = vst [vmem:[#allocation105_spill] sm:$0xff] %v6586_v34  ;;  %v6599_v61 = vrot.slane %v2368_v14, %v5158_v1  ;;  %v6602_v11 = vrot.slane %v2369_v25, %v5158_v1  ;;  %v6607_v5 = vcombine.low %v6589_v51, %v6573_v57  ;;  %v2440_v46 = vcombine.low %v1395_v2, %v1399_v15  ;;  %v1403_v19 = vpop.permute.xlu1 %1402 }
 0x1bf   :  { %2781 = vperm.xlu1 %4796, %v6586_v34   ;;  %v6611_v29 = vcombine.low %v6592_v6, %v6576_v38  ;;  %v6615_v55 = vcombine.high %v6596_v22, %v6570_v60  ;;  %v2441_v4 = vcombine.high %v1395_v2, %v1399_v15  ;;  %v6627_v14 = vcombine.low %v6439_v30, %v6423_v47 }
 0x1c0   :  { %8798 = vst [vmem:[#allocation106_spill] sm:$0xff] %v6607_v5  ;;  %v6619_v0 = vcombine.low %v6599_v61, %v6579_v20  ;;  %v6623_v32 = vcombine.low %v6602_v11, %v6582_v41  ;;  %v2424_v25 = vcombine.low %v6462_v42, %v6533_v13  ;;  %v6637_v2 = vcombine.low %v5636_v36, %v5614_v56  ;;  %v6641_v5 = vpop.permute.xlu0 %2625 }
 0x1c1   :  { %2808 = vperm.xlu0 %4795, %v6567_v54   ;;  %8799 = vst [vmem:[#allocation107_spill] sm:$0xff] %v6611_v29  ;;  %v2456_v29 = vcombine.low %v1401_v35, %v1405_v52  ;;  %v2448_v15 = vrot.slane %v2440_v46, %v5133_v43  ;;  %v2455_v47 = vrot.slane %v2441_v4, %v5133_v43  ;;  %8803 = vst [vmem:[#allocation111_spill] sm:$0xff] %v6641_v5 }
 0x1c2   :  { %8800 = vst [vmem:[#allocation108_spill] sm:$0xff] %v6619_v0  ;;  %8801 = vst [vmem:[#allocation109_spill] sm:$0xff] %v6623_v32  ;;  %v2425_v0 = vcombine.high %v6462_v42, %v6533_v13  ;;  %v2457_v32 = vcombine.high %v1401_v35, %v1405_v52  ;;  %v1407_v30 = vpop.permute.xlu1 %1406  ;;  %v6645_v34 = vcombine.low %v6505_v7, %v6480_v17 }
 0x1c3   :  { %2787 = vperm.xlu1 %4796, %v6627_v14   ;;  %8802 = vst [vmem:[#allocation110_spill] sm:$0xff] %v6637_v2  ;;  %v2472_v42 = vcombine.low %v1403_v19, %v1407_v30  ;;  %v2473_v13 = vcombine.high %v1403_v19, %v1407_v30  ;;  %v2432_v35 = vrot.slane %v2424_v25, %v5133_v43 }
 0x1c4   :  { %8804 = vst [vmem:[#allocation112_spill] sm:$0xff] %v6645_v34  ;;  %v2439_v56 = vrot.slane %v2425_v0, %v5133_v43  ;;  %v6653_v36 = vcombine.low %v6529_v26, %v6515_v58  ;;  %v6657_v52 = vcombine.high %v5640_v37, %v5617_v45  ;;  %v2464_v7 = vrot.slane %v2456_v29, %v5133_v43  ;;  %v6663_v5 = vpop.permute.xlu0 %2634  ;;  %v8805_v45 = vld [vmem:[#allocation41_spill] sm:$0xff] }
 0x1c5   :  { %2814 = vperm.xlu0 %4795, %v6615_v55   ;;  %v2471_v17 = vrot.slane %v2457_v32, %v5133_v43  ;;  %v2480_v46 = vrot.slane %v2472_v42, %v5133_v43  ;;  %v2487_v4 = vrot.slane %v2473_v13, %v5133_v43  ;;  %v2488_v19 = vcombine.low %v2432_v35, %v2448_v15 }
 0x1c6   :  { %v2489_v0 = vcombine.high %v2432_v35, %v2448_v15  ;;  %v2504_v25 = vcombine.low %v2439_v56, %v2455_v47  ;;  %v2505_v30 = vcombine.high %v2439_v56, %v2455_v47  ;;  %v6669_v37 = vcombine.high %v8805_v45, %v5620_v9  ;;  %v8820_v45 = vld [vmem:[#allocation52_spill] sm:$0xff] }
 0x1c7   :  { %2793 = vperm.xlu1 %4796, %v6645_v34   ;;  %v2520_v58 = vcombine.low %v2464_v7, %v2480_v46  ;;  %v2521_v26 = vcombine.high %v2464_v7, %v2480_v46  ;;  %v2537_v34 = vcombine.high %v2471_v17, %v2487_v4  ;;  %v6687_v42 = vcombine.low %v6540_v39, %v6557_v48 }
 0x1c8   :  { %v6683_v47 = vpop.permute.xlu0 %2640  ;;  %v6690_v9 = vrot.slane %v2488_v19, %v5158_v1  ;;  %v6693_v13 = vrot.slane %v2489_v0, %v5158_v1  ;;  %v6696_v35 = vrot.slane %v2504_v25, %v5158_v1  ;;  %v6717_v56 = vcombine.high %v5657_v27, %v5646_v21  ;;  %v6737_v27 = vpop.permute.xlu1 %2628  ;;  %v8812_v19 = vld [vmem:[#allocation27_spill] sm:$0xff] }
 0x1c9   :  { %3751 = vperm.xlu0 %4795, %v6637_v2   ;;  %v2536_v2 = vcombine.low %v2471_v17, %v2487_v4  ;;  %v6672_v43 = vrot.slane %v2520_v58, %v5158_v1  ;;  %v6675_v29 = vrot.slane %v2521_v26, %v5158_v1  ;;  %v6681_v15 = vrot.slane %v2537_v34, %v5158_v1 }
 0x1ca   :  { %v6700_v34 = vrot.slane %v2505_v30, %v5158_v1  ;;  %8809 = vst [vmem:[#allocation115_spill] sm:$0xff] %v6717_v56  ;;  %v6727_v17 = vcombine.low %v6596_v22, %v6570_v60  ;;  %v6733_v46 = vcombine.high %v5776_v40, %v5745_v24  ;;  %v8511_v4 = vmov 1   ;;  %v8813_v60 = vld [vmem:[#allocation12_spill] sm:$0xff]  ;;  %v8815_v24 = vld [vmem:[#allocation21_spill] sm:$0xff] }
 0x1cb   :  { %2799 = vperm.xlu1 %4796, %v6653_v36   ;;  %v6678_v32 = vrot.slane %v2536_v2, %v5158_v1  ;;  %v6705_v39 = vcombine.low %v6690_v9, %v6672_v43  ;;  %v6709_v48 = vcombine.low %v6693_v13, %v6675_v29  ;;  %v6744_v22 = vcombine.high %v8813_v60, %v5748_v63  ;;  %v8816_v40 = vld [vmem:[#allocation4_spill] sm:$0xff]  ;;  %v8819_v63 = vld [vmem:[#allocation30_spill] sm:$0xff] }
 0x1cc   :  { %v6721_v1 = vcombine.low %v6700_v34, %v6681_v15  ;;  %v6723_v7 = vpop.permute.xlu0 %2646  ;;  %8811 = vst [vmem:[#allocation117_spill] sm:$0xff] %v6733_v46  ;;  %v6748_v25 = vpop.permute.xlu1 %2631  ;;  %v6754_v30 = vcombine.high %v8816_v40, %v5761_v12  ;;  %v8824_v12 = vld [vmem:[#allocation32_spill] sm:$0xff] }
 0x1cd   :  { %3760 = vperm.xlu0 %4795, %v6657_v52   ;;  %8806 = vst [vmem:[#allocation41_spill] sm:$0xff] %v6705_v39  ;;  %8807 = vst [vmem:[#allocation113_spill] sm:$0xff] %v6709_v48  ;;  %v6713_v2 = vcombine.low %v6696_v35, %v6678_v32 }
 0x1ce   :  { %8810 = vst [vmem:[#allocation116_spill] sm:$0xff] %v6721_v1  ;;  %8814 = vst [vmem:[#allocation27_spill] sm:$0xff] %v6744_v22 }
 0x1cf   :  { %2805 = vperm.xlu1 %4796, %v6687_v42   ;;  %8808 = vst [vmem:[#allocation114_spill] sm:$0xff] %v6713_v2  ;;  %8817 = vst [vmem:[#allocation12_spill] sm:$0xff] %v6754_v30 }
 0x1d0   :  { %v6735_v21 = vpop.permute.xlu0 %2652  ;;  %v6758_v26 = vpop.permute.xlu1 %2637 }
 0x1d1   :  { %3766 = vperm.xlu0 %4795, %v6669_v37  }
 0x1d3   :  { %2811 = vperm.xlu1 %4796, %v6727_v17  }
 0x1d4   :  { %v6746_v0 = vpop.permute.xlu0 %2658 }
 0x1d5   :  { %3772 = vperm.xlu0 %4795, %v6717_v56  }
 0x1d7   :  { %4797 = vset.pattern.permute.xlu1 %v8511_v4 }
 0x1d8   :  { %3160 = vperm.xlu1 %4797, %v8812_v19   ;;  %v6756_v58 = vpop.permute.xlu0 %2664  ;;  %v8821_v19 = vld [vmem:[#allocation53_spill] sm:$0xff] }
 0x1d9   :  { %3778 = vperm.xlu0 %4795, %v6733_v46   ;;  %8818 = vst [vmem:[#allocation21_spill] sm:$0xff] %v6756_v58  ;;  %v6764_v60 = vcombine.high %v8821_v19, %v8820_v45  ;;  %v8828_v45 = vld [vmem:[#allocation3_spill] sm:$0xff] }
 0x1da   :  { %v6784_v19 = vcombine.high %v8828_v45, %v5923_v31  ;;  %v8834_v31 = vld [vmem:[#allocation2_spill] sm:$0xff]  ;;  %v8836_v45 = vld [vmem:[#allocation64_spill] sm:$0xff] }
 0x1db   :  { %8822 = vst [vmem:[#allocation4_spill] sm:$0xff] %v6764_v60 }
 0x1dc   :  { %3166 = vperm.xlu1 %4797, %v8815_v24   ;;  %v6766_v4 = vpop.permute.xlu0 %2670  ;;  %v8825_v24 = vld [vmem:[#allocation14_spill] sm:$0xff]  ;;  %8829 = vst [vmem:[#allocation53_spill] sm:$0xff] %v6784_v19 }
 0x1dd   :  { %3784 = vperm.xlu0 %4795, %v6744_v22   ;;  %8823 = vst [vmem:[#allocation30_spill] sm:$0xff] %v6766_v4  ;;  %v6768_v22 = vpop.permute.xlu1 %2643  ;;  %v6774_v40 = vcombine.high %v8825_v24, %v5920_v49  ;;  %v8831_v49 = vld [vmem:[#allocation37_spill] sm:$0xff] }
 0x1df   :  { %8826 = vst [vmem:[#allocation52_spill] sm:$0xff] %v6774_v40 }
 0x1e0   :  { %3169 = vperm.xlu1 %4797, %v8819_v63   ;;  %v6776_v46 = vpop.permute.xlu0 %2676  ;;  %v8827_v63 = vld [vmem:[#allocation36_spill] sm:$0xff] }
 0x1e1   :  { %3790 = vperm.xlu0 %4795, %v6754_v30   ;;  %v6778_v30 = vpop.permute.xlu1 %2649 }
 0x1e4   :  { %3175 = vperm.xlu1 %4797, %v8824_v12   ;;  %v6786_v4 = vpop.permute.xlu0 %2682  ;;  %v6794_v12 = vcombine.high %v5960_v28, %v5936_v44  ;;  %v8840_v44 = vld [vmem:[#allocation39_spill] sm:$0xff]  ;;  %v8841_v28 = vld [vmem:[#allocation13_spill] sm:$0xff] }
 0x1e5   :  { %3796 = vperm.xlu0 %4795, %v6764_v60   ;;  %8830 = vst [vmem:[#allocation32_spill] sm:$0xff] %v6786_v4  ;;  %v6788_v60 = vpop.permute.xlu1 %2655 }
 0x1e6   :  { %8832 = vst [vmem:[#allocation14_spill] sm:$0xff] %v6794_v12 }
 0x1e8   :  { %3181 = vperm.xlu1 %4797, %v8827_v63   ;;  %v6796_v24 = vpop.permute.xlu0 %2688  ;;  %v8835_v63 = vld [vmem:[#allocation63_spill] sm:$0xff] }
 0x1e9   :  { %3802 = vperm.xlu0 %4795, %v6774_v40   ;;  %8833 = vst [vmem:[#allocation36_spill] sm:$0xff] %v6796_v24  ;;  %v6798_v40 = vpop.permute.xlu1 %2661  ;;  %v6804_v4 = vcombine.high %v8836_v45, %v8835_v63  ;;  %v8845_v63 = vld [vmem:[#allocation6_spill] sm:$0xff] }
 0x1ea   :  { %v6824_v45 = vcombine.high %v8845_v63, %v6095_v33  ;;  %v8853_v33 = vld [vmem:[#allocation48_spill] sm:$0xff]  ;;  %v8855_v63 = vld [vmem:[#allocation78_spill] sm:$0xff] }
 0x1eb   :  { %8837 = vst [vmem:[#allocation3_spill] sm:$0xff] %v6804_v4 }
 0x1ec   :  { %3187 = vperm.xlu1 %4797, %v8831_v49   ;;  %v6806_v56 = vpop.permute.xlu0 %2694  ;;  %v6814_v49 = vcombine.high %v8841_v28, %v6092_v18  ;;  %8846 = vst [vmem:[#allocation39_spill] sm:$0xff] %v6824_v45  ;;  %v8848_v18 = vld [vmem:[#allocation45_spill] sm:$0xff] }
 0x1ed   :  { %3808 = vperm.xlu0 %4795, %v6784_v19   ;;  %8838 = vst [vmem:[#allocation37_spill] sm:$0xff] %v6806_v56  ;;  %v6808_v19 = vpop.permute.xlu1 %2667  ;;  %v8850_v28 = vld [vmem:[#allocation77_spill] sm:$0xff] }
 0x1ee   :  { %8839 = vst [vmem:[#allocation2_spill] sm:$0xff] %v6808_v19  ;;  %8842 = vst [vmem:[#allocation63_spill] sm:$0xff] %v6814_v49 }
 0x1f0   :  { %3193 = vperm.xlu1 %4797, %v8834_v31   ;;  %v6816_v24 = vpop.permute.xlu0 %2700  ;;  %v8844_v31 = vld [vmem:[#allocation16_spill] sm:$0xff] }
 0x1f1   :  { %3814 = vperm.xlu0 %4795, %v6794_v12   ;;  %8843 = vst [vmem:[#allocation64_spill] sm:$0xff] %v6816_v24  ;;  %v6818_v12 = vpop.permute.xlu1 %2673 }
 0x1f4   :  { %3199 = vperm.xlu1 %4797, %v8840_v44   ;;  %v6826_v56 = vpop.permute.xlu0 %2706  ;;  %v8849_v44 = vld [vmem:[#allocation75_spill] sm:$0xff] }
 0x1f5   :  { %3820 = vperm.xlu0 %4795, %v6804_v4   ;;  %8847 = vst [vmem:[#allocation13_spill] sm:$0xff] %v6826_v56  ;;  %v6828_v4 = vpop.permute.xlu1 %2679  ;;  %v6834_v24 = vcombine.high %v8850_v28, %v8849_v44  ;;  %v8860_v44 = vld [vmem:[#allocation15_spill] sm:$0xff] }
 0x1f6   :  { %v6854_v28 = vcombine.high %v8860_v44, %v6262_v62  ;;  %v8870_v62 = vld [vmem:[#allocation17_spill] sm:$0xff] }
 0x1f7   :  { %8851 = vst [vmem:[#allocation16_spill] sm:$0xff] %v6834_v24  ;;  %v8872_v44 = vld [vmem:[#allocation89_spill] sm:$0xff] }
 0x1f8   :  { %3205 = vperm.xlu1 %4797, %v8844_v31   ;;  %v6836_v58 = vpop.permute.xlu0 %2712  ;;  %v8854_v31 = vld [vmem:[#allocation76_spill] sm:$0xff]  ;;  %8861 = vst [vmem:[#allocation48_spill] sm:$0xff] %v6854_v28 }
 0x1f9   :  { %3826 = vperm.xlu0 %4795, %v6814_v49   ;;  %8852 = vst [vmem:[#allocation6_spill] sm:$0xff] %v6836_v58  ;;  %v6838_v49 = vpop.permute.xlu1 %2685  ;;  %v6844_v56 = vcombine.high %v8855_v63, %v8854_v31  ;;  %v8865_v31 = vld [vmem:[#allocation87_spill] sm:$0xff]  ;;  %v8866_v63 = vld [vmem:[#allocation5_spill] sm:$0xff] }
 0x1fb   :  { %8856 = vst [vmem:[#allocation45_spill] sm:$0xff] %v6844_v56 }
 0x1fc   :  { %3211 = vperm.xlu1 %4797, %v8848_v18   ;;  %v6846_v19 = vpop.permute.xlu0 %2718  ;;  %v8859_v18 = vld [vmem:[#allocation50_spill] sm:$0xff] }
 0x1fd   :  { %3832 = vperm.xlu0 %4795, %v6824_v45   ;;  %8857 = vst [vmem:[#allocation75_spill] sm:$0xff] %v6846_v19  ;;  %v6848_v45 = vpop.permute.xlu1 %2691  ;;  %v6864_v19 = vcombine.high %v8866_v63, %v8865_v31  ;;  %v8876_v31 = vld [vmem:[#allocation33_spill] sm:$0xff]  ;;  %v8877_v63 = vld [vmem:[#allocation90_spill] sm:$0xff] }
 0x1fe   :  { %8858 = vst [vmem:[#allocation77_spill] sm:$0xff] %v6848_v45 }
 0x1ff   :  { %8867 = vst [vmem:[#allocation50_spill] sm:$0xff] %v6864_v19 }
 0x200   :  { %3217 = vperm.xlu1 %4797, %v8853_v33   ;;  %v6856_v58 = vpop.permute.xlu0 %2724  ;;  %v8864_v33 = vld [vmem:[#allocation54_spill] sm:$0xff] }
 0x201   :  { %3838 = vperm.xlu0 %4795, %v6834_v24   ;;  %8862 = vst [vmem:[#allocation76_spill] sm:$0xff] %v6856_v58  ;;  %v6858_v24 = vpop.permute.xlu1 %2697 }
 0x202   :  { %8863 = vst [vmem:[#allocation78_spill] sm:$0xff] %v6858_v24 }
 0x204   :  { %3223 = vperm.xlu1 %4797, %v8859_v18   ;;  %v6866_v45 = vpop.permute.xlu0 %2730  ;;  %v8871_v18 = vld [vmem:[#allocation24_spill] sm:$0xff] }
 0x205   :  { %3844 = vperm.xlu0 %4795, %v6844_v56   ;;  %8868 = vst [vmem:[#allocation15_spill] sm:$0xff] %v6866_v45  ;;  %v6868_v56 = vpop.permute.xlu1 %2703  ;;  %v6874_v58 = vcombine.high %v8872_v44, %v8871_v18  ;;  %v6884_v45 = vcombine.high %v8877_v63, %v8876_v31  ;;  %v6894_v18 = vcombine.high %v6455_v3, %v6426_v10  ;;  %v8885_v10 = vld [vmem:[#allocation19_spill] sm:$0xff] }
 0x206   :  { %8869 = vst [vmem:[#allocation54_spill] sm:$0xff] %v6868_v56  ;;  %v6904_v31 = vcombine.high %v6458_v16, %v6429_v23  ;;  %v6914_v3 = vcombine.high %v6470_v8, %v6442_v59  ;;  %v8888_v23 = vld [vmem:[#allocation71_spill] sm:$0xff]  ;;  %v8889_v16 = vld [vmem:[#allocation97_spill] sm:$0xff]  ;;  %v6934_v8 = vcombine.high %v6589_v51, %v6573_v57  ;;  %v8900_v57 = vld [vmem:[#allocation20_spill] sm:$0xff]  ;;  %v6954_v51 = vcombine.high %v6599_v61, %v6579_v20 }
 0x207   :  { %8873 = vst [vmem:[#allocation87_spill] sm:$0xff] %v6874_v58  ;;  %8878 = vst [vmem:[#allocation17_spill] sm:$0xff] %v6884_v45  ;;  %v8894_v59 = vld [vmem:[#allocation73_spill] sm:$0xff]  ;;  %v8907_v20 = vld [vmem:[#allocation86_spill] sm:$0xff]  ;;  %v6974_v61 = vcombine.high %v6690_v9, %v6672_v43  ;;  %v6994_v9 = vcombine.high %v6696_v35, %v6678_v32 }
 0x208   :  { %3229 = vperm.xlu1 %4797, %v8864_v33   ;;  %v6876_v24 = vpop.permute.xlu0 %2736  ;;  %v8875_v33 = vld [vmem:[#allocation26_spill] sm:$0xff]  ;;  %8884 = vst [vmem:[#allocation33_spill] sm:$0xff] %v6904_v31  ;;  %8886 = vst [vmem:[#allocation90_spill] sm:$0xff] %v6914_v3  ;;  %v8914_v43 = vld [vmem:[#allocation28_spill] sm:$0xff] }
 0x209   :  { %3850 = vperm.xlu0 %4795, %v6854_v28   ;;  %8874 = vst [vmem:[#allocation5_spill] sm:$0xff] %v6876_v24  ;;  %v6878_v28 = vpop.permute.xlu1 %2709  ;;  %8882 = vst [vmem:[#allocation26_spill] sm:$0xff] %v6894_v18  ;;  %v8922_v32 = vld [vmem:[#allocation35_spill] sm:$0xff] }
 0x20a   :  { %8895 = vst [vmem:[#allocation97_spill] sm:$0xff] %v6934_v8  ;;  %8901 = vst [vmem:[#allocation20_spill] sm:$0xff] %v6954_v51 }
 0x20b   :  { %8908 = vst [vmem:[#allocation86_spill] sm:$0xff] %v6974_v61  ;;  %8915 = vst [vmem:[#allocation28_spill] sm:$0xff] %v6994_v9 }
 0x20c   :  { %3235 = vperm.xlu1 %4797, %v8870_v62   ;;  %v6886_v56 = vpop.permute.xlu0 %2742  ;;  %v8881_v62 = vld [vmem:[#allocation61_spill] sm:$0xff] }
 0x20d   :  { %3856 = vperm.xlu0 %4795, %v6864_v19   ;;  %8879 = vst [vmem:[#allocation24_spill] sm:$0xff] %v6886_v56  ;;  %v6888_v19 = vpop.permute.xlu1 %2715 }
 0x20e   :  { %8880 = vst [vmem:[#allocation89_spill] sm:$0xff] %v6888_v19  ;;  %v9008_v19 = vld [vmem:[#allocation23_spill] sm:$0xff] }
 0x210   :  { %3241 = vperm.xlu1 %4797, %v8875_v33   ;;  %v6896_v44 = vpop.permute.xlu0 %2748  ;;  %v8883_v33 = vld [vmem:[#allocation65_spill] sm:$0xff] }
 0x211   :  { %3862 = vperm.xlu0 %4795, %v6874_v58   ;;  %v6898_v58 = vpop.permute.xlu1 %2721 }
 0x214   :  { %3247 = vperm.xlu1 %4797, %v8881_v62   ;;  %v6906_v63 = vpop.permute.xlu0 %2754 }
 0x215   :  { %3868 = vperm.xlu0 %4795, %v6884_v45  }
 0x216   :  { %v6908_v45 = vpop.permute.xlu1 %2727 }
 0x218   :  { %3253 = vperm.xlu1 %4797, %v8883_v33   ;;  %v8890_v33 = vld [vmem:[#allocation99_spill] sm:$0xff] }
 0x219   :  { %3874 = vperm.xlu0 %4795, %v6894_v18   ;;  %v6916_v62 = vpop.permute.xlu0 %2760  ;;  %v6924_v56 = vcombine.high %v8890_v33, %v8889_v16  ;;  %v6944_v16 = vcombine.high %v6592_v6, %v6576_v38  ;;  %v8903_v38 = vld [vmem:[#allocation29_spill] sm:$0xff]  ;;  %v6964_v6 = vcombine.high %v6602_v11, %v6582_v41  ;;  %v8910_v41 = vld [vmem:[#allocation91_spill] sm:$0xff]  ;;  %v6984_v11 = vcombine.high %v6693_v13, %v6675_v29 }
 0x21a   :  { %8887 = vst [vmem:[#allocation61_spill] sm:$0xff] %v6916_v62  ;;  %v6918_v18 = vpop.permute.xlu1 %2733  ;;  %v8918_v29 = vld [vmem:[#allocation25_spill] sm:$0xff]  ;;  %v7004_v13 = vcombine.high %v6700_v34, %v6681_v15  ;;  %v8992_v62 = vld [vmem:[#allocation88_spill] sm:$0xff] }
 0x21b   :  { %8891 = vst [vmem:[#allocation65_spill] sm:$0xff] %v6924_v56  ;;  %8898 = vst [vmem:[#allocation73_spill] sm:$0xff] %v6944_v16 }
 0x21c   :  { %3259 = vperm.xlu1 %4797, %v8885_v10   ;;  %8904 = vst [vmem:[#allocation29_spill] sm:$0xff] %v6964_v6  ;;  %8911 = vst [vmem:[#allocation91_spill] sm:$0xff] %v6984_v11 }
 0x21d   :  { %3880 = vperm.xlu0 %4795, %v6904_v31   ;;  %v6926_v24 = vpop.permute.xlu0 %2766  ;;  %8919 = vst [vmem:[#allocation25_spill] sm:$0xff] %v7004_v13 }
 0x21e   :  { %8892 = vst [vmem:[#allocation19_spill] sm:$0xff] %v6926_v24  ;;  %v6928_v31 = vpop.permute.xlu1 %2739  ;;  %v8968_v24 = vld [vmem:[#allocation10_spill] sm:$0xff] }
 0x21f   :  { %8893 = vst [vmem:[#allocation71_spill] sm:$0xff] %v6928_v31  ;;  %v9000_v31 = vld [vmem:[#allocation11_spill] sm:$0xff] }
 0x220   :  { %3265 = vperm.xlu1 %4797, %v8888_v23   ;;  %v8897_v23 = vld [vmem:[#allocation79_spill] sm:$0xff] }
 0x221   :  { %3886 = vperm.xlu0 %4795, %v6914_v3  }
 0x223   :  { %v6936_v10 = vpop.permute.xlu0 %2772 }
 0x224   :  { %3271 = vperm.xlu1 %4797, %v8894_v59   ;;  %8896 = vst [vmem:[#allocation99_spill] sm:$0xff] %v6936_v10  ;;  %v6938_v3 = vpop.permute.xlu1 %2745  ;;  %v9004_v10 = vld [vmem:[#allocation34_spill] sm:$0xff] }
 0x225   :  { %3892 = vperm.xlu0 %4795, %v6924_v56  }
 0x227   :  { %v6946_v33 = vpop.permute.xlu0 %2778 }
 0x228   :  { %3277 = vperm.xlu1 %4797, %v8897_v23   ;;  %8899 = vst [vmem:[#allocation79_spill] sm:$0xff] %v6946_v33  ;;  %v8984_v33 = vld [vmem:[#allocation9_spill] sm:$0xff] }
 0x229   :  { %3898 = vperm.xlu0 %4795, %v6934_v8   ;;  %v6948_v56 = vpop.permute.xlu1 %2751 }
 0x22c   :  { %3283 = vperm.xlu1 %4797, %v8900_v57   ;;  %v6956_v59 = vpop.permute.xlu0 %2784 }
 0x22d   :  { %3904 = vperm.xlu0 %4795, %v6944_v16   ;;  %8902 = vst [vmem:[#allocation118_spill] sm:$0xff] %v6956_v59  ;;  %v6958_v8 = vpop.permute.xlu1 %2757  ;;  %v8960_v59 = vld [vmem:[#allocation62_spill] sm:$0xff] }
 0x230   :  { %3289 = vperm.xlu1 %4797, %v8903_v38   ;;  %v6966_v23 = vpop.permute.xlu0 %2790 }
 0x231   :  { %3910 = vperm.xlu0 %4795, %v6954_v51   ;;  %8905 = vst [vmem:[#allocation119_spill] sm:$0xff] %v6966_v23  ;;  %v6968_v16 = vpop.permute.xlu1 %2763  ;;  %v8931_v23 = vld [vmem:[#allocation22_spill] sm:$0xff] }
 0x232   :  { %8906 = vst [vmem:[#allocation120_spill] sm:$0xff] %v6968_v16  ;;  %v8996_v16 = vld [vmem:[#allocation94_spill] sm:$0xff] }
 0x234   :  { %3295 = vperm.xlu1 %4797, %v8907_v20  }
 0x235   :  { %3916 = vperm.xlu0 %4795, %v6964_v6  }
 0x236   :  { %v6978_v51 = vpop.permute.xlu1 %2769 }
 0x238   :  { %v6976_v57 = vpop.permute.xlu0 %2796  ;;  %3301 = vperm.xlu1 %4797, %v8910_v41  }
 0x239   :  { %8909 = vst [vmem:[#allocation121_spill] sm:$0xff] %v6976_v57  ;;  %3922 = vperm.xlu0 %4795, %v6974_v61   ;;  %v8972_v57 = vld [vmem:[#allocation72_spill] sm:$0xff] }
 0x23a   :  { %v6988_v6 = vpop.permute.xlu1 %2775 }
 0x23b   :  { %8913 = vst [vmem:[#allocation123_spill] sm:$0xff] %v6988_v6  ;;  %v9012_v6 = vld [vmem:[#allocation98_spill] sm:$0xff] }
 0x23c   :  { %v6986_v38 = vpop.permute.xlu0 %2802  ;;  %3307 = vperm.xlu1 %4797, %v8914_v43  }
 0x23d   :  { %8912 = vst [vmem:[#allocation122_spill] sm:$0xff] %v6986_v38  ;;  %3928 = vperm.xlu0 %4795, %v6984_v11  }
 0x23e   :  { %v6998_v61 = vpop.permute.xlu1 %2781 }
 0x23f   :  { %8917 = vst [vmem:[#allocation125_spill] sm:$0xff] %v6998_v61  ;;  %v8988_v61 = vld [vmem:[#allocation85_spill] sm:$0xff] }
 0x240   :  { %v6996_v20 = vpop.permute.xlu0 %2808  ;;  %3313 = vperm.xlu1 %4797, %v8918_v29   ;;  %v8927_v29 = vld [vmem:[#allocation100_spill] sm:$0xff] }
 0x241   :  { %8916 = vst [vmem:[#allocation124_spill] sm:$0xff] %v6996_v20  ;;  %3934 = vperm.xlu0 %4795, %v6994_v9   ;;  %v8925_v20 = vmov 1   ;;  %v8926_v9 = vld [vmem:[#allocation38_spill] sm:$0xff] }
 0x242   :  { %v7008_v11 = vpop.permute.xlu1 %2787 }
 0x243   :  { %8921 = vst [vmem:[#allocation127_spill] sm:$0xff] %v7008_v11  ;;  %v8964_v11 = vld [vmem:[#allocation68_spill] sm:$0xff] }
 0x244   :  { %v7006_v41 = vpop.permute.xlu0 %2814  ;;  %3319 = vperm.xlu1 %4797, %v8922_v32  }
 0x245   :  { %8920 = vst [vmem:[#allocation126_spill] sm:$0xff] %v7006_v41  ;;  %3940 = vperm.xlu0 %4795, %v7004_v13   ;;  %v8930_v41 = vld [vmem:[#allocation40_spill] sm:$0xff] }
 0x246   :  { %v7014_v43 = vpop.permute.xlu1 %2793 }
 0x247   :  { %8924 = vst [vmem:[#allocation128_spill] sm:$0xff] %v7014_v43  ;;  %v8980_v43 = vld [vmem:[#allocation82_spill] sm:$0xff] }
 0x248   :  { %v7012_v35 = vpop.permute.xlu0 %3751  ;;  %3325 = vperm.xlu1 %4797, %v8927_v29   ;;  %v8937_v29 = vld [vmem:[#allocation46_spill] sm:$0xff] }
 0x249   :  { %8923 = vst [vmem:[#allocation35_spill] sm:$0xff] %v7012_v35  ;;  %4799 = vset.pattern.permute.xlu0 %v8925_v20  ;;  %v8934_v35 = vld [vmem:[#allocation7_spill] sm:$0xff] }
 0x24a   :  { %3163 = vperm.xlu0 %4799, %v8926_v9   ;;  %v7021_v34 = vpop.permute.xlu1 %2799 }
 0x24b   :  { %8929 = vst [vmem:[#allocation100_spill] sm:$0xff] %v7021_v34  ;;  %v8976_v34 = vld [vmem:[#allocation74_spill] sm:$0xff] }
 0x24c   :  { %v7019_v15 = vpop.permute.xlu0 %3760  ;;  %3331 = vperm.xlu1 %4797, %v8931_v23   ;;  %v8940_v23 = vld [vmem:[#allocation49_spill] sm:$0xff] }
 0x24d   :  { %8928 = vst [vmem:[#allocation38_spill] sm:$0xff] %v7019_v15 }
 0x24e   :  { %3172 = vperm.xlu0 %4799, %v8930_v41   ;;  %v7027_v32 = vpop.permute.xlu1 %2805 }
 0x24f   :  { %8933 = vst [vmem:[#allocation22_spill] sm:$0xff] %v7027_v32  ;;  %v8956_v32 = vld [vmem:[#allocation60_spill] sm:$0xff] }
 0x250   :  { %v7025_v13 = vpop.permute.xlu0 %3766  ;;  %3337 = vperm.xlu1 %4797, %v6554_v53   ;;  %v8943_v53 = vld [vmem:[#allocation51_spill] sm:$0xff] }
 0x251   :  { %8932 = vst [vmem:[#allocation40_spill] sm:$0xff] %v7025_v13 }
 0x252   :  { %3178 = vperm.xlu0 %4799, %v8934_v35   ;;  %v7033_v9 = vpop.permute.xlu1 %2811 }
 0x253   :  { %8936 = vst [vmem:[#allocation129_spill] sm:$0xff] %v7033_v9  ;;  %v8945_v9 = vld [vmem:[#allocation42_spill] sm:$0xff] }
 0x254   :  { %v7031_v38 = vpop.permute.xlu0 %3772  ;;  %3343 = vperm.xlu1 %4797, %v6567_v54  }
 0x255   :  { %8935 = vst [vmem:[#allocation7_spill] sm:$0xff] %v7031_v38  ;;  %v8944_v38 = vmov 0  }
 0x256   :  { %3184 = vperm.xlu0 %4799, %v8937_v29  }
 0x257   :  { %v7039_v41 = vpop.permute.xlu1 %3160 }
 0x258   :  { %v7037_v15 = vpop.permute.xlu0 %3778  ;;  %8939 = vst [vmem:[#allocation130_spill] sm:$0xff] %v7039_v41  ;;  %3349 = vperm.xlu1 %4797, %v6615_v55   ;;  %v8949_v41 = vld [vmem:[#allocation43_spill] sm:$0xff] }
 0x259   :  { %8938 = vst [vmem:[#allocation46_spill] sm:$0xff] %v7037_v15  ;;  %v8948_v15 = vld [vmem:[#allocation57_spill] sm:$0xff] }
 0x25a   :  { %3190 = vperm.xlu0 %4799, %v8940_v23  }
 0x25b   :  { %v7045_v35 = vpop.permute.xlu1 %3166 }
 0x25c   :  { %v7043_v13 = vpop.permute.xlu0 %3784  ;;  %8942 = vst [vmem:[#allocation131_spill] sm:$0xff] %v7045_v35  ;;  %4798 = vset.pattern.permute.xlu1 %v8944_v38  ;;  %v8953_v35 = vld [vmem:[#allocation44_spill] sm:$0xff] }
 0x25d   :  { %8941 = vst [vmem:[#allocation49_spill] sm:$0xff] %v7043_v13  ;;  %3754 = vperm.xlu1 %4798, %v8945_v9   ;;  %v8952_v13 = vld [vmem:[#allocation8_spill] sm:$0xff] }
 0x25e   :  { %3196 = vperm.xlu0 %4799, %v8943_v53  }
 0x25f   :  { %v7052_v54 = vpop.permute.xlu1 %3169 }
 0x260   :  { %v7050_v29 = vpop.permute.xlu0 %3790  ;;  %8947 = vst [vmem:[#allocation42_spill] sm:$0xff] %v7052_v54 }
 0x261   :  { %8946 = vst [vmem:[#allocation51_spill] sm:$0xff] %v7050_v29  ;;  %3757 = vperm.xlu1 %4798, %v8949_v41   ;;  %v8957_v29 = vld [vmem:[#allocation47_spill] sm:$0xff] }
 0x262   :  { %3202 = vperm.xlu0 %4799, %v8948_v15  }
 0x263   :  { %v7058_v55 = vpop.permute.xlu1 %3175 }
 0x264   :  { %v7056_v23 = vpop.permute.xlu0 %3796  ;;  %8951 = vst [vmem:[#allocation43_spill] sm:$0xff] %v7058_v55 }
 0x265   :  { %8950 = vst [vmem:[#allocation57_spill] sm:$0xff] %v7056_v23  ;;  %3763 = vperm.xlu1 %4798, %v8953_v35   ;;  %v8961_v23 = vld [vmem:[#allocation55_spill] sm:$0xff] }
 0x266   :  { %3208 = vperm.xlu0 %4799, %v8952_v13  }
 0x267   :  { %v7064_v38 = vpop.permute.xlu1 %3181 }
 0x268   :  { %v7062_v53 = vpop.permute.xlu0 %3802  ;;  %8955 = vst [vmem:[#allocation44_spill] sm:$0xff] %v7064_v38 }
 0x269   :  { %8954 = vst [vmem:[#allocation8_spill] sm:$0xff] %v7062_v53  ;;  %3769 = vperm.xlu1 %4798, %v8957_v29   ;;  %v8965_v53 = vld [vmem:[#allocation56_spill] sm:$0xff] }
 0x26a   :  { %3214 = vperm.xlu0 %4799, %v8956_v32  }
 0x26b   :  { %v7070_v15 = vpop.permute.xlu1 %3187 }
 0x26c   :  { %v7068_v54 = vpop.permute.xlu0 %3808  ;;  %8959 = vst [vmem:[#allocation47_spill] sm:$0xff] %v7070_v15 }
 0x26d   :  { %8958 = vst [vmem:[#allocation60_spill] sm:$0xff] %v7068_v54  ;;  %3775 = vperm.xlu1 %4798, %v8961_v23   ;;  %v8969_v54 = vld [vmem:[#allocation58_spill] sm:$0xff] }
 0x26e   :  { %3220 = vperm.xlu0 %4799, %v8960_v59  }
 0x26f   :  { %v7076_v13 = vpop.permute.xlu1 %3193 }
 0x270   :  { %v7074_v55 = vpop.permute.xlu0 %3814  ;;  %8963 = vst [vmem:[#allocation55_spill] sm:$0xff] %v7076_v13 }
 0x271   :  { %8962 = vst [vmem:[#allocation62_spill] sm:$0xff] %v7074_v55  ;;  %3781 = vperm.xlu1 %4798, %v8965_v53   ;;  %v8973_v55 = vld [vmem:[#allocation59_spill] sm:$0xff] }
 0x272   :  { %3226 = vperm.xlu0 %4799, %v8964_v11  }
 0x273   :  { %v7082_v32 = vpop.permute.xlu1 %3199 }
 0x274   :  { %v7080_v38 = vpop.permute.xlu0 %3820  ;;  %8967 = vst [vmem:[#allocation56_spill] sm:$0xff] %v7082_v32 }
 0x275   :  { %8966 = vst [vmem:[#allocation68_spill] sm:$0xff] %v7080_v38  ;;  %3787 = vperm.xlu1 %4798, %v8969_v54   ;;  %v8977_v38 = vld [vmem:[#allocation66_spill] sm:$0xff] }
 0x276   :  { %3232 = vperm.xlu0 %4799, %v8968_v24  }
 0x277   :  { %v7088_v59 = vpop.permute.xlu1 %3205 }
 0x278   :  { %v7086_v15 = vpop.permute.xlu0 %3826  ;;  %8971 = vst [vmem:[#allocation58_spill] sm:$0xff] %v7088_v59 }
 0x279   :  { %8970 = vst [vmem:[#allocation10_spill] sm:$0xff] %v7086_v15  ;;  %3793 = vperm.xlu1 %4798, %v8973_v55   ;;  %v8981_v15 = vld [vmem:[#allocation67_spill] sm:$0xff] }
 0x27a   :  { %3238 = vperm.xlu0 %4799, %v8972_v57  }
 0x27b   :  { %v7094_v11 = vpop.permute.xlu1 %3211 }
 0x27c   :  { %v7092_v13 = vpop.permute.xlu0 %3832  ;;  %8975 = vst [vmem:[#allocation59_spill] sm:$0xff] %v7094_v11 }
 0x27d   :  { %8974 = vst [vmem:[#allocation72_spill] sm:$0xff] %v7092_v13  ;;  %3799 = vperm.xlu1 %4798, %v8977_v38   ;;  %v8985_v13 = vld [vmem:[#allocation69_spill] sm:$0xff] }
 0x27e   :  { %3244 = vperm.xlu0 %4799, %v8976_v34  }
 0x27f   :  { %v7100_v24 = vpop.permute.xlu1 %3217 }
 0x280   :  { %v7098_v32 = vpop.permute.xlu0 %3838  ;;  %8979 = vst [vmem:[#allocation66_spill] sm:$0xff] %v7100_v24 }
 0x281   :  { %8978 = vst [vmem:[#allocation74_spill] sm:$0xff] %v7098_v32  ;;  %3805 = vperm.xlu1 %4798, %v8981_v15   ;;  %v8989_v32 = vld [vmem:[#allocation70_spill] sm:$0xff] }
 0x282   :  { %3250 = vperm.xlu0 %4799, %v8980_v43  }
 0x283   :  { %v7106_v57 = vpop.permute.xlu1 %3223 }
 0x284   :  { %v7104_v59 = vpop.permute.xlu0 %3844  ;;  %8983 = vst [vmem:[#allocation67_spill] sm:$0xff] %v7106_v57 }
 0x285   :  { %8982 = vst [vmem:[#allocation82_spill] sm:$0xff] %v7104_v59  ;;  %3811 = vperm.xlu1 %4798, %v8985_v13   ;;  %v8993_v59 = vld [vmem:[#allocation80_spill] sm:$0xff] }
 0x286   :  { %3256 = vperm.xlu0 %4799, %v8984_v33  }
 0x287   :  { %v7112_v34 = vpop.permute.xlu1 %3229 }
 0x288   :  { %v7110_v11 = vpop.permute.xlu0 %3850  ;;  %8987 = vst [vmem:[#allocation69_spill] sm:$0xff] %v7112_v34 }
 0x289   :  { %8986 = vst [vmem:[#allocation9_spill] sm:$0xff] %v7110_v11  ;;  %3817 = vperm.xlu1 %4798, %v8989_v32   ;;  %v8997_v11 = vld [vmem:[#allocation81_spill] sm:$0xff] }
 0x28a   :  { %3262 = vperm.xlu0 %4799, %v8988_v61  }
 0x28b   :  { %v7118_v43 = vpop.permute.xlu1 %3235 }
 0x28c   :  { %v7116_v24 = vpop.permute.xlu0 %3856  ;;  %8991 = vst [vmem:[#allocation70_spill] sm:$0xff] %v7118_v43 }
 0x28d   :  { %8990 = vst [vmem:[#allocation85_spill] sm:$0xff] %v7116_v24  ;;  %3823 = vperm.xlu1 %4798, %v8993_v59   ;;  %v9001_v24 = vld [vmem:[#allocation83_spill] sm:$0xff] }
 0x28e   :  { %3268 = vperm.xlu0 %4799, %v8992_v62  }
 0x28f   :  { %v7124_v33 = vpop.permute.xlu1 %3241 }
 0x290   :  { %v7122_v57 = vpop.permute.xlu0 %3862  ;;  %8995 = vst [vmem:[#allocation80_spill] sm:$0xff] %v7124_v33 }
 0x291   :  { %8994 = vst [vmem:[#allocation88_spill] sm:$0xff] %v7122_v57  ;;  %3829 = vperm.xlu1 %4798, %v8997_v11   ;;  %v9005_v57 = vld [vmem:[#allocation84_spill] sm:$0xff] }
 0x292   :  { %3274 = vperm.xlu0 %4799, %v8996_v16  }
 0x293   :  { %v7130_v61 = vpop.permute.xlu1 %3247 }
 0x294   :  { %v7128_v34 = vpop.permute.xlu0 %3868  ;;  %8999 = vst [vmem:[#allocation81_spill] sm:$0xff] %v7130_v61 }
 0x295   :  { %8998 = vst [vmem:[#allocation94_spill] sm:$0xff] %v7128_v34  ;;  %3835 = vperm.xlu1 %4798, %v9001_v24   ;;  %v9009_v34 = vld [vmem:[#allocation92_spill] sm:$0xff] }
 0x296   :  { %3280 = vperm.xlu0 %4799, %v9000_v31  }
 0x297   :  { %v7136_v62 = vpop.permute.xlu1 %3253 }
 0x298   :  { %v7134_v43 = vpop.permute.xlu0 %3874  ;;  %9003 = vst [vmem:[#allocation83_spill] sm:$0xff] %v7136_v62 }
 0x299   :  { %9002 = vst [vmem:[#allocation11_spill] sm:$0xff] %v7134_v43  ;;  %3841 = vperm.xlu1 %4798, %v9005_v57   ;;  %v9013_v43 = vld [vmem:[#allocation93_spill] sm:$0xff]  ;;  %v9016_v57 = vld [vmem:[#allocation31_spill] sm:$0xff] }
 0x29a   :  { %3286 = vperm.xlu0 %4799, %v9004_v10  }
 0x29b   :  { %v7142_v16 = vpop.permute.xlu1 %3259 }
 0x29c   :  { %v7140_v33 = vpop.permute.xlu0 %3880  ;;  %9007 = vst [vmem:[#allocation132_spill] sm:$0xff] %v7142_v16 }
 0x29d   :  { %9006 = vst [vmem:[#allocation34_spill] sm:$0xff] %v7140_v33  ;;  %3847 = vperm.xlu1 %4798, %v9009_v34   ;;  %v9017_v33 = vld [vmem:[#allocation95_spill] sm:$0xff] }
 0x29e   :  { %3292 = vperm.xlu0 %4799, %v9008_v19  }
 0x29f   :  { %v7148_v31 = vpop.permute.xlu1 %3265 }
 0x2a0   :  { %v7146_v61 = vpop.permute.xlu0 %3886  ;;  %9011 = vst [vmem:[#allocation92_spill] sm:$0xff] %v7148_v31 }
 0x2a1   :  { %9010 = vst [vmem:[#allocation23_spill] sm:$0xff] %v7146_v61  ;;  %3853 = vperm.xlu1 %4798, %v9013_v43   ;;  %v9020_v61 = vld [vmem:[#allocation96_spill] sm:$0xff]  ;;  %v9023_v43 = vld [vmem:[#allocation105_spill] sm:$0xff] }
 0x2a2   :  { %3298 = vperm.xlu0 %4799, %v9012_v6  }
 0x2a3   :  { %v7154_v10 = vpop.permute.xlu1 %3271 }
 0x2a4   :  { %v7152_v62 = vpop.permute.xlu0 %3892  ;;  %9015 = vst [vmem:[#allocation133_spill] sm:$0xff] %v7154_v10 }
 0x2a5   :  { %9014 = vst [vmem:[#allocation98_spill] sm:$0xff] %v7152_v62  ;;  %3859 = vperm.xlu1 %4798, %v9017_v33   ;;  %v9024_v62 = vld [vmem:[#allocation101_spill] sm:$0xff] }
 0x2a6   :  { %3304 = vperm.xlu0 %4799, %v9016_v57  }
 0x2a7   :  { %v7160_v19 = vpop.permute.xlu1 %3277 }
 0x2a8   :  { %v7158_v16 = vpop.permute.xlu0 %3898  ;;  %9019 = vst [vmem:[#allocation95_spill] sm:$0xff] %v7160_v19 }
 0x2a9   :  { %9018 = vst [vmem:[#allocation31_spill] sm:$0xff] %v7158_v16  ;;  %3865 = vperm.xlu1 %4798, %v9020_v61   ;;  %v9027_v16 = vld [vmem:[#allocation102_spill] sm:$0xff]  ;;  %v9030_v61 = vld [vmem:[#allocation112_spill] sm:$0xff] }
 0x2aa   :  { %3310 = vperm.xlu0 %4799, %v6547_v50  }
 0x2ab   :  { %v7166_v6 = vpop.permute.xlu1 %3283 }
 0x2ac   :  { %v7164_v31 = vpop.permute.xlu0 %3904  ;;  %9022 = vst [vmem:[#allocation135_spill] sm:$0xff] %v7166_v6 }
 0x2ad   :  { %9021 = vst [vmem:[#allocation134_spill] sm:$0xff] %v7164_v31  ;;  %3871 = vperm.xlu1 %4798, %v9024_v62   ;;  %v9031_v31 = vld [vmem:[#allocation103_spill] sm:$0xff] }
 0x2ae   :  { %3316 = vperm.xlu0 %4799, %v9023_v43  }
 0x2af   :  { %v7172_v57 = vpop.permute.xlu1 %3289 }
 0x2b0   :  { %v7170_v10 = vpop.permute.xlu0 %3910  ;;  %9026 = vst [vmem:[#allocation101_spill] sm:$0xff] %v7172_v57 }
 0x2b1   :  { %9025 = vst [vmem:[#allocation105_spill] sm:$0xff] %v7170_v10  ;;  %3877 = vperm.xlu1 %4798, %v9027_v16   ;;  %v9034_v10 = vld [vmem:[#allocation104_spill] sm:$0xff] }
 0x2b2   :  { %3322 = vperm.xlu0 %4799, %v6627_v14  }
 0x2b3   :  { %v7178_v50 = vpop.permute.xlu1 %3295 }
 0x2b4   :  { %v7176_v19 = vpop.permute.xlu0 %3916  ;;  %9029 = vst [vmem:[#allocation136_spill] sm:$0xff] %v7178_v50 }
 0x2b5   :  { %9028 = vst [vmem:[#allocation102_spill] sm:$0xff] %v7176_v19  ;;  %3883 = vperm.xlu1 %4798, %v9031_v31   ;;  %v9037_v19 = vld [vmem:[#allocation106_spill] sm:$0xff] }
 0x2b6   :  { %3328 = vperm.xlu0 %4799, %v9030_v61  }
 0x2b7   :  { %v7184_v43 = vpop.permute.xlu1 %3301 }
 0x2b8   :  { %v7182_v6 = vpop.permute.xlu0 %3922  ;;  %9033 = vst [vmem:[#allocation103_spill] sm:$0xff] %v7184_v43 }
 0x2b9   :  { %9032 = vst [vmem:[#allocation112_spill] sm:$0xff] %v7182_v6  ;;  %3889 = vperm.xlu1 %4798, %v9034_v10   ;;  %v9040_v6 = vld [vmem:[#allocation107_spill] sm:$0xff] }
 0x2ba   :  { %3334 = vperm.xlu0 %4799, %v6653_v36  }
 0x2bb   :  { %v7190_v14 = vpop.permute.xlu1 %3307 }
 0x2bc   :  { %v7188_v57 = vpop.permute.xlu0 %3928  ;;  %9036 = vst [vmem:[#allocation138_spill] sm:$0xff] %v7190_v14 }
 0x2bd   :  { %9035 = vst [vmem:[#allocation137_spill] sm:$0xff] %v7188_v57  ;;  %3895 = vperm.xlu1 %4798, %v9037_v19   ;;  %v9043_v57 = vld [vmem:[#allocation108_spill] sm:$0xff] }
 0x2be   :  { %3340 = vperm.xlu0 %4799, %v6687_v42  }
 0x2bf   :  { %v7196_v61 = vpop.permute.xlu1 %3313 }
 0x2c0   :  { %v7194_v50 = vpop.permute.xlu0 %3934  ;;  %9039 = vst [vmem:[#allocation140_spill] sm:$0xff] %v7196_v61 }
 0x2c1   :  { %9038 = vst [vmem:[#allocation139_spill] sm:$0xff] %v7194_v50  ;;  %3901 = vperm.xlu1 %4798, %v9040_v6   ;;  %v9045_v50 = vld [vmem:[#allocation109_spill] sm:$0xff] }
 0x2c2   :  { %3346 = vperm.xlu0 %4799, %v6727_v17  }
 0x2c3   :  { %v7202_v36 = vpop.permute.xlu1 %3319 }
 0x2c4   :  { %v7200_v43 = vpop.permute.xlu0 %3940  ;;  %9042 = vst [vmem:[#allocation142_spill] sm:$0xff] %v7202_v36 }
 0x2c5   :  { %9041 = vst [vmem:[#allocation141_spill] sm:$0xff] %v7200_v43  ;;  %3907 = vperm.xlu1 %4798, %v9043_v57  }
 0x2c6   :  { %4266 = vperm.xlu0 %4799, %v8945_v9  }
 0x2c7   :  { %v7208_v42 = vpop.permute.xlu1 %3325 }
 0x2c8   :  { %9044 = vst [vmem:[#allocation143_spill] sm:$0xff] %v7208_v42 }
 0x2c9   :  { %v7206_v10 = vpop.permute.xlu0 %3163  ;;  %3913 = vperm.xlu1 %4798, %v9045_v50   ;;  %v9049_v50 = vlaneseq }
 0x2ca   :  { %4275 = vperm.xlu0 %4799, %v8953_v35  }
 0x2cb   :  { %v7214_v17 = vpop.permute.xlu1 %3331 }
 0x2cc   :  { %9046 = vst [vmem:[#allocation144_spill] sm:$0xff] %v7214_v17  ;;  %v9053_v17 = vld [vmem:[#allocation110_spill] sm:$0xff] }
 0x2cd   :  { %v7212_v19 = vpop.permute.xlu0 %3172  ;;  %3919 = vperm.xlu1 %4798, %v6705_v39  }
 0x2ce   :  { %4281 = vperm.xlu0 %4799, %v8957_v29   ;;  %v7231_v29 = vand.u32 127, %v9049_v50 }
 0x2cf   :  { %v7220_v9 = vpop.permute.xlu1 %3337 }
 0x2d0   :  { %9047 = vst [vmem:[#allocation145_spill] sm:$0xff] %v7220_v9  ;;  %v2864_v14 = vadd.s32 4294967240, %v7231_v29 }
 0x2d1   :  { %v7218_v43 = vpop.permute.xlu0 %3178  ;;  %3925 = vperm.xlu1 %4798, %v6709_v48   ;;  %v2829_v48 = vadd.s32 4294967280, %v7231_v29 }
 0x2d2   :  { %4287 = vperm.xlu0 %4799, %v8961_v23   ;;  %v2822_v23 = vadd.s32 4294967288, %v7231_v29 }
 0x2d3   :  { %v7226_v35 = vpop.permute.xlu1 %3343 }
 0x2d4   :  { %9048 = vst [vmem:[#allocation146_spill] sm:$0xff] %v7226_v35 }
 0x2d5   :  { %v7224_v57 = vpop.permute.xlu0 %3184  ;;  %3931 = vperm.xlu1 %4798, %v6713_v2  }
 0x2d6   :  { %4293 = vperm.xlu0 %4799, %v8965_v53   ;;  %v9052_v53 = vld [vmem:[#allocation18_spill] sm:$0xff] }
 0x2d7   :  { %v7235_v39 = vpop.permute.xlu1 %3349  ;;  %v7245_v2 = vsub.s32 %v2822_v23, %v9052_v53  ;;  %v7250_v9 = vsub.s32 %v2829_v48, %v9052_v53  ;;  %v2850_v23 = vadd.s32 4294967256, %v7231_v29 }
 0x2d8   :  { %9050 = vst [vmem:[#allocation147_spill] sm:$0xff] %v7235_v39  ;;  %v7256_v39 = vsub.s32 %v7231_v29, %v9052_v53 }
 0x2d9   :  { %v7233_v6 = vpop.permute.xlu0 %3190  ;;  %3937 = vperm.xlu1 %4798, %v6721_v1   ;;  %v2836_v1 = vadd.s32 4294967272, %v7231_v29  ;;  %v2826_v48 = vrot.slane %v6737_v27, %v7245_v2 }
 0x2da   :  { %4299 = vperm.xlu0 %4799, %v8969_v54   ;;  %v2843_v54 = vadd.s32 4294967264, %v7231_v29 }
 0x2dc   :  { %v7247_v50 = vpop.permute.xlu1 %3754  ;;  %v7271_v36 = vsub.s32 %v2843_v54, %v9052_v53 }
 0x2dd   :  { %v7241_v35 = vpop.permute.xlu0 %3196  ;;  %4800 = vset.pattern.permute.xlu1 %v8925_v20  ;;  %v2833_v20 = vrot.slane %v6748_v25, %v7250_v9  ;;  %v7285_v25 = vsub.s32 %v2850_v23, %v9052_v53  ;;  %v2878_v23 = vrot.slane %v6735_v21, %v7245_v2 }
 0x2de   :  { %9051 = vst [vmem:[#allocation148_spill] sm:$0xff] %v7241_v35  ;;  %4305 = vperm.xlu0 %4799, %v8973_v55   ;;  %4263 = vperm.xlu1 %4800, %v9053_v17   ;;  %v2857_v17 = vadd.s32 4294967248, %v7231_v29 }
 0x2e0   :  { %v7266_v42 = vpop.permute.xlu1 %3757 }
 0x2e1   :  { %v7260_v55 = vpop.permute.xlu0 %3202 }
 0x2e2   :  { %9054 = vst [vmem:[#allocation18_spill] sm:$0xff] %v7260_v55  ;;  %4311 = vperm.xlu0 %4799, %v8977_v38   ;;  %v9055_v55 = vld [vmem:[#allocation111_spill] sm:$0xff]  ;;  %v7277_v38 = vsub.s32 %v2836_v1, %v9052_v53  ;;  %4269 = vperm.xlu1 %4800, %v8949_v41   ;;  %v2847_v41 = vrot.slane %v6758_v26, %v7271_v36 }
 0x2e3   :  { %v2821_v61 = vrot.slane %v9055_v55, %v7256_v39  ;;  %v2874_v55 = vrot.slane %v6778_v30, %v7256_v39  ;;  %v2854_v26 = vrot.slane %v6683_v47, %v7285_v25 }
 0x2e4   :  { %v7290_v1 = vpop.permute.xlu1 %3763  ;;  %v2888_v47 = vrot.slane %v6746_v0, %v7277_v38 }
 0x2e5   :  { %v7280_v27 = vpop.permute.xlu0 %3208  ;;  %v2828_v54 = vsel %vm8602_vm0, %v2826_v48, %v2821_v61  ;;  %v2840_v61 = vrot.slane %v6663_v5, %v7277_v38  ;;  %v7308_v48 = vsub.s32 %v2864_v14, %v9052_v53  ;;  %v2879_v5 = vsel %vm8602_vm0, %v2878_v23, %v2874_v55 }
 0x2e6   :  { %9056 = vst [vmem:[#allocation110_spill] sm:$0xff] %v7280_v27  ;;  %4317 = vperm.xlu0 %4799, %v8981_v15   ;;  %v2835_v35 = vsel %vm8601_vm1, %v2833_v20, %v2828_v54  ;;  %v7296_v27 = vsub.s32 %v2857_v17, %v9052_v53  ;;  %v2883_v15 = vrot.slane %v6788_v60, %v7250_v9  ;;  %v3351_v17 = vadd.s32 4294967232, %v7231_v29 }
 0x2e7   :  { %4272 = vperm.xlu1 %4800, %v6657_v52   ;;  %v2842_v60 = vsel %vm2841_vm2, %v2840_v61, %v2835_v35  ;;  %v2913_v35 = vrot.slane %v6818_v12, %v7256_v39  ;;  %v3363_v54 = vadd.s32 4294967216, %v7231_v29  ;;  %v2917_v12 = vrot.slane %v6776_v46, %v7245_v2 }
 0x2e8   :  { %v7315_v21 = vpop.permute.xlu1 %3769  ;;  %v2849_v52 = vsel %vm8603_vm3, %v2847_v41, %v2842_v60  ;;  %v2861_v20 = vrot.slane %v6768_v22, %v7296_v27  ;;  %v2884_v14 = vsel %vm8601_vm1, %v2883_v15, %v2879_v5  ;;  %v2922_v22 = vrot.slane %v6828_v4, %v7250_v9 }
 0x2e9   :  { %v7305_v30 = vpop.permute.xlu0 %3214  ;;  %9057 = vst [vmem:[#allocation111_spill] sm:$0xff] %v7315_v21  ;;  %v2856_v0 = vsel %vm2855_vm4, %v2854_v26, %v2849_v52  ;;  %v2889_v41 = vsel %vm2841_vm2, %v2888_v47, %v2884_v14  ;;  %v3384_v15 = vadd.s32 4294967192, %v7231_v29  ;;  %v2868_v61 = vrot.slane %v6723_v7, %v7308_v48  ;;  %v9060_v26 = vld [vmem:[#allocation21_spill] sm:$0xff]  ;;  %v9061_v47 = vld [vmem:[#allocation115_spill] sm:$0xff] }
 0x2ea   :  { %4323 = vperm.xlu0 %4799, %v8985_v13   ;;  %v2893_v13 = vrot.slane %v6798_v40, %v7271_v36  ;;  %v3370_v40 = vadd.s32 4294967208, %v7231_v29  ;;  %v2863_v4 = vsel %vm2862_vm5, %v2861_v20, %v2856_v0  ;;  %v2898_v5 = vrot.slane %v9060_v26, %v7285_v25  ;;  %v9063_v20 = vld [vmem:[#allocation30_spill] sm:$0xff]  ;;  %v9075_v21 = vld [vmem:[#allocation27_spill] sm:$0xff] }
 0x2eb   :  { %4278 = vperm.xlu1 %4800, %v6669_v37   ;;  %v2918_v46 = vsel %vm8602_vm0, %v2917_v12, %v2913_v35  ;;  %v7353_v52 = vsub.s32 %v3351_v17, %v9052_v53  ;;  %v7356_v14 = vsub.s32 %v3363_v54, %v9052_v53  ;;  %v7371_v17 = vsel %vm2869_vm6, %v2868_v61, %v2863_v4  ;;  %v9064_v54 = vld [vmem:[#allocation32_spill] sm:$0xff] }
 0x2ec   :  { %v7341_v37 = vpop.permute.xlu1 %3775  ;;  %v2894_v23 = vsel %vm8603_vm3, %v2893_v13, %v2889_v41  ;;  %v2908_v13 = vrot.slane %v9063_v20, %v7308_v48  ;;  %v2923_v0 = vsel %vm8601_vm1, %v2922_v22, %v2918_v46  ;;  %v2932_v41 = vrot.slane %v6838_v49, %v7271_v36  ;;  %v9066_v4 = vld [vmem:[#allocation36_spill] sm:$0xff]  ;;  %v9068_v20 = vld [vmem:[#allocation117_spill] sm:$0xff] }
 0x2ed   :  { %v7330_v55 = vpop.permute.xlu0 %3220  ;;  %v7367_v35 = vsub.s32 %v3370_v40, %v9052_v53  ;;  %v2927_v12 = vrot.slane %v9064_v54, %v7277_v38  ;;  %v7377_v26 = vsub.s32 %v3384_v15, %v9052_v53  ;;  %v9065_v40 = vld [vmem:[#allocation78_spill] sm:$0xff]  ;;  %v7388_v61 = vadd.s32 4294967224, %v7231_v29 }
 0x2ee   :  { %9058 = vst [vmem:[#allocation149_spill] sm:$0xff] %v7330_v55  ;;  %4329 = vperm.xlu0 %4799, %v8989_v32   ;;  %v9059_v32 = vld [vmem:[#allocation2_spill] sm:$0xff]  ;;  %v2952_v46 = vrot.slane %v9065_v40, %v7256_v39 }
 0x2ef   :  { %v2903_v60 = vrot.slane %v9059_v32, %v7296_v27  ;;  %4284 = vperm.xlu1 %4800, %v9061_v47   ;;  %v2899_v32 = vsel %vm2855_vm4, %v2898_v5, %v2894_v23  ;;  %v2937_v47 = vrot.slane %v9066_v4, %v7285_v25  ;;  %v2928_v23 = vsel %vm2841_vm2, %v2927_v12, %v2923_v0  ;;  %v9067_v15 = vld [vmem:[#allocation54_spill] sm:$0xff] }
 0x2f0   :  { %v7379_v22 = vpop.permute.xlu1 %3781  ;;  %v2961_v5 = vrot.slane %v9067_v15, %v7250_v9  ;;  %v3000_v4 = vrot.slane %v6908_v45, %v7250_v9  ;;  %v3030_v0 = vrot.slane %v6938_v3, %v7256_v39  ;;  %v9073_v45 = vld [vmem:[#allocation13_spill] sm:$0xff]  ;;  %v9074_v3 = vld [vmem:[#allocation6_spill] sm:$0xff] }
 0x2f1   :  { %v7359_v7 = vpop.permute.xlu0 %3226  ;;  %v2904_v49 = vsel %vm2862_vm5, %v2903_v60, %v2899_v32  ;;  %v2991_v60 = vrot.slane %v6898_v58, %v7256_v39  ;;  %v9070_v32 = vld [vmem:[#allocation64_spill] sm:$0xff]  ;;  %v9071_v58 = vld [vmem:[#allocation37_spill] sm:$0xff] }
 0x2f2   :  { %9062 = vst [vmem:[#allocation2_spill] sm:$0xff] %v7359_v7  ;;  %4335 = vperm.xlu0 %4799, %v8993_v59   ;;  %v7385_v59 = vadd.s32 4294967176, %v7231_v29  ;;  %v2956_v40 = vrot.slane %v9070_v32, %v7245_v2  ;;  %v2933_v7 = vsel %vm8603_vm3, %v2932_v41, %v2928_v23  ;;  %v7409_v12 = vsel %vm2869_vm6, %v2908_v13, %v2904_v49 }
 0x2f3   :  { %4290 = vperm.xlu1 %4800, %v9068_v20   ;;  %v2947_v15 = vrot.slane %v9071_v58, %v7308_v48  ;;  %v9072_v20 = vld [vmem:[#allocation76_spill] sm:$0xff]  ;;  %v3039_v41 = vrot.slane %v6948_v56, %v7250_v9  ;;  %v2966_v32 = vrot.slane %v9073_v45, %v7277_v38  ;;  %v3034_v49 = vrot.slane %v6896_v44, %v7245_v2 }
 0x2f4   :  { %v7417_v23 = vpop.permute.xlu1 %3787  ;;  %v2957_v13 = vsel %vm8602_vm0, %v2956_v40, %v2952_v46  ;;  %v2938_v58 = vsel %vm2855_vm4, %v2937_v47, %v2933_v7  ;;  %v2971_v56 = vrot.slane %v6878_v28, %v7271_v36  ;;  %v3010_v44 = vrot.slane %v6918_v18, %v7271_v36  ;;  %v9077_v28 = vld [vmem:[#allocation15_spill] sm:$0xff] }
 0x2f5   :  { %v7398_v54 = vpop.permute.xlu0 %3232  ;;  %v3035_v7 = vsel %vm8602_vm0, %v3034_v49, %v3030_v0  ;;  %v3005_v47 = vrot.slane %v9077_v28, %v7277_v38  ;;  %v9078_v18 = vld [vmem:[#allocation75_spill] sm:$0xff]  ;;  %v9082_v28 = vld [vmem:[#allocation12_spill] sm:$0xff] }
 0x2f6   :  { %9069 = vst [vmem:[#allocation21_spill] sm:$0xff] %v7398_v54  ;;  %4341 = vperm.xlu0 %4799, %v8997_v11   ;;  %v2995_v54 = vrot.slane %v9072_v20, %v7245_v2  ;;  %v2976_v11 = vrot.slane %v9074_v3, %v7285_v25  ;;  %v2962_v20 = vsel %vm8601_vm1, %v2961_v5, %v2957_v13  ;;  %v9076_v3 = vld [vmem:[#allocation77_spill] sm:$0xff]  ;;  %v9079_v0 = vld [vmem:[#allocation123_spill] sm:$0xff] }
 0x2f7   :  { %4296 = vperm.xlu1 %4800, %v9075_v21   ;;  %v2942_v46 = vrot.slane %v9076_v3, %v7296_v27  ;;  %v3040_v21 = vsel %vm8601_vm1, %v3039_v41, %v3035_v7  ;;  %v3049_v5 = vrot.slane %v6958_v8, %v7271_v36  ;;  %v3078_v41 = vrot.slane %v9079_v0, %v7250_v9  ;;  %v9080_v8 = vld [vmem:[#allocation89_spill] sm:$0xff]  ;;  %v9081_v3 = vld [vmem:[#allocation99_spill] sm:$0xff]  ;;  %v9085_v0 = vld [vmem:[#allocation84_spill] sm:$0xff] }
 0x2f8   :  { %v2996_v55 = vsel %vm8602_vm0, %v2995_v54, %v2991_v60  ;;  %v3069_v60 = vrot.slane %v6978_v51, %v7256_v39  ;;  %v2986_v54 = vrot.slane %v9078_v18, %v7308_v48  ;;  %v2981_v49 = vrot.slane %v9080_v8, %v7296_v27  ;;  %v9084_v18 = vld [vmem:[#allocation71_spill] sm:$0xff] }
 0x2f9   :  { %v7432_v45 = vpop.permute.xlu0 %3238  ;;  %v3001_v40 = vsel %vm8601_vm1, %v3000_v4, %v2996_v55  ;;  %v7448_v55 = vpop.permute.xlu1 %3793  ;;  %v2967_v4 = vsel %vm2841_vm2, %v2966_v32, %v2962_v20  ;;  %v3073_v7 = vrot.slane %v9081_v3, %v7245_v2  ;;  %v9087_v3 = vld [vmem:[#allocation120_spill] sm:$0xff] }
 0x2fa   :  { %4347 = vperm.xlu0 %4799, %v9001_v24   ;;  %v3044_v24 = vrot.slane %v6906_v63, %v7277_v38  ;;  %v2972_v13 = vsel %vm8603_vm3, %v2971_v56, %v2967_v4  ;;  %v3006_v51 = vsel %vm2841_vm2, %v3005_v47, %v3001_v40  ;;  %v2943_v63 = vsel %vm2862_vm5, %v2942_v46, %v2938_v58  ;;  %v9086_v40 = vld [vmem:[#allocation5_spill] sm:$0xff] }
 0x2fb   :  { %4302 = vperm.xlu1 %4800, %v9082_v28   ;;  %v3011_v20 = vsel %vm8603_vm3, %v3010_v44, %v3006_v51  ;;  %v3020_v56 = vrot.slane %v9084_v18, %v7296_v27  ;;  %v3015_v47 = vrot.slane %v9086_v40, %v7285_v25  ;;  %v3059_v28 = vrot.slane %v9087_v3, %v7296_v27  ;;  %v9088_v51 = vld [vmem:[#allocation61_spill] sm:$0xff] }
 0x2fc   :  { %v3045_v4 = vsel %vm2841_vm2, %v3044_v24, %v3040_v21  ;;  %v3074_v58 = vsel %vm8602_vm0, %v3073_v7, %v3069_v60  ;;  %v2977_v44 = vsel %vm2855_vm4, %v2976_v11, %v2972_v13  ;;  %v3054_v21 = vrot.slane %v9088_v51, %v7285_v25  ;;  %v9089_v18 = vld [vmem:[#allocation125_spill] sm:$0xff]  ;;  %v9091_v60 = vld [vmem:[#allocation128_spill] sm:$0xff] }
 0x2fd   :  { %v7464_v32 = vpop.permute.xlu0 %3244  ;;  %v3050_v8 = vsel %vm8603_vm3, %v3049_v5, %v3045_v4  ;;  %v7478_v46 = vpop.permute.xlu1 %3799  ;;  %v3079_v24 = vsel %vm8601_vm1, %v3078_v41, %v3074_v58  ;;  %v2982_v40 = vsel %vm2862_vm5, %v2981_v49, %v2977_v44  ;;  %v3016_v5 = vsel %vm2855_vm4, %v3015_v47, %v3011_v20  ;;  %v9090_v4 = vld [vmem:[#allocation79_spill] sm:$0xff]  ;;  %v9094_v49 = vld [vmem:[#allocation100_spill] sm:$0xff] }
 0x2fe   :  { %9083 = vst [vmem:[#allocation115_spill] sm:$0xff] %v7464_v32  ;;  %4353 = vperm.xlu0 %4799, %v9085_v0   ;;  %v3088_v0 = vrot.slane %v9089_v18, %v7271_v36  ;;  %v3083_v3 = vrot.slane %v9090_v4, %v7277_v38  ;;  %v3108_v7 = vrot.slane %v9091_v60, %v7256_v39  ;;  %v9092_v32 = vld [vmem:[#allocation4_spill] sm:$0xff] }
 0x2ff   :  { %4308 = vperm.xlu1 %4800, %v9092_v32   ;;  %v2948_v13 = vsel %vm2869_vm6, %v2947_v15, %v2943_v63  ;;  %v3021_v41 = vsel %vm2862_vm5, %v3020_v56, %v3016_v5  ;;  %v3055_v58 = vsel %vm2855_vm4, %v3054_v21, %v3050_v8  ;;  %v3117_v44 = vrot.slane %v9094_v49, %v7250_v9  ;;  %v9095_v20 = vld [vmem:[#allocation24_spill] sm:$0xff]  ;;  %v9096_v32 = vld [vmem:[#allocation121_spill] sm:$0xff]  ;;  %v9097_v56 = vld [vmem:[#allocation19_spill] sm:$0xff] }
 0x300   :  { %v3025_v47 = vrot.slane %v9095_v20, %v7308_v48  ;;  %v3060_v51 = vsel %vm2862_vm5, %v3059_v28, %v3055_v58  ;;  %v3112_v18 = vrot.slane %v9096_v32, %v7245_v2  ;;  %v3084_v4 = vsel %vm2841_vm2, %v3083_v3, %v3079_v24  ;;  %v9099_v24 = vld [vmem:[#allocation118_spill] sm:$0xff] }
 0x301   :  { %v7493_v11 = vpop.permute.xlu0 %3250  ;;  %v7507_v15 = vpop.permute.xlu1 %3805  ;;  %v2987_v63 = vsel %vm2869_vm6, %v2986_v54, %v2982_v40  ;;  %v3064_v8 = vrot.slane %v9097_v56, %v7308_v48  ;;  %v3089_v21 = vsel %vm8603_vm3, %v3088_v0, %v3084_v4  ;;  %v3145_v28 = vsel %vm8605_vm7, %v7409_v12, %v7371_v17  ;;  %v9100_v54 = vld [vmem:[#allocation52_spill] sm:$0xff]  ;;  %v9102_v32 = vld [vmem:[#allocation22_spill] sm:$0xff]  ;;  %v9103_v12 = vld [vmem:[#allocation93_spill] sm:$0xff] }
 0x302   :  { %9093 = vst [vmem:[#allocation30_spill] sm:$0xff] %v7493_v11  ;;  %4359 = vperm.xlu0 %4799, %v9009_v34   ;;  %v9098_v34 = vld [vmem:[#allocation127_spill] sm:$0xff]  ;;  %v3026_v60 = vsel %vm2869_vm6, %v3025_v47, %v3021_v41  ;;  %v3093_v3 = vrot.slane %v9099_v24, %v7285_v25  ;;  %v3113_v58 = vsel %vm8602_vm0, %v3112_v18, %v3108_v7  ;;  %v9104_v47 = vld [vmem:[#allocation122_spill] sm:$0xff]  ;;  %v9108_v24 = vld [vmem:[#allocation53_spill] sm:$0xff] }
 0x303   :  { %v3098_v5 = vrot.slane %v9098_v34, %v7296_v27  ;;  %4314 = vperm.xlu1 %4800, %v9100_v54   ;;  %v3147_v0 = vsel %vm8604_vm8, %v2948_v13, %v3145_v28  ;;  %v3065_v49 = vsel %vm2869_vm6, %v3064_v8, %v3060_v51  ;;  %v3118_v20 = vsel %vm8601_vm1, %v3117_v44, %v3113_v58  ;;  %v9124_v58 = vld [vmem:[#allocation49_spill] sm:$0xff]  ;;  %v9137_v11 = vld [vmem:[#allocation3_spill] sm:$0xff] }
 0x304   :  { %v3127_v17 = vrot.slane %v9102_v32, %v7271_v36  ;;  %v3149_v41 = vsel %vm8600_vm9, %v2987_v63, %v3147_v0  ;;  %v3122_v7 = vrot.slane %v9104_v47, %v7277_v38  ;;  %v3094_v18 = vsel %vm2855_vm4, %v3093_v3, %v3089_v21  ;;  %v9107_v21 = vld [vmem:[#allocation119_spill] sm:$0xff]  ;;  %v9112_v0 = vld [vmem:[#allocation129_spill] sm:$0xff]  ;;  %v9140_v3 = vld [vmem:[#allocation56_spill] sm:$0xff] }
 0x305   :  { %v7523_v40 = vpop.permute.xlu0 %3256  ;;  %v7537_v4 = vsub.s32 %v7385_v59, %v9052_v53  ;;  %v7539_v13 = vpop.permute.xlu1 %3811  ;;  %v3151_v44 = vsel %vm8599_vm10, %v3026_v60, %v3149_v41  ;;  %v3099_v51 = vsel %vm2862_vm5, %v3098_v5, %v3094_v18  ;;  %v7545_v56 = vsub.s32 %v7388_v61, %v9052_v53  ;;  %v9110_v5 = vld [vmem:[#allocation124_spill] sm:$0xff]  ;;  %v9116_v41 = vld [vmem:[#allocation38_spill] sm:$0xff] }
 0x306   :  { %9101 = vst [vmem:[#allocation32_spill] sm:$0xff] %v7523_v40  ;;  %4365 = vperm.xlu0 %4799, %v9103_v12   ;;  %9105 = vst [vmem:[#allocation78_spill] sm:$0xff] %v7539_v13  ;;  %v3377_v63 = vadd.s32 4294967200, %v7231_v29  ;;  %v7549_v8 = vsel %vm8598_vm11, %v3065_v49, %v3151_v44  ;;  %v3103_v34 = vrot.slane %v9107_v21, %v7308_v48  ;;  %v3391_v28 = vadd.s32 4294967184, %v7231_v29  ;;  %v9114_v29 = vld [vmem:[#allocation35_spill] sm:$0xff]  ;;  %v9152_v40 = vld [vmem:[#allocation85_spill] sm:$0xff] }
 0x307   :  { %9106 = vst [vmem:[#allocation36_spill] sm:$0xff] %v7549_v8  ;;  %v3123_v59 = vsel %vm2841_vm2, %v3122_v7, %v3118_v20  ;;  %4320 = vperm.xlu1 %4800, %v9108_v24   ;;  %v3132_v61 = vrot.slane %v9110_v5, %v7285_v25  ;;  %v3137_v49 = vrot.slane %v9112_v0, %v7296_v27  ;;  %vm3389_vm11 = vcmask 917312   ;;  %v9146_v7 = vld [vmem:[#allocation66_spill] sm:$0xff]  ;;  %v9155_v0 = vld [vmem:[#allocation63_spill] sm:$0xff] }
 0x308   :  { %v3128_v54 = vsel %vm8603_vm3, %v3127_v17, %v3123_v59  ;;  %v7567_v20 = vsel %vm2869_vm6, %v3103_v34, %v3099_v51  ;;  %v9117_v17 = vld [vmem:[#allocation40_spill] sm:$0xff]  ;;  %v7578_v18 = vsub.s32 %v3377_v63, %v9052_v53  ;;  %v3360_v21 = vrot.slane %v7206_v10, %v7545_v56  ;;  %v9119_v59 = vld [vmem:[#allocation14_spill] sm:$0xff] }
 0x309   :  { %v7556_v60 = vpop.permute.xlu0 %3262  ;;  %9113 = vst [vmem:[#allocation117_spill] sm:$0xff] %v7567_v20  ;;  %v7571_v12 = vpop.permute.xlu1 %3817  ;;  %v7586_v34 = vsub.s32 %v3391_v28, %v9052_v53  ;;  %v9122_v63 = vld [vmem:[#allocation46_spill] sm:$0xff]  ;;  %v9125_v10 = vld [vmem:[#allocation96_spill] sm:$0xff]  ;;  %v9126_v53 = vld [vmem:[#allocation131_spill] sm:$0xff]  ;;  %vm3396_vm10 = vcmask 982912   ;;  %vm3403_vm9 = vcmask 1048512  }
 0x30a   :  { %9109 = vst [vmem:[#allocation54_spill] sm:$0xff] %v7556_v60  ;;  %4371 = vperm.xlu0 %4799, %v9017_v33   ;;  %9115 = vst [vmem:[#allocation64_spill] sm:$0xff] %v7571_v12  ;;  %v3133_v33 = vsel %vm2855_vm4, %v3132_v61, %v3128_v54  ;;  %v9123_v61 = vld [vmem:[#allocation130_spill] sm:$0xff]  ;;  %v3367_v28 = vrot.slane %v9126_v53, %v7356_v14  ;;  %v9132_v53 = vld [vmem:[#allocation44_spill] sm:$0xff]  ;;  %v3381_v8 = vrot.slane %v7212_v19, %v7578_v18 }
 0x30b   :  { %4326 = vperm.xlu1 %4800, %v9119_v59   ;;  %v7592_v5 = vsel %vm2862_vm5, %v3137_v49, %v3133_v33  ;;  %v3355_v54 = vrot.slane %v9123_v61, %v7353_v52  ;;  %v9127_v59 = vld [vmem:[#allocation51_spill] sm:$0xff]  ;;  %v9128_v49 = vld [vmem:[#allocation42_spill] sm:$0xff]  ;;  %v9164_v19 = vld [vmem:[#allocation132_spill] sm:$0xff] }
 0x30c   :  { %9121 = vst [vmem:[#allocation76_spill] sm:$0xff] %v7592_v5  ;;  %v3374_v33 = vrot.slane %v9128_v49, %v7367_v35  ;;  %v9130_v61 = vld [vmem:[#allocation43_spill] sm:$0xff]  ;;  %v9153_v44 = vld [vmem:[#allocation70_spill] sm:$0xff] }
 0x30d   :  { %v7589_v24 = vpop.permute.xlu0 %3268  ;;  %v7609_v32 = vpop.permute.xlu1 %3823  ;;  %v9134_v49 = vld [vmem:[#allocation47_spill] sm:$0xff]  ;;  %v3362_v51 = vsel %vm3361_vm12, %v3360_v21, %v3355_v54 }
 0x30e   :  { %9120 = vst [vmem:[#allocation37_spill] sm:$0xff] %v7589_v24  ;;  %4377 = vperm.xlu0 %4799, %v9125_v10   ;;  %v3412_v5 = vrot.slane %v9134_v49, %v7545_v56  ;;  %v9136_v12 = vld [vmem:[#allocation55_spill] sm:$0xff]  ;;  %v3369_v60 = vsel %vm3368_vm13, %v3367_v28, %v3362_v51  ;;  %v3408_v28 = vrot.slane %v7224_v57, %v7353_v52  ;;  %v9176_v51 = vld [vmem:[#allocation138_spill] sm:$0xff] }
 0x30f   :  { %4332 = vperm.xlu1 %4800, %v9137_v11   ;;  %v9144_v54 = vld [vmem:[#allocation59_spill] sm:$0xff]  ;;  %v9150_v11 = vld [vmem:[#allocation9_spill] sm:$0xff]  ;;  %v3949_v57 = vrot.slane %v7247_v50, %v7245_v2  ;;  %v3984_v10 = vrot.slane %v7341_v37, %v7256_v39  ;;  %v9180_v37 = vld [vmem:[#allocation142_spill] sm:$0xff] }
 0x310   :  { %v9170_v21 = vld [vmem:[#allocation39_spill] sm:$0xff] }
 0x311   :  { %v7627_v20 = vpop.permute.xlu0 %3274  ;;  %v7646_v47 = vpop.permute.xlu1 %3829  ;;  %v9171_v24 = vld [vmem:[#allocation135_spill] sm:$0xff] }
 0x312   :  { %9138 = vst [vmem:[#allocation13_spill] sm:$0xff] %v7627_v20  ;;  %4383 = vperm.xlu0 %4799, %v9024_v62   ;;  %9147 = vst [vmem:[#allocation6_spill] sm:$0xff] %v7646_v47  ;;  %v3376_v47 = vsel %vm3375_vm14, %v3374_v33, %v3369_v60  ;;  %v9166_v60 = vld [vmem:[#allocation92_spill] sm:$0xff]  ;;  %v3395_v33 = vrot.slane %v7218_v43, %v7586_v34  ;;  %v3954_v20 = vrot.slane %v7266_v42, %v7250_v9 }
 0x313   :  { %4338 = vperm.xlu1 %4800, %v9155_v0   ;;  %v3413_v0 = vsel %vm3361_vm12, %v3412_v5, %v3408_v28  ;;  %v9178_v42 = vrot.slane %v9130_v61, %v7377_v26  ;;  %v9181_v28 = vrot.slane %v9114_v29, %v7256_v39  ;;  %v9182_v61 = vld [vmem:[#allocation110_spill] sm:$0xff]  ;;  %v3456_v29 = vrot.slane %v7305_v30, %v7356_v14 }
 0x314   :  { %v4003_v30 = vrot.slane %v7417_v23, %v7271_v36 }
 0x315   :  { %v7664_v13 = vpop.permute.xlu0 %3280  ;;  %v7682_v62 = vpop.permute.xlu1 %3835  ;;  %v3950_v43 = vsel %vm8602_vm0, %v3949_v57, %v9181_v28  ;;  %v9185_v57 = vld [vmem:[#allocation143_spill] sm:$0xff]  ;;  %v9189_v28 = vld [vmem:[#allocation45_spill] sm:$0xff] }
 0x316   :  { %9156 = vst [vmem:[#allocation27_spill] sm:$0xff] %v7664_v13  ;;  %4389 = vperm.xlu0 %4799, %v9027_v16   ;;  %9162 = vst [vmem:[#allocation77_spill] sm:$0xff] %v7682_v62  ;;  %v3417_v13 = vrot.slane %v7233_v6, %v7356_v14  ;;  %v3383_v6 = vsel %vm8606_vm15, %v3381_v8, %v3376_v47  ;;  %v3955_v5 = vsel %vm8601_vm1, %v3954_v20, %v3950_v43  ;;  %v9188_v43 = vld [vmem:[#allocation18_spill] sm:$0xff] }
 0x317   :  { %4344 = vperm.xlu1 %4800, %v9170_v21   ;;  %v3390_v62 = vsel %vm3389_vm11, %v9178_v42, %v3383_v6  ;;  %v3447_v6 = vrot.slane %v9182_v61, %v7353_v52  ;;  %v9183_v42 = vld [vmem:[#allocation97_spill] sm:$0xff]  ;;  %v9186_v61 = vld [vmem:[#allocation144_spill] sm:$0xff] }
 0x318   :  { %v3418_v50 = vsel %vm3368_vm13, %v3417_v13, %v3413_v0  ;;  %v3993_v13 = vrot.slane %v7379_v22, %v7250_v9  ;;  %v9179_v0 = vld [vmem:[#allocation16_spill] sm:$0xff]  ;;  %v3397_v21 = vsel %vm3396_vm10, %v3395_v33, %v3390_v62  ;;  %v9184_v22 = vrot.slane %v9136_v12, %v7367_v35 }
 0x319   :  { %v7701_v16 = vpop.permute.xlu0 %3286  ;;  %v7718_v8 = vpop.permute.xlu1 %3841  ;;  %v3964_v62 = vrot.slane %v7290_v1, %v7271_v36  ;;  %v9187_v12 = vrot.slane %v9122_v63, %v7245_v2  ;;  %v3437_v1 = vrot.slane %v9188_v43, %v7586_v34  ;;  %v9191_v63 = vrot.slane %v9132_v53, %v7537_v4  ;;  %v9195_v53 = vld [vmem:[#allocation111_spill] sm:$0xff] }
 0x31a   :  { %4395 = vperm.xlu0 %4799, %v9031_v31   ;;  %v9175_v31 = vld [vmem:[#allocation148_spill] sm:$0xff] }
 0x31b   :  { %v3427_v49 = vrot.slane %v9175_v31, %v7578_v18  ;;  %4350 = vperm.xlu1 %4800, %v9179_v0   ;;  %v3423_v0 = vsel %vm3375_vm14, %v9184_v22, %v3418_v50  ;;  %v3989_v20 = vsel %vm8602_vm0, %v9187_v12, %v3984_v10  ;;  %v7783_v10 = vsel %vm3403_vm9, %v9191_v63, %v3397_v21  ;;  %v9194_v12 = vld [vmem:[#allocation41_spill] sm:$0xff] }
 0x31c   :  { %v3994_v50 = vsel %vm8601_vm1, %v3993_v13, %v3989_v20  ;;  %v9192_v13 = vrot.slane %v9144_v54, %v7545_v56  ;;  %v3974_v21 = vrot.slane %v9195_v53, %v7296_v27  ;;  %v9196_v63 = vld [vmem:[#allocation149_spill] sm:$0xff]  ;;  %v9201_v53 = vld [vmem:[#allocation48_spill] sm:$0xff] }
 0x31d   :  { %v7738_v31 = vpop.permute.xlu0 %3292  ;;  %v3848_v33 = vpop.permute.xlu1 %3847  ;;  %v3428_v47 = vsel %vm8606_vm15, %v3427_v49, %v3423_v0  ;;  %v9190_v49 = vld [vmem:[#allocation145_spill] sm:$0xff]  ;;  %v3466_v0 = vrot.slane %v9196_v63, %v7578_v18 }
 0x31e   :  { %4410 = vperm.xlu0 %4799, %v9183_v42   ;;  %v4101_v22 = vrot.slane %v3848_v33, %v7256_v39  ;;  %v3452_v23 = vsel %vm3361_vm12, %v9192_v13, %v3447_v6  ;;  %v9193_v33 = vrot.slane %v9116_v41, %v7277_v38  ;;  %v9197_v6 = vrot.slane %v9140_v3, %v7377_v26 }
 0x31f   :  { %4356 = vperm.xlu1 %4800, %v9189_v28   ;;  %v3457_v43 = vsel %vm3368_vm13, %v3456_v29, %v3452_v23  ;;  %v9200_v3 = vrot.slane %v9150_v11, %v7245_v2 }
 0x320   :  { %v3960_v28 = vsel %vm2841_vm2, %v9193_v33, %v3955_v5  ;;  %v3433_v41 = vsel %vm3389_vm11, %v9197_v6, %v3428_v47  ;;  %v9198_v5 = vld [vmem:[#allocation21_spill] sm:$0xff] }
 0x321   :  { %v7775_v42 = vpop.permute.xlu0 %3298  ;;  %v3965_v20 = vsel %vm8603_vm3, %v3964_v62, %v3960_v28  ;;  %v3854_v54 = vpop.permute.xlu1 %3853  ;;  %v3486_v13 = vrot.slane %v9198_v5, %v7353_v52  ;;  %v9199_v62 = vrot.slane %v9124_v58, %v7277_v38  ;;  %v3438_v33 = vsel %vm3396_vm10, %v3437_v1, %v3433_v41 }
 0x322   :  { %4431 = vperm.xlu0 %4799, %v9194_v12   ;;  %v4110_v23 = vrot.slane %v3854_v54, %v7250_v9  ;;  %v3495_v12 = vrot.slane %v7432_v45, %v7356_v14  ;;  %v4106_v47 = vsel %vm8602_vm0, %v9200_v3, %v4101_v22  ;;  %v9202_v58 = vrot.slane %v9117_v17, %v7285_v25  ;;  %v9204_v22 = vld [vmem:[#allocation73_spill] sm:$0xff]  ;;  %v9205_v17 = vld [vmem:[#allocation2_spill] sm:$0xff] }
 0x323   :  { %v3999_v29 = vsel %vm2841_vm2, %v9199_v62, %v3994_v50  ;;  %4362 = vperm.xlu1 %4800, %v9201_v53   ;;  %v9203_v1 = vrot.slane %v9146_v7, %v7367_v35  ;;  %v4013_v45 = vrot.slane %v7448_v55, %v7296_v27  ;;  %v3476_v41 = vrot.slane %v9205_v17, %v7586_v34  ;;  %v9210_v3 = vld [vmem:[#allocation50_spill] sm:$0xff] }
 0x324   :  { %v4004_v28 = vsel %vm8603_vm3, %v4003_v30, %v3999_v29  ;;  %v3970_v50 = vsel %vm2855_vm4, %v9202_v58, %v3965_v20  ;;  %v4111_v11 = vsel %vm8601_vm1, %v4110_v23, %v4106_v47  ;;  %v4023_v20 = vrot.slane %v7478_v46, %v7256_v39  ;;  %v9208_v46 = vld [vmem:[#allocation115_spill] sm:$0xff]  ;;  %v9213_v58 = vld [vmem:[#allocation6_spill] sm:$0xff] }
 0x325   :  { %v7820_v63 = vpop.permute.xlu0 %3304  ;;  %v3462_v30 = vsel %vm3375_vm14, %v9203_v1, %v3457_v43  ;;  %v3975_v54 = vsel %vm2862_vm5, %v3974_v21, %v3970_v50  ;;  %v3860_v7 = vpop.permute.xlu1 %3859  ;;  %v9206_v43 = vrot.slane %v9153_v44, %v7545_v56  ;;  %v9207_v5 = vrot.slane %v9127_v59, %v7285_v25  ;;  %v9214_v1 = vld [vmem:[#allocation90_spill] sm:$0xff] }
 0x326   :  { %4416 = vperm.xlu0 %4799, %v9204_v22   ;;  %v3467_v6 = vsel %vm8606_vm15, %v3466_v0, %v3462_v30  ;;  %v4032_v0 = vrot.slane %v7507_v15, %v7250_v9  ;;  %v4120_v21 = vrot.slane %v3860_v7, %v7271_v36  ;;  %v3505_v23 = vrot.slane %v9208_v46, %v7578_v18  ;;  %v9211_v15 = vld [vmem:[#allocation67_spill] sm:$0xff]  ;;  %v9219_v7 = vld [vmem:[#allocation8_spill] sm:$0xff] }
 0x327   :  { %v3491_v55 = vsel %vm3361_vm12, %v9206_v43, %v3486_v13  ;;  %v4009_v62 = vsel %vm2855_vm4, %v9207_v5, %v4004_v28  ;;  %v4062_v44 = vrot.slane %v7609_v32, %v7256_v39  ;;  %v9209_v13 = vrot.slane %v9152_v40, %v7277_v38  ;;  %4368 = vperm.xlu1 %4800, %v9210_v3   ;;  %v9215_v40 = vld [vmem:[#allocation58_spill] sm:$0xff]  ;;  %v9217_v22 = vld [vmem:[#allocation7_spill] sm:$0xff]  ;;  %v9224_v3 = vld [vmem:[#allocation57_spill] sm:$0xff] }
 0x328   :  { %v3496_v29 = vsel %vm3368_vm13, %v3495_v12, %v3491_v55  ;;  %v9212_v47 = vrot.slane %v9211_v15, %v7377_v26  ;;  %v4014_v53 = vsel %vm2862_vm5, %v4013_v45, %v4009_v62  ;;  %v4071_v50 = vrot.slane %v9213_v58, %v7250_v9  ;;  %v9221_v62 = vld [vmem:[#allocation80_spill] sm:$0xff] }
 0x329   :  { %v4116_v59 = vsel %vm2841_vm2, %v9209_v13, %v4111_v11  ;;  %v7861_v28 = vpop.permute.xlu0 %3310  ;;  %v9216_v30 = vrot.slane %v9215_v40, %v7537_v4  ;;  %v9218_v17 = vrot.slane %v9217_v22, %v7308_v48  ;;  %v9220_v43 = vrot.slane %v9219_v7, %v7245_v2  ;;  %v3866_v5 = vpop.permute.xlu1 %3865  ;;  %v9223_v13 = vld [vmem:[#allocation78_spill] sm:$0xff]  ;;  %v9230_v40 = vld [vmem:[#allocation87_spill] sm:$0xff]  ;;  %v9231_v22 = vld [vmem:[#allocation32_spill] sm:$0xff] }
 0x32a   :  { %v3472_v12 = vsel %vm3389_vm11, %v9212_v47, %v3467_v6  ;;  %v4121_v32 = vsel %vm8603_vm3, %v4120_v21, %v4116_v59  ;;  %4398 = vperm.xlu0 %4799, %v9214_v1   ;;  %v9222_v21 = vrot.slane %v9221_v62, %v7367_v35  ;;  %v4042_v59 = vrot.slane %v9223_v13, %v7271_v36  ;;  %v9226_v47 = vld [vmem:[#allocation10_spill] sm:$0xff] }
 0x32b   :  { %v7876_v11 = vsel %vm3403_vm9, %v9216_v30, %v3438_v33  ;;  %v3980_v6 = vsel %vm2869_vm6, %v9218_v17, %v3975_v54  ;;  %v3477_v45 = vsel %vm3396_vm10, %v3476_v41, %v3472_v12  ;;  %v4028_v55 = vsel %vm8602_vm0, %v9220_v43, %v4023_v20  ;;  %4374 = vperm.xlu1 %4800, %v9230_v40   ;;  %v9236_v62 = vld [vmem:[#allocation30_spill] sm:$0xff] }
 0x32c   :  { %v3501_v46 = vsel %vm3375_vm14, %v9222_v21, %v3496_v29  ;;  %v4033_v33 = vsel %vm8601_vm1, %v4032_v0, %v4028_v55  ;;  %v4130_v54 = vrot.slane %v3866_v5, %v7296_v27  ;;  %v9225_v41 = vrot.slane %v9224_v3, %v7308_v48  ;;  %v9228_v29 = vld [vmem:[#allocation88_spill] sm:$0xff]  ;;  %v9234_v55 = vld [vmem:[#allocation69_spill] sm:$0xff]  ;;  %v9239_v3 = vld [vmem:[#allocation54_spill] sm:$0xff] }
 0x32d   :  { %v3506_v20 = vsel %vm8606_vm15, %v3505_v23, %v3501_v46  ;;  %v9227_v12 = vrot.slane %v9226_v47, %v7245_v2  ;;  %v9229_v0 = vrot.slane %v9228_v29, %v7285_v25  ;;  %v7909_v30 = vpop.permute.xlu0 %3316  ;;  %v3525_v17 = vrot.slane %v9231_v22, %v7353_v52  ;;  %v9232_v23 = vld [vmem:[#allocation77_spill] sm:$0xff]  ;;  %v9237_v46 = vld [vmem:[#allocation60_spill] sm:$0xff]  ;;  %v9241_v29 = vld [vmem:[#allocation27_spill] sm:$0xff] }
 0x32e   :  { %v4019_v15 = vsel %vm2869_vm6, %v9225_v41, %v4014_v53  ;;  %v4081_v7 = vrot.slane %v9232_v23, %v7271_v36  ;;  %v3515_v21 = vrot.slane %v9236_v62, %v7586_v34  ;;  %v3872_v41 = vpop.permute.xlu1 %3871 }
 0x32f   :  { %v4067_v58 = vsel %vm8602_vm0, %v9227_v12, %v4062_v44  ;;  %v4126_v1 = vsel %vm2855_vm4, %v9229_v0, %v4121_v32  ;;  %v9233_v44 = vld [vmem:[#allocation91_spill] sm:$0xff]  ;;  %v9235_v32 = vrot.slane %v9234_v55, %v7537_v4  ;;  %v4254_v47 = vsel %vm8605_vm7, %v4019_v15, %v3980_v6  ;;  %v9246_v15 = vld [vmem:[#allocation17_spill] sm:$0xff] }
 0x330   :  { %v4072_v53 = vsel %vm8601_vm1, %v4071_v50, %v4067_v58  ;;  %v7917_v43 = vsel %vm2862_vm5, %v4130_v54, %v4126_v1  ;;  %4440 = vperm.xlu0 %4799, %v9233_v44   ;;  %v9238_v50 = vrot.slane %v9237_v46, %v7277_v38  ;;  %v3534_v54 = vrot.slane %v9239_v3, %v7356_v14  ;;  %v9240_v58 = vld [vmem:[#allocation64_spill] sm:$0xff]  ;;  %v9242_v1 = vld [vmem:[#allocation81_spill] sm:$0xff]  ;;  %v9249_v3 = vld [vmem:[#allocation62_spill] sm:$0xff] }
 0x331   :  { %v7924_v5 = vsel %vm3403_vm9, %v9235_v32, %v3477_v45  ;;  %v4052_v45 = vrot.slane %v9240_v58, %v7296_v27  ;;  %v3564_v0 = vrot.slane %v9241_v29, %v7353_v52  ;;  %v9243_v40 = vrot.slane %v9242_v1, %v7377_v26  ;;  %4380 = vperm.xlu1 %4800, %v9246_v15   ;;  %v7952_v55 = vpop.permute.xlu0 %3322  ;;  %v9251_v58 = vld [vmem:[#allocation37_spill] sm:$0xff] }
 0x332   :  { %v4038_v13 = vsel %vm2841_vm2, %v9238_v50, %v4033_v33  ;;  %v9244_v33 = vld [vmem:[#allocation72_spill] sm:$0xff]  ;;  %v3573_v6 = vrot.slane %v7701_v16, %v7356_v14  ;;  %v9247_v32 = vrot.slane %v9164_v19, %v7545_v56  ;;  %v4091_v46 = vrot.slane %v7718_v8, %v7296_v27 }
 0x333   :  { %v4043_v12 = vsel %vm8603_vm3, %v4042_v59, %v4038_v13  ;;  %v3511_v22 = vsel %vm3389_vm11, %v9243_v40, %v3506_v20  ;;  %v9245_v23 = vrot.slane %v9244_v33, %v7277_v38  ;;  %v4140_v59 = vrot.slane %v3872_v41, %v7256_v39  ;;  %v9248_v16 = vld [vmem:[#allocation20_spill] sm:$0xff]  ;;  %v9253_v40 = vld [vmem:[#allocation74_spill] sm:$0xff] }
 0x334   :  { %v3530_v62 = vsel %vm3361_vm12, %v9247_v32, %v3525_v17  ;;  %4422 = vperm.xlu0 %4799, %v9248_v16   ;;  %v3516_v50 = vsel %vm3396_vm10, %v3515_v21, %v3511_v22  ;;  %v9250_v41 = vrot.slane %v9249_v3, %v7285_v25  ;;  %v3612_v17 = vrot.slane %v7861_v28, %v7356_v14  ;;  %v9255_v22 = vld [vmem:[#allocation11_spill] sm:$0xff]  ;;  %v9261_v16 = vld [vmem:[#allocation65_spill] sm:$0xff] }
 0x335   :  { %v4077_v44 = vsel %vm2841_vm2, %v9245_v23, %v4072_v53  ;;  %v3603_v53 = vrot.slane %v7820_v63, %v7353_v52  ;;  %v3535_v13 = vsel %vm3368_vm13, %v3534_v54, %v3530_v62  ;;  %v3544_v63 = vrot.slane %v9251_v58, %v7578_v18 }
 0x336   :  { %v4082_v20 = vsel %vm8603_vm3, %v4081_v7, %v4077_v44  ;;  %v4048_v19 = vsel %vm2855_vm4, %v9250_v41, %v4043_v12  ;;  %v3878_v7 = vpop.permute.xlu1 %3877  ;;  %v9252_v29 = vrot.slane %v9171_v24, %v7545_v56  ;;  %v9254_v12 = vrot.slane %v9253_v40, %v7285_v25  ;;  %v9257_v24 = vld [vmem:[#allocation26_spill] sm:$0xff]  ;;  %v9258_v44 = vld [vmem:[#allocation83_spill] sm:$0xff] }
 0x337   :  { %v4053_v8 = vsel %vm2862_vm5, %v4052_v45, %v4048_v19  ;;  %v4149_v54 = vrot.slane %v3878_v7, %v7250_v9  ;;  %v3583_v45 = vrot.slane %v7738_v31, %v7578_v18  ;;  %v9256_v33 = vrot.slane %v9255_v22, %v7245_v2  ;;  %4386 = vperm.xlu1 %4800, %v9257_v24   ;;  %v9273_v24 = vld [vmem:[#allocation140_spill] sm:$0xff] }
 0x338   :  { %v3569_v21 = vsel %vm3361_vm12, %v9252_v29, %v3564_v0  ;;  %v4087_v28 = vsel %vm2855_vm4, %v9254_v12, %v4082_v20  ;;  %v3329_v0 = vpop.permute.xlu0 %3328  ;;  %v9259_v15 = vrot.slane %v9258_v44, %v7537_v4  ;;  %v9260_v62 = vrot.slane %v9176_v51, %v7545_v56  ;;  %4404 = vperm.xlu0 %4799, %v9261_v16   ;;  %v9263_v51 = vld [vmem:[#allocation68_spill] sm:$0xff]  ;;  %v9265_v29 = vld [vmem:[#allocation101_spill] sm:$0xff] }
 0x339   :  { %v3574_v1 = vsel %vm3368_vm13, %v3573_v6, %v3569_v21  ;;  %v4145_v23 = vsel %vm8602_vm0, %v9256_v33, %v4140_v59  ;;  %v4092_v32 = vsel %vm2862_vm5, %v4091_v46, %v4087_v28  ;;  %v9262_v59 = vrot.slane %v9166_v60, %v7367_v35  ;;  %v9267_v21 = vld [vmem:[#allocation13_spill] sm:$0xff] }
 0x33a   :  { %v7996_v6 = vsel %vm3403_vm9, %v9259_v15, %v3516_v50  ;;  %v3608_v31 = vsel %vm3361_vm12, %v9260_v62, %v3603_v53  ;;  %v4150_v20 = vsel %vm8601_vm1, %v4149_v54, %v4145_v23  ;;  %v3622_v50 = vrot.slane %v7909_v30, %v7578_v18  ;;  %v3884_v19 = vpop.permute.xlu1 %3883  ;;  %v9268_v54 = vld [vmem:[#allocation82_spill] sm:$0xff]  ;;  %v9272_v33 = vld [vmem:[#allocation33_spill] sm:$0xff] }
 0x33b   :  { %v3540_v3 = vsel %vm3375_vm14, %v9262_v59, %v3535_v13  ;;  %v3613_v41 = vsel %vm3368_vm13, %v3612_v17, %v3608_v31  ;;  %v3642_v46 = vrot.slane %v3329_v0, %v7353_v52  ;;  %v9264_v53 = vrot.slane %v9263_v51, %v7308_v48  ;;  %4392 = vperm.xlu1 %4800, %v9272_v33   ;;  %v9279_v51 = vld [vmem:[#allocation94_spill] sm:$0xff] }
 0x33c   :  { %v3545_v58 = vsel %vm8606_vm15, %v3544_v63, %v3540_v3  ;;  %v9266_v60 = vrot.slane %v9265_v29, %v7367_v35  ;;  %v4159_v17 = vrot.slane %v3884_v19, %v7271_v36  ;;  %v3554_v30 = vrot.slane %v9267_v21, %v7586_v34  ;;  %v9277_v3 = vld [vmem:[#allocation133_spill] sm:$0xff]  ;;  %v9286_v21 = vld [vmem:[#allocation106_spill] sm:$0xff] }
 0x33d   :  { %v4058_v7 = vsel %vm2869_vm6, %v9264_v53, %v4053_v8  ;;  %v9269_v40 = vrot.slane %v9268_v54, %v7308_v48  ;;  %v9270_v8 = vld [vmem:[#allocation34_spill] sm:$0xff]  ;;  %vm3154_vm1 = vcmask 1046534   ;;  %v3593_v23 = vrot.slane %v7775_v42, %v7586_v34 }
 0x33e   :  { %v3579_v13 = vsel %vm3375_vm14, %v9266_v60, %v3574_v1  ;;  %v9271_v63 = vrot.slane %v9270_v8, %v7277_v38  ;;  %v3335_v1 = vpop.permute.xlu0 %3334  ;;  %v9274_v0 = vrot.slane %v9273_v24, %v7367_v35  ;;  %vm3156_vm0 = vcmask 1047559   ;;  %v3890_v59 = vpop.permute.xlu1 %3889  ;;  %v9290_v33 = vld [vmem:[#allocation98_spill] sm:$0xff] }
 0x33f   :  { %v4097_v12 = vsel %vm2869_vm6, %v9269_v40, %v4092_v32  ;;  %v3584_v28 = vsel %vm8606_vm15, %v3583_v45, %v3579_v13  ;;  %v3651_v45 = vrot.slane %v3335_v1, %v7356_v14  ;;  %v9275_v32 = vld [vmem:[#allocation28_spill] sm:$0xff]  ;;  %v4255_v62 = vsel %vm8604_vm8, %v4058_v7, %v4254_v47  ;;  %4407 = vperm.xlu1 %4800, %v9286_v21  }
 0x340   :  { %v4155_v22 = vsel %vm2841_vm2, %v9271_v63, %v4150_v20  ;;  %v3618_v44 = vsel %vm3375_vm14, %v9274_v0, %v3613_v41  ;;  %4446 = vperm.xlu0 %4799, %v9275_v32   ;;  %v3632_v20 = vrot.slane %v7952_v55, %v7586_v34  ;;  %v9276_v42 = vrot.slane %v9186_v61, %v7545_v56  ;;  %v9282_v7 = vld [vmem:[#allocation136_spill] sm:$0xff] }
 0x341   :  { %v4160_v15 = vsel %vm8603_vm3, %v4159_v17, %v4155_v22  ;;  %v3623_v31 = vsel %vm8606_vm15, %v3622_v50, %v3618_v44  ;;  %v9278_v41 = vrot.slane %v9277_v3, %v7377_v26  ;;  %v9280_v47 = vrot.slane %v9279_v51, %v7308_v48  ;;  %v9299_v3 = vld [vmem:[#allocation107_spill] sm:$0xff]  ;;  %v9301_v51 = vld [vmem:[#allocation126_spill] sm:$0xff] }
 0x342   :  { %v3647_v16 = vsel %vm3361_vm12, %v9276_v42, %v3642_v46  ;;  %v4169_v55 = vrot.slane %v3890_v59, %v7296_v27  ;;  %vm9281_vm3 = vcmask 1043459   ;;  %v9283_v29 = vrot.slane %v9282_v7, %v7377_v26  ;;  %v3896_v0 = vpop.permute.xlu1 %3895 }
 0x343   :  { %v3550_v19 = vsel %vm3389_vm11, %v9278_v41, %v3545_v58  ;;  %v4136_v50 = vsel %vm2869_vm6, %v9280_v47, %v7917_v43  ;;  %v3652_v53 = vsel %vm3368_vm13, %v3651_v45, %v3647_v16  ;;  %v4256_v46 = vsel %vm9281_vm3, %v4097_v12, %v4255_v62  ;;  %v9284_v58 = vld [vmem:[#allocation23_spill] sm:$0xff]  ;;  %v3341_v43 = vpop.permute.xlu0 %3340  ;;  %4413 = vperm.xlu1 %4800, %v9299_v3   ;;  %v9319_v3 = vld [vmem:[#allocation108_spill] sm:$0xff] }
 0x344   :  { %v3555_v61 = vsel %vm3396_vm10, %v3554_v30, %v3550_v19  ;;  %v3589_v60 = vsel %vm3389_vm11, %v9283_v29, %v3584_v28  ;;  %v9285_v13 = vrot.slane %v9284_v58, %v7285_v25  ;;  %v9287_v30 = vrot.slane %v9180_v37, %v7377_v26  ;;  %v9288_v28 = vld [vmem:[#allocation116_spill] sm:$0xff]  ;;  %v9297_v16 = vld [vmem:[#allocation103_spill] sm:$0xff] }
 0x345   :  { %v3594_v54 = vsel %vm3396_vm10, %v3593_v23, %v3589_v60  ;;  %v3661_v8 = vrot.slane %v3341_v43, %v7578_v18  ;;  %4449 = vperm.xlu0 %4799, %v9288_v28   ;;  %vm9289_vm3 = vcmask 1044484   ;;  %v9291_v1 = vrot.slane %v9290_v33, %v7308_v48  ;;  %v9300_v19 = vld [vmem:[#allocation76_spill] sm:$0xff]  ;;  %v9306_v29 = vld [vmem:[#allocation147_spill] sm:$0xff]  ;;  %v9312_v28 = vld [vmem:[#allocation86_spill] sm:$0xff] }
 0x346   :  { %v4165_v17 = vsel %vm2855_vm4, %v9285_v13, %v4160_v15  ;;  %v3628_v40 = vsel %vm3389_vm11, %v9287_v30, %v3623_v31  ;;  %v4257_v63 = vsel %vm9289_vm3, %v4136_v50, %v4256_v46  ;;  %v9292_v37 = vrot.slane %v9190_v49, %v7367_v35  ;;  %v9293_v15 = vld [vmem:[#allocation95_spill] sm:$0xff]  ;;  %v9309_v43 = vld [vmem:[#allocation36_spill] sm:$0xff] }
 0x347   :  { %v4170_v12 = vsel %vm2862_vm5, %v4169_v55, %v4165_v17  ;;  %v3633_v22 = vsel %vm3396_vm10, %v3632_v20, %v3628_v40  ;;  %v3678_v44 = vsel %vm8605_vm7, %v7876_v11, %v7783_v10  ;;  %v9294_v45 = vrot.slane %v9293_v15, %v7537_v4  ;;  %v9296_v20 = vld [vmem:[#allocation146_spill] sm:$0xff]  ;;  %v3347_v41 = vpop.permute.xlu0 %3346  ;;  %v9305_v46 = vld [vmem:[#allocation31_spill] sm:$0xff]  ;;  %v3902_v17 = vpop.permute.xlu1 %3901  ;;  %4434 = vperm.xlu1 %4800, %v9312_v28  }
 0x348   :  { %v4175_v23 = vsel %vm2869_vm6, %v9291_v1, %v4170_v12  ;;  %v3657_v24 = vsel %vm3375_vm14, %v9292_v37, %v3652_v53  ;;  %vm9295_vm3 = vcmask 1045509   ;;  %v3666_v42 = vrot.slane %v9296_v20, %v7377_v26  ;;  %v9317_v20 = vld [vmem:[#allocation105_spill] sm:$0xff] }
 0x349   :  { %v3560_v32 = vsel %vm3403_vm9, %v9294_v45, %v3555_v61  ;;  %v4258_v62 = vsel %vm9295_vm3, %v4175_v23, %v4257_v63  ;;  %v3662_v31 = vsel %vm8606_vm15, %v3661_v8, %v3657_v24  ;;  %v3679_v49 = vsel %vm8604_vm8, %v7924_v5, %v3678_v44  ;;  %v9314_v23 = vld [vmem:[#allocation134_spill] sm:$0xff]  ;;  %v9315_v45 = vld [vmem:[#allocation113_spill] sm:$0xff] }
 0x34a   :  { %v9298_v59 = vrot.slane %v9297_v16, %v7537_v4  ;;  %v4179_v11 = vrot.slane %v3896_v0, %v7256_v39  ;;  %v9302_v47 = vrot.slane %v9301_v51, %v7308_v48  ;;  %vm9303_vm3 = vcmask 1043459  }
 0x34b   :  { %v3680_v53 = vsel %vm9303_vm3, %v7996_v6, %v3679_v49  ;;  %v9304_v5 = vrot.slane %v9185_v57, %v7537_v4  ;;  %v3671_v61 = vrot.slane %v3347_v41, %v7586_v34  ;;  %v4183_v7 = vrot.slane %v9305_v46, %v7245_v2  ;;  %v4267_v63 = vpop.permute.xlu0 %4266  ;;  %v3908_v0 = vpop.permute.xlu1 %3907  ;;  %4437 = vperm.xlu1 %4800, %v9315_v45  }
 0x34c   :  { %v3599_v10 = vsel %vm3403_vm9, %v9298_v59, %v3594_v54  ;;  %v3143_v50 = vsel %vm2869_vm6, %v9302_v47, %v9300_v19  ;;  %v3676_v60 = vrot.slane %v9306_v29, %v7537_v4  ;;  %vm9307_vm8 = vcmask 1044484   ;;  %v9310_v54 = vld [vmem:[#allocation117_spill] sm:$0xff]  ;;  %v9318_v59 = vld [vmem:[#allocation102_spill] sm:$0xff] }
 0x34d   :  { %v3638_v55 = vsel %vm3403_vm9, %v9304_v5, %v3633_v22  ;;  %v3681_v58 = vsel %vm9307_vm8, %v3560_v32, %v3680_v53  ;;  %v3667_v13 = vsel %vm3389_vm11, %v3666_v42, %v3662_v31  ;;  %vm9308_vm7 = vcmask 1045509   ;;  %v9320_v5 = vld [vmem:[#allocation104_spill] sm:$0xff] }
 0x34e   :  { %v3682_v6 = vsel %vm9308_vm7, %v3599_v10, %v3681_v58  ;;  %vm4774_vm3 = vcmask 523264   ;;  %v3672_v57 = vsel %vm3396_vm10, %v3671_v61, %v3667_v13  ;;  %v4188_v21 = vrot.slane %v3902_v17, %v7250_v9  ;;  %v9321_v61 = vld [vmem:[#allocation112_spill] sm:$0xff]  ;;  %v9322_v58 = vld [vmem:[#allocation114_spill] sm:$0xff] }
 0x34f   :  { %v3155_v30 = vsel %vm3154_vm1, %v9310_v54, %v9309_v43  ;;  %v3683_v40 = vsel %vm3154_vm1, %v3638_v55, %v3682_v6  ;;  %vm9311_vm15 = vcmask 130112   ;;  %v3677_v8 = vsel %vm3403_vm9, %v3676_v60, %v3672_v57  ;;  %v4276_v32 = vpop.permute.xlu0 %4275  ;;  %v3914_v49 = vpop.permute.xlu1 %3913  ;;  %4419 = vperm.xlu1 %4800, %v9319_v3   ;;  %v9324_v43 = vld [vmem:[#allocation109_spill] sm:$0xff]  ;;  %v9325_v54 = vld [vmem:[#allocation139_spill] sm:$0xff] }
 0x350   :  { %v4184_v12 = vsel %vm9311_vm15, %v4183_v7, %v4179_v11  ;;  %v3157_v22 = vsel %vm3156_vm0, %v3143_v50, %v3155_v30  ;;  %v3684_v33 = vsel %vm3156_vm0, %v3677_v8, %v3683_v40  ;;  %vm9313_vm7 = vcmask 195712   ;;  %v9326_v8 = vld [vmem:[#allocation141_spill] sm:$0xff] }
 0x351   :  { %v4189_v1 = vsel %vm9313_vm7, %v4188_v21, %v4184_v12  ;;  %v4193_v37 = vrot.slane %v9314_v23, %v7277_v38  ;;  %v4775_v24 = vsel %vm4774_vm3, %v3157_v22, %v3684_v33  ;;  %v4198_v44 = vrot.slane %v3908_v0, %v7271_v36  ;;  %v9327_v22 = vld [vmem:[#allocation29_spill] sm:$0xff] }
 0x352   :  { %4777 = vst [vmem:[%s8340_s1] sm:$0xff] %v4775_v24  ;;  %vm9316_vm8 = vcmask 326912   ;;  %v4203_v42 = vrot.slane %v9317_v20, %v7285_v25  ;;  %v4208_v16 = vrot.slane %v3914_v49, %v7296_v27  ;;  %v4213_v10 = vrot.slane %v9318_v59, %v7308_v48  ;;  %v9328_v24 = vld [vmem:[#allocation25_spill] sm:$0xff] }
 0x353   :  { %v4194_v15 = vsel %vm2841_vm2, %v4193_v37, %v4189_v1  ;;  %v4282_v41 = vpop.permute.xlu0 %4281  ;;  %v3920_v47 = vpop.permute.xlu1 %3919  ;;  %4401 = vperm.xlu1 %4800, %v9320_v5   ;;  %v4222_v46 = vrot.slane %v9321_v61, %v7245_v2  ;;  %v4242_v30 = vrot.slane %v9325_v54, %v7285_v25  ;;  %v4252_v28 = vrot.slane %v9326_v8, %v7308_v48 }
 0x354   :  { %v4199_v31 = vsel %vm9316_vm8, %v4198_v44, %v4194_v15  ;;  %v4218_v53 = vrot.slane %v3920_v47, %v7256_v39  ;;  %v4461_v25 = vrot.slane %v4267_v63, %v7545_v56 }
 0x355   :  { %v4204_v11 = vsel %vm2855_vm4, %v4203_v42, %v4199_v31 }
 0x356   :  { %v4209_v19 = vsel %vm2862_vm5, %v4208_v16, %v4204_v11  ;;  %v4223_v60 = vsel %vm9311_vm15, %v4222_v46, %v4218_v53  ;;  %v4476_v16 = vrot.slane %v4276_v32, %v7578_v18  ;;  %vm9333_vm15 = vcmask 1042434  }
 0x357   :  { %v4214_v51 = vsel %vm2869_vm6, %v4213_v10, %v4209_v19  ;;  %v4288_v55 = vpop.permute.xlu0 %4287  ;;  %v3926_v7 = vpop.permute.xlu1 %3925  ;;  %4443 = vperm.xlu1 %4800, %v9322_v58   ;;  %v4486_v19 = vrot.slane %v4282_v41, %v7586_v34 }
 0x358   :  { %v4259_v50 = vsel %vm3154_vm1, %v4214_v51, %v4258_v62  ;;  %v4227_v29 = vrot.slane %v3926_v7, %v7250_v9  ;;  %v9323_v62 = vld [vmem:[#allocation137_spill] sm:$0xff]  ;;  %v4496_v46 = vrot.slane %v4288_v55, %v7353_v52 }
 0x359   :  { %v4232_v6 = vrot.slane %v9323_v62, %v7277_v38 }
 0x35a   :  { %v4228_v17 = vsel %vm9313_vm7, %v4227_v29, %v4223_v60 }
 0x35b   :  { %v4294_v13 = vpop.permute.xlu0 %4293  ;;  %v3932_v39 = vpop.permute.xlu1 %3931  ;;  %v4233_v21 = vsel %vm2841_vm2, %v4232_v6, %v4228_v17  ;;  %4425 = vperm.xlu1 %4800, %v9324_v43   ;;  %vm9329_vm2 = vcmask 851712  }
 0x35c   :  { %v4237_v57 = vrot.slane %v3932_v39, %v7271_v36  ;;  %v4505_v60 = vrot.slane %v4294_v13, %v7356_v14  ;;  %vm9334_vm7 = vmmov %vm9329_vm2 }
 0x35e   :  { %v4238_v9 = vsel %vm9316_vm8, %v4237_v57, %v4233_v21  ;;  %vm9335_vm8 = vcmask 1043459  }
 0x35f   :  { %v4300_v2 = vpop.permute.xlu0 %4299  ;;  %v3938_v40 = vpop.permute.xlu1 %3937  ;;  %v4243_v38 = vsel %vm2855_vm4, %v4242_v30, %v4238_v9  ;;  %4428 = vperm.xlu1 %4800, %v9327_v22   ;;  %vm9330_vm4 = vmmov %vm9329_vm2 }
 0x360   :  { %v4247_v12 = vrot.slane %v3938_v40, %v7296_v27  ;;  %v4515_v39 = vrot.slane %v4300_v2, %v7578_v18 }
 0x362   :  { %v4248_v33 = vsel %vm2862_vm5, %v4247_v12, %v4243_v38  ;;  %vm9331_vm5 = vcmask 1041409  }
 0x363   :  { %v4306_v36 = vpop.permute.xlu0 %4305  ;;  %v4253_v1 = vsel %vm2869_vm6, %v4252_v28, %v4248_v33  ;;  %v4264_v37 = vpop.permute.xlu1 %4263  ;;  %4452 = vperm.xlu1 %4800, %v9328_v24   ;;  %vm9332_vm6 = vmmov %vm9329_vm2 }
 0x364   :  { %v8186_v23 = vsel %vm3156_vm0, %v4253_v1, %v4259_v50  ;;  %v4457_v27 = vrot.slane %v4264_v37, %v7353_v52  ;;  %v4525_v13 = vrot.slane %v4306_v36, %v7586_v34 }
 0x366   :  { %v4462_v0 = vsel %vm3361_vm12, %v4461_v25, %v4457_v27 }
 0x367   :  { %v4312_v48 = vpop.permute.xlu0 %4311  ;;  %v4270_v44 = vpop.permute.xlu1 %4269 }
 0x368   :  { %v4466_v15 = vrot.slane %v4270_v44, %v7356_v14  ;;  %v4535_v22 = vrot.slane %v4312_v48, %v7353_v52 }
 0x36a   :  { %v4467_v31 = vsel %vm3368_vm13, %v4466_v15, %v4462_v0 }
 0x36b   :  { %v4318_v45 = vpop.permute.xlu0 %4317  ;;  %v4273_v20 = vpop.permute.xlu1 %4272 }
 0x36c   :  { %v4471_v42 = vrot.slane %v4273_v20, %v7367_v35  ;;  %v4544_v36 = vrot.slane %v4318_v45, %v7356_v14 }
 0x36e   :  { %v4472_v63 = vsel %vm3375_vm14, %v4471_v42, %v4467_v31 }
 0x36f   :  { %v4324_v49 = vpop.permute.xlu0 %4323  ;;  %v4279_v59 = vpop.permute.xlu1 %4278  ;;  %v4477_v10 = vsel %vm9329_vm2, %v4476_v16, %v4472_v63 }
 0x370   :  { %v4481_v11 = vrot.slane %v4279_v59, %v7377_v26  ;;  %v4554_v0 = vrot.slane %v4324_v49, %v7578_v18 }
 0x372   :  { %v4482_v51 = vsel %vm3389_vm11, %v4481_v11, %v4477_v10 }
 0x373   :  { %v4330_v3 = vpop.permute.xlu0 %4329  ;;  %v4285_v47 = vpop.permute.xlu1 %4284  ;;  %v4487_v50 = vsel %vm3396_vm10, %v4486_v19, %v4482_v51 }
 0x374   :  { %v4491_v53 = vrot.slane %v4285_v47, %v7537_v4  ;;  %v4564_v45 = vrot.slane %v4330_v3, %v7586_v34 }
 0x376   :  { %v4492_v32 = vsel %vm3403_vm9, %v4491_v53, %v4487_v50 }
 0x377   :  { %v4336_v5 = vpop.permute.xlu0 %4335  ;;  %v4291_v61 = vpop.permute.xlu1 %4290 }
 0x378   :  { %v4500_v7 = vrot.slane %v4291_v61, %v7545_v56  ;;  %v4574_v19 = vrot.slane %v4336_v5, %v7353_v52 }
 0x37a   :  { %v4501_v41 = vsel %vm3361_vm12, %v4500_v7, %v4496_v46 }
 0x37b   :  { %v4342_v29 = vpop.permute.xlu0 %4341  ;;  %v4297_v58 = vpop.permute.xlu1 %4296  ;;  %v4506_v17 = vsel %vm3368_vm13, %v4505_v60, %v4501_v41 }
 0x37c   :  { %v4510_v62 = vrot.slane %v4297_v58, %v7367_v35  ;;  %v4583_v47 = vrot.slane %v4342_v29, %v7356_v14 }
 0x37e   :  { %v4511_v57 = vsel %vm3375_vm14, %v4510_v62, %v4506_v17 }
 0x37f   :  { %v4348_v6 = vpop.permute.xlu0 %4347  ;;  %v4303_v21 = vpop.permute.xlu1 %4302  ;;  %v4516_v55 = vsel %vm9330_vm4, %v4515_v39, %v4511_v57  ;;  %vm9336_vm4 = vmmov %vm9329_vm2 }
 0x380   :  { %v4520_v43 = vrot.slane %v4303_v21, %v7377_v26  ;;  %v4593_v60 = vrot.slane %v4348_v6, %v7578_v18 }
 0x382   :  { %v4521_v54 = vsel %vm3389_vm11, %v4520_v43, %v4516_v55 }
 0x383   :  { %v4354_v9 = vpop.permute.xlu0 %4353  ;;  %v4309_v30 = vpop.permute.xlu1 %4308  ;;  %v4526_v40 = vsel %vm3396_vm10, %v4525_v13, %v4521_v54 }
 0x384   :  { %v4530_v12 = vrot.slane %v4309_v30, %v7537_v4  ;;  %v4603_v29 = vrot.slane %v4354_v9, %v7586_v34 }
 0x386   :  { %v4531_v8 = vsel %vm3403_vm9, %v4530_v12, %v4526_v40 }
 0x387   :  { %v8219_v2 = vpop.permute.xlu0 %4359  ;;  %v4766_v28 = vsel %vm9331_vm5, %v4531_v8, %v4492_v32  ;;  %v4315_v38 = vpop.permute.xlu1 %4314  ;;  %vm9340_vm5 = vcmask 1045509  }
 0x388   :  { %v4539_v33 = vrot.slane %v4315_v38, %v7545_v56 }
 0x38a   :  { %v4540_v1 = vsel %vm3361_vm12, %v4539_v33, %v4535_v22 }
 0x38b   :  { %v4321_v37 = vpop.permute.xlu1 %4320  ;;  %v4545_v25 = vsel %vm3368_vm13, %v4544_v36, %v4540_v1  ;;  %v8227_v27 = vpop.permute.xlu0 %4365 }
 0x38c   :  { %v4549_v24 = vrot.slane %v4321_v37, %v7367_v35 }
 0x38e   :  { %v4550_v44 = vsel %vm3375_vm14, %v4549_v24, %v4545_v25 }
 0x38f   :  { %v4327_v15 = vpop.permute.xlu1 %4326  ;;  %v4555_v48 = vsel %vm9332_vm6, %v4554_v0, %v4550_v44  ;;  %v8235_v20 = vpop.permute.xlu0 %4371 }
 0x390   :  { %v4559_v31 = vrot.slane %v4327_v15, %v7377_v26 }
 0x392   :  { %v4560_v42 = vsel %vm3389_vm11, %v4559_v31, %v4555_v48  ;;  %v4613_v31 = vrot.slane %v8219_v2, %v7353_v52 }
 0x393   :  { %v4333_v16 = vpop.permute.xlu1 %4332  ;;  %v4565_v63 = vsel %vm3396_vm10, %v4564_v45, %v4560_v42  ;;  %v8243_v51 = vpop.permute.xlu0 %4377 }
 0x394   :  { %v4569_v59 = vrot.slane %v4333_v16, %v7537_v4 }
 0x396   :  { %v4570_v49 = vsel %vm3403_vm9, %v4569_v59, %v4565_v63 }
 0x397   :  { %v4767_v10 = vsel %vm9333_vm15, %v4570_v49, %v4766_v28  ;;  %v4339_v11 = vpop.permute.xlu1 %4338  ;;  %v4384_v46 = vpop.permute.xlu0 %4383 }
 0x398   :  { %v4578_v3 = vrot.slane %v4339_v11, %v7545_v56  ;;  %v4652_v48 = vrot.slane %v4384_v46, %v7353_v52 }
 0x39a   :  { %v4579_v50 = vsel %vm3361_vm12, %v4578_v3, %v4574_v19  ;;  %v4622_v19 = vrot.slane %v8227_v27, %v7356_v14 }
 0x39b   :  { %v4345_v53 = vpop.permute.xlu1 %4344  ;;  %v4584_v32 = vsel %vm3368_vm13, %v4583_v47, %v4579_v50  ;;  %v4390_v39 = vpop.permute.xlu0 %4389 }
 0x39c   :  { %v4588_v61 = vrot.slane %v4345_v53, %v7367_v35  ;;  %v4661_v59 = vrot.slane %v4390_v39, %v7356_v14 }
 0x39e   :  { %v4589_v7 = vsel %vm3375_vm14, %v4588_v61, %v4584_v32  ;;  %v4632_v61 = vrot.slane %v8235_v20, %v7578_v18 }
 0x39f   :  { %v4351_v41 = vpop.permute.xlu1 %4350  ;;  %v4594_v58 = vsel %vm9334_vm7, %v4593_v60, %v4589_v7  ;;  %v4396_v13 = vpop.permute.xlu0 %4395 }
 0x3a0   :  { %v4598_v5 = vrot.slane %v4351_v41, %v7377_v26  ;;  %v4671_v60 = vrot.slane %v4396_v13, %v7578_v18 }
 0x3a2   :  { %v4599_v17 = vsel %vm3389_vm11, %v4598_v5, %v4594_v58 }
 0x3a3   :  { %v4357_v62 = vpop.permute.xlu1 %4356  ;;  %v4604_v21 = vsel %vm3396_vm10, %v4603_v29, %v4599_v17  ;;  %v4411_v40 = vpop.permute.xlu0 %4410 }
 0x3a4   :  { %v4608_v57 = vrot.slane %v4357_v62, %v7537_v4  ;;  %v4695_v47 = vrot.slane %v4411_v40, %v7545_v56 }
 0x3a6   :  { %v4609_v55 = vsel %vm3403_vm9, %v4608_v57, %v4604_v21 }
 0x3a7   :  { %v8260_v43 = vsel %vm9335_vm8, %v4609_v55, %v4767_v10  ;;  %v4363_v6 = vpop.permute.xlu1 %4362  ;;  %v4432_v8 = vpop.permute.xlu0 %4431 }
 0x3a8   :  { %v4617_v15 = vrot.slane %v4363_v6, %v7545_v56  ;;  %v4730_v46 = vrot.slane %v4432_v8, %v7353_v52 }
 0x3aa   :  { %v4618_v49 = vsel %vm3361_vm12, %v4617_v15, %v4613_v31 }
 0x3ab   :  { %v4369_v54 = vpop.permute.xlu1 %4368  ;;  %v4417_v38 = vpop.permute.xlu0 %4416  ;;  %v4623_v7 = vsel %vm3368_vm13, %v4622_v19, %v4618_v49 }
 0x3ac   :  { %v4627_v10 = vrot.slane %v4369_v54, %v7367_v35  ;;  %v4642_v54 = vrot.slane %v8243_v51, %v7586_v34 }
 0x3ae   :  { %v4628_v41 = vsel %vm3375_vm14, %v4627_v10, %v4623_v7 }
 0x3af   :  { %v4375_v30 = vpop.permute.xlu1 %4374  ;;  %v4399_v33 = vpop.permute.xlu0 %4398  ;;  %v4633_v6 = vsel %vm9336_vm4, %v4632_v61, %v4628_v41 }
 0x3b0   :  { %v4676_v55 = vrot.slane %v4399_v33, %v7377_v26 }
 0x3b3   :  { %v8262_v12 = vpop.permute.xlu1 %4380  ;;  %v4441_v37 = vpop.permute.xlu0 %4440 }
 0x3b4   :  { %v4744_v13 = vrot.slane %v4441_v37, %v7367_v35  ;;  %v4647_v40 = vrot.slane %v8262_v12, %v7537_v4 }
 0x3b7   :  { %v4387_v9 = vpop.permute.xlu1 %4386  ;;  %v4423_v24 = vpop.permute.xlu0 %4422 }
 0x3b8   :  { %v4656_v44 = vrot.slane %v4387_v9, %v7545_v56 }
 0x3ba   :  { %v4657_v42 = vsel %vm3361_vm12, %v4656_v44, %v4652_v48 }
 0x3bb   :  { %v4393_v28 = vpop.permute.xlu1 %4392  ;;  %v4405_v16 = vpop.permute.xlu0 %4404  ;;  %v4662_v50 = vsel %vm3368_vm13, %v4661_v59, %v4657_v42 }
 0x3bc   :  { %v4666_v63 = vrot.slane %v4393_v28, %v7367_v35  ;;  %v4686_v12 = vrot.slane %v4405_v16, %v7537_v4 }
 0x3be   :  { %v4667_v27 = vsel %vm3375_vm14, %v4666_v63, %v4662_v50 }
 0x3bf   :  { %v4408_v22 = vpop.permute.xlu1 %4407  ;;  %v4447_v58 = vpop.permute.xlu0 %4446  ;;  %v4672_v29 = vsel %vm9329_vm2, %v4671_v60, %v4667_v27 }
 0x3c0   :  { %v4691_v11 = vrot.slane %v4408_v22, %v7353_v52 }
 0x3c2   :  { %v4696_v5 = vsel %vm3361_vm12, %v4695_v47, %v4691_v11 }
 0x3c3   :  { %v4414_v36 = vpop.permute.xlu1 %4413 }
 0x3c4   :  { %v4700_v3 = vrot.slane %v4414_v36, %v7356_v14  ;;  %v4450_v37 = vpop.permute.xlu0 %4449 }
 0x3c5   :  { %v4759_v31 = vrot.slane %v4450_v37, %v7586_v34 }
 0x3c6   :  { %v4701_v17 = vsel %vm3368_vm13, %v4700_v3, %v4696_v5 }
 0x3c7   :  { %v4435_v1 = vpop.permute.xlu1 %4434 }
 0x3c8   :  { %v4734_v2 = vrot.slane %v4435_v1, %v7545_v56  ;;  %v4637_v56 = vrot.slane %v4375_v30, %v7377_v26  ;;  %v4754_v1 = vrot.slane %v4447_v58, %v7377_v26 }
 0x3ca   :  { %v4735_v20 = vsel %vm3361_vm12, %v4734_v2, %v4730_v46  ;;  %v4638_v30 = vsel %vm3389_vm11, %v4637_v56, %v4633_v6  ;;  %vm9337_vm12 = vmmov %vm9329_vm2 }
 0x3cb   :  { %v4438_v25 = vpop.permute.xlu1 %4437  ;;  %v4643_v36 = vsel %vm3396_vm10, %v4642_v54, %v4638_v30 }
 0x3cc   :  { %v4739_v53 = vrot.slane %v4438_v25, %v7356_v14  ;;  %v4705_v14 = vrot.slane %v4417_v38, %v7367_v35  ;;  %v4715_v35 = vrot.slane %v4423_v24, %v7377_v26 }
 0x3ce   :  { %v4740_v62 = vsel %vm3368_vm13, %v4739_v53, %v4735_v20  ;;  %v4706_v8 = vsel %vm3375_vm14, %v4705_v14, %v4701_v17  ;;  %vm9338_vm13 = vmmov %vm9329_vm2 }
 0x3cf   :  { %v4420_v0 = vpop.permute.xlu1 %4419  ;;  %v4745_v28 = vsel %vm3375_vm14, %v4744_v13, %v4740_v62  ;;  %vm9339_vm14 = vcmask 1044484  }
 0x3d0   :  { %v4710_v52 = vrot.slane %v4420_v0, %v7578_v18  ;;  %v4648_v0 = vsel %vm3403_vm9, %v4647_v40, %v4643_v36 }
 0x3d1   :  { %v4769_v26 = vsel %vm9339_vm14, %v4648_v0, %v8260_v43 }
 0x3d2   :  { %v4711_v9 = vsel %vm9337_vm12, %v4710_v52, %v4706_v8 }
 0x3d3   :  { %v4402_v45 = vpop.permute.xlu1 %4401  ;;  %v4716_v44 = vsel %vm3389_vm11, %v4715_v35, %v4711_v9 }
 0x3d4   :  { %v4681_v39 = vrot.slane %v4402_v45, %v7586_v34 }
 0x3d7   :  { %v4444_v32 = vpop.permute.xlu1 %4443 }
 0x3d8   :  { %v4749_v57 = vrot.slane %v4444_v32, %v7578_v18  ;;  %v4677_v18 = vsel %vm3389_vm11, %v4676_v55, %v4672_v29 }
 0x3d9   :  { %v4682_v22 = vsel %vm3396_vm10, %v4681_v39, %v4677_v18 }
 0x3da   :  { %v4750_v51 = vsel %vm9338_vm13, %v4749_v57, %v4745_v28  ;;  %v4687_v24 = vsel %vm3403_vm9, %v4686_v12, %v4682_v22 }
 0x3db   :  { %v4426_v21 = vpop.permute.xlu1 %4425  ;;  %v4755_v15 = vsel %vm3389_vm11, %v4754_v1, %v4750_v51  ;;  %v4770_v63 = vsel %vm9340_vm5, %v4687_v24, %v4769_v26 }
 0x3dc   :  { %v4720_v38 = vrot.slane %v4426_v21, %v7586_v34  ;;  %v4760_v59 = vsel %vm3396_vm10, %v4759_v31, %v4755_v15 }
 0x3de   :  { %v4721_v48 = vsel %vm3396_vm10, %v4720_v38, %v4716_v44 }
 0x3df   :  { %v4429_v33 = vpop.permute.xlu1 %4428 }
 0x3e0   :  { %v4725_v25 = vrot.slane %v4429_v33, %v7537_v4 }
 0x3e2   :  { %v4726_v45 = vsel %vm3403_vm9, %v4725_v25, %v4721_v48 }
 0x3e3   :  { %v4453_v42 = vpop.permute.xlu1 %4452  ;;  %v4771_v49 = vsel %vm3154_vm1, %v4726_v45, %v4770_v63 }
 0x3e4   :  { %v4764_v16 = vrot.slane %v4453_v42, %v7537_v4 }
 0x3e6   :  { %v4765_v10 = vsel %vm3403_vm9, %v4764_v16, %v4760_v59 }
 0x3e7   :  { %v4772_v11 = vsel %vm3156_vm0, %v4765_v10, %v4771_v49 }
 0x3e8   :  { %v4776_v34 = vsel %vm4774_vm3, %v8186_v23, %v4772_v11 }
 0x3e9   :  { %4778 = vst [vmem:[%s8340_s1 + $0x8] sm:$0xff] %v4776_v34 }

</bundles_post_ra>
